<compile_context>
chip_gen: v7x
topology: tpu7x:2x2x1
jax: 0.10.0
libtpu: 0.0.40
codegen_flags: <defaults>
</compile_context>

<pallas_src>
import functools

import numpy as np
import jax
import jax.numpy as jnp
from jax import lax
from jax.experimental import pallas as pl
from jax.experimental.pallas import tpu as pltpu


# ----------------------------------------------------------------------------
# Kernel: one block of `block_batch` batch elements per grid step, all in VMEM.
# ----------------------------------------------------------------------------
def _mha_kernel(x_ref, wqkv_ref, wproj_ref, bproj_ref, o_ref, *,
                num_heads, head_dim):
    bt, s, d = x_ref.shape
    scale = head_dim ** (-0.5)

    # Fused QKV projection: flatten (bt, s) -> rows so the MXU is fed bt*s rows at once.
    x_bf = x_ref[...].reshape(bt * s, d).astype(jnp.bfloat16)
    qkv = jnp.dot(x_bf, wqkv_ref[...],
                  preferred_element_type=jnp.float32)          # (bt*s, 3d) f32
    qkv = qkv.reshape(bt, s, 3 * d)

    acc = jnp.zeros((bt, s, d), jnp.float32)
    for h in range(num_heads):                                  # static, small head count
        lo = h * head_dim
        # 128-aligned lane slices of the fused QKV result (no relayout for head_dim % 128 == 0).
        q = (qkv[:, :, lo:lo + head_dim] * scale).astype(jnp.bfloat16)
        k = qkv[:, :, d + lo:d + lo + head_dim].astype(jnp.bfloat16)
        v = qkv[:, :, 2 * d + lo:2 * d + lo + head_dim].astype(jnp.bfloat16)

        # Batched attention over the bt batch elements in this block.
        att = jnp.einsum('bqe,bke->bqk', q, k,
                         preferred_element_type=jnp.float32)    # (bt, s, s) f32
        att = jnp.exp(att - jnp.max(att, axis=-1, keepdims=True))
        att = att * pl.reciprocal(jnp.sum(att, axis=-1, keepdims=True), approx=True)

        hv = jnp.einsum('bqk,bke->bqe', att.astype(jnp.bfloat16), v,
                        preferred_element_type=jnp.float32)     # (bt, s, head_dim)

        # Accumulate the output projection per head (no concat of head outputs).
        acc = acc + jnp.einsum('bse,ed->bsd', hv.astype(jnp.bfloat16), wproj_ref[h],
                               preferred_element_type=jnp.float32)

    o_ref[...] = acc + bproj_ref[...]                           # (1, d) broadcasts over (bt, s, d)


# ----------------------------------------------------------------------------
# Host-side wrapper
# ----------------------------------------------------------------------------
def _pick_block_batch(B, S):
    """Pack enough batch elements per step to feed the MXU >=128 (ideally 256) rows,
    while keeping >= 2 grid steps so both v7x TensorCores are used."""
    bt = max(1, min(B, 256 // max(S, 1)))
    while bt > 1 and B % bt != 0:
        bt -= 1
    while bt > 1 and (B // bt) < 2:
        bt -= 1
        while bt > 1 and B % bt != 0:
            bt -= 1
    return bt


def mha_forward(x, wqkv_t, wproj_t, bproj, *, num_heads, block_batch=None):
    """x: (B, S, D) f32.  wqkv_t: (D, 3D).  wproj_t: (D, D).  bproj: (D,)."""
    B, S, D = x.shape
    assert D % num_heads == 0
    hd = D // num_heads
    if block_batch is None:
        block_batch = _pick_block_batch(B, S)
    assert B % block_batch == 0
    grid = (B // block_batch,)

    # Weight preprocessing (host side): bf16 storage, per-head split of the proj weight.
    wqkv_bf = wqkv_t.astype(jnp.bfloat16)                     # (D, 3D)
    wproj_bf = wproj_t.reshape(num_heads, hd, D).astype(jnp.bfloat16)
    bproj2 = bproj.reshape(1, D).astype(jnp.float32)

    in_specs = [
        pl.BlockSpec((block_batch, S, D), lambda b: (b, 0, 0)),   # x
        pl.BlockSpec((D, 3 * D), lambda b: (0, 0)),               # fused QKV weight (bf16)
        pl.BlockSpec((num_heads, hd, D), lambda b: (0, 0, 0)),    # per-head proj weight (bf16)
        pl.BlockSpec((1, D), lambda b: (0, 0)),                   # proj bias (f32)
    ]

    kernel = functools.partial(_mha_kernel, num_heads=num_heads, head_dim=hd)

    return pl.pallas_call(
        kernel,
        out_shape=jax.ShapeDtypeStruct((B, S, D), jnp.float32),
        grid_spec=pltpu.PrefetchScalarGridSpec(
            num_scalar_prefetch=0,
            grid=grid,
            in_specs=in_specs,
            out_specs=pl.BlockSpec((block_batch, S, D), lambda b: (b, 0, 0)),
        ),
        compiler_params=pltpu.CompilerParams(dimension_semantics=("parallel",)),
    )(x, wqkv_bf, wproj_bf, bproj2)


# ----------------------------------------------------------------------------
# Pure-JAX f32 reference (mirrors the PyTorch module)
# ----------------------------------------------------------------------------
def mha_reference(x, wqkv_t, wproj_t, bproj, *, num_heads):
    HI = lax.Precision.HIGHEST
    B, S, D = x.shape
    hd = D // num_heads
    scale = hd ** (-0.5)
    qkv = jnp.einsum('bsd,de->bse', x, wqkv_t, precision=HI)
    qkv = qkv.reshape(B, S, 3, num_heads, hd).transpose(2, 0, 3, 1, 4)
    q, k, v = qkv[0] * scale, qkv[1], qkv[2]
    att = jax.nn.softmax(jnp.einsum('bhqe,bhke->bhqk', q, k, precision=HI), axis=-1)
    o = jnp.einsum('bhqk,bhke->bhqe', att, v, precision=HI)
    o = o.transpose(0, 2, 1, 3).reshape(B, S, D)
    return jnp.einsum('bsd,de->bse', o, wproj_t, precision=HI) + bproj


# ----------------------------------------------------------------------------
if __name__ == "__main__":
    # Small, TPU-friendly shapes: dim=256, 2 heads -> head_dim=128 (lane aligned),
    # seq=128, batch=4 packed 2-per-step -> 256 MXU rows per step, 2 parallel grid steps.
    B, S, D, H = 4, 128, 256, 2

    key = jax.random.PRNGKey(0)
    k1, k2, k3, k4 = jax.random.split(key, 4)
    x = jax.random.normal(k1, (B, S, D), jnp.float32)
    wqkv_t = jax.random.normal(k2, (D, 3 * D), jnp.float32) * (D ** -0.5)   # qkv Linear (no bias), pre-transposed
    wproj_t = jax.random.normal(k3, (D, D), jnp.float32) * (D ** -0.5)      # proj Linear weight, pre-transposed
    bproj = jax.random.normal(k4, (D,), jnp.float32) * 0.02                 # proj Linear bias

    out = mha_forward(x, wqkv_t, wproj_t, bproj, num_heads=H)
    out = jax.block_until_ready(out)

    ref = jax.block_until_ready(mha_reference(x, wqkv_t, wproj_t, bproj, num_heads=H))

    assert out.shape == (B, S, D), out.shape
    # bf16 weights / bf16 matmul operands with f32 accumulation vs f32 reference.
    np.testing.assert_allclose(np.asarray(out), np.asarray(ref), rtol=2e-2, atol=2e-2)

    print("KERNEL_OK")
</pallas_src>

<mosaic_0001>
module attributes {stable_mosaic.version = 11 : i64} {
  func.func @_mha_kernel(%arg0: i32, %arg1: memref<2x128x256xf32, #tpu.memory_space<vmem>>, %arg2: memref<256x768xbf16, #tpu.memory_space<vmem>>, %arg3: memref<2x128x256xbf16, #tpu.memory_space<vmem>>, %arg4: memref<1x256xf32, #tpu.memory_space<vmem>>, %arg5: memref<2x128x256xf32, #tpu.memory_space<vmem>>) attributes {dimension_semantics = [#tpu.dimension_semantics<parallel>], iteration_bounds = array<i64: 2>, scalar_prefetch = 0 : i64, scratch_operands = 0 : i64, tpu.core_type = #tpu.core_type<tc>, window_params = [{transform_indices = @transform_0, window_bounds = array<i64: 2, 128, 256>}, {pipeline_mode = #tpu.pipeline_mode<synchronous>, transform_indices = @transform_1, window_bounds = array<i64: 256, 768>}, {pipeline_mode = #tpu.pipeline_mode<synchronous>, transform_indices = @transform_2, window_bounds = array<i64: 2, 128, 256>}, {pipeline_mode = #tpu.pipeline_mode<synchronous>, transform_indices = @transform_3, window_bounds = array<i64: 1, 256>}, {transform_indices = @transform_4, window_bounds = array<i64: 2, 128, 256>}]} {
    %c0 = arith.constant 0 : index
    %c0_0 = arith.constant 0 : index
    %c0_1 = arith.constant 0 : index
    %0 = vector.load %arg1[%c0, %c0_0, %c0_1] : memref<2x128x256xf32, #tpu.memory_space<vmem>>, vector<2x128x256xf32>
    %1 = vector.shape_cast %0 : vector<2x128x256xf32> to vector<256x256xf32>
    %2 = arith.truncf %1 : vector<256x256xf32> to vector<256x256xbf16>
    %c0_2 = arith.constant 0 : index
    %c0_3 = arith.constant 0 : index
    %3 = vector.load %arg2[%c0_2, %c0_3] : memref<256x768xbf16, #tpu.memory_space<vmem>>, vector<256x768xbf16>
    %cst = arith.constant dense<0.000000e+00> : vector<256x768xf32>
    %4 = tpu.matmul %2, %3, %cst {dimension_numbers = #tpu.dot_dimension_numbers<[1], [0], [0], [1], [0, 0, 1, 1], [], []>} : vector<256x256xbf16>, vector<256x768xbf16>, vector<256x768xf32> -> vector<256x768xf32>
    %5 = vector.shape_cast %4 : vector<256x768xf32> to vector<2x128x768xf32>
    %cst_4 = arith.constant 0.000000e+00 : f32
    %6 = vector.broadcast %cst_4 : f32 to vector<2x128x256xf32>
    %7 = vector.extract_strided_slice %5 {offsets = [0, 0, 0], sizes = [2, 128, 128], strides = [1, 1, 1]} : vector<2x128x768xf32> to vector<2x128x128xf32>
    %cst_5 = arith.constant 0.0883883461 : f32
    %8 = vector.broadcast %cst_5 : f32 to vector<2x128x128xf32>
    %9 = arith.mulf %7, %8 : vector<2x128x128xf32>
    %10 = arith.truncf %9 : vector<2x128x128xf32> to vector<2x128x128xbf16>
    %11 = vector.extract_strided_slice %5 {offsets = [0, 0, 256], sizes = [2, 128, 128], strides = [1, 1, 1]} : vector<2x128x768xf32> to vector<2x128x128xf32>
    %12 = arith.truncf %11 : vector<2x128x128xf32> to vector<2x128x128xbf16>
    %13 = vector.extract_strided_slice %5 {offsets = [0, 0, 512], sizes = [2, 128, 128], strides = [1, 1, 1]} : vector<2x128x768xf32> to vector<2x128x128xf32>
    %14 = arith.truncf %13 : vector<2x128x128xf32> to vector<2x128x128xbf16>
    "tpu.trace_start"() <{level = 10 : i32, message = "bqe,bke->bqk"}> : () -> ()
    %cst_6 = arith.constant dense<0.000000e+00> : vector<2x128x128xf32>
    %15 = tpu.matmul %10, %12, %cst_6 {dimension_numbers = #tpu.dot_dimension_numbers<[2], [2], [1], [1], [0, 0, 0, 1, 1, 1], [0], [0]>} : vector<2x128x128xbf16>, vector<2x128x128xbf16>, vector<2x128x128xf32> -> vector<2x128x128xf32>
    "tpu.trace_stop"() : () -> ()
    %cst_7 = arith.constant dense<0xFF800000> : vector<2x128xf32>
    %16 = vector.multi_reduction <maximumf>, %15, %cst_7 [2] : vector<2x128x128xf32> to vector<2x128xf32>
    %17 = vector.shape_cast %16 : vector<2x128xf32> to vector<2x128x1xf32>
    %18 = vector.broadcast %17 : vector<2x128x1xf32> to vector<2x128x128xf32>
    %19 = arith.subf %15, %18 : vector<2x128x128xf32>
    %20 = math.exp %19 : vector<2x128x128xf32>
    %cst_8 = arith.constant dense<0.000000e+00> : vector<2x128xf32>
    %21 = vector.multi_reduction <add>, %20, %cst_8 [2] : vector<2x128x128xf32> to vector<2x128xf32>
    %22 = vector.shape_cast %21 : vector<2x128xf32> to vector<2x128x1xf32>
    %23 = tpu.reciprocal %22 {approx = true} : vector<2x128x1xf32> -> vector<2x128x1xf32>
    %24 = vector.broadcast %23 : vector<2x128x1xf32> to vector<2x128x128xf32>
    %25 = arith.mulf %20, %24 : vector<2x128x128xf32>
    %26 = arith.truncf %25 : vector<2x128x128xf32> to vector<2x128x128xbf16>
    "tpu.trace_start"() <{level = 10 : i32, message = "bqk,bke->bqe"}> : () -> ()
    %cst_9 = arith.constant dense<0.000000e+00> : vector<2x128x128xf32>
    %27 = tpu.matmul %26, %14, %cst_9 {dimension_numbers = #tpu.dot_dimension_numbers<[2], [1], [1], [2], [0, 0, 0, 1, 1, 2], [0], [0]>} : vector<2x128x128xbf16>, vector<2x128x128xbf16>, vector<2x128x128xf32> -> vector<2x128x128xf32>
    "tpu.trace_stop"() : () -> ()
    %28 = arith.truncf %27 : vector<2x128x128xf32> to vector<2x128x128xbf16>
    %c0_10 = arith.constant 0 : index
    %c0_11 = arith.constant 0 : index
    %c0_12 = arith.constant 0 : index
    %29 = vector.load %arg3[%c0_10, %c0_11, %c0_12] : memref<2x128x256xbf16, #tpu.memory_space<vmem>>, vector<1x128x256xbf16>
    %30 = vector.shape_cast %29 : vector<1x128x256xbf16> to vector<128x256xbf16>
    "tpu.trace_start"() <{level = 10 : i32, message = "bse,ed->bsd"}> : () -> ()
    %cst_13 = arith.constant dense<0.000000e+00> : vector<2x128x256xf32>
    %31 = tpu.matmul %28, %30, %cst_13 {dimension_numbers = #tpu.dot_dimension_numbers<[2], [0], [0, 1], [1], [0, 0, 0, 1, 1, 1], [], []>} : vector<2x128x128xbf16>, vector<128x256xbf16>, vector<2x128x256xf32> -> vector<2x128x256xf32>
    "tpu.trace_stop"() : () -> ()
    %32 = arith.addf %6, %31 : vector<2x128x256xf32>
    %33 = vector.extract_strided_slice %5 {offsets = [0, 0, 128], sizes = [2, 128, 128], strides = [1, 1, 1]} : vector<2x128x768xf32> to vector<2x128x128xf32>
    %cst_14 = arith.constant 0.0883883461 : f32
    %34 = vector.broadcast %cst_14 : f32 to vector<2x128x128xf32>
    %35 = arith.mulf %33, %34 : vector<2x128x128xf32>
    %36 = arith.truncf %35 : vector<2x128x128xf32> to vector<2x128x128xbf16>
    %37 = vector.extract_strided_slice %5 {offsets = [0, 0, 384], sizes = [2, 128, 128], strides = [1, 1, 1]} : vector<2x128x768xf32> to vector<2x128x128xf32>
    %38 = arith.truncf %37 : vector<2x128x128xf32> to vector<2x128x128xbf16>
    %39 = vector.extract_strided_slice %5 {offsets = [0, 0, 640], sizes = [2, 128, 128], strides = [1, 1, 1]} : vector<2x128x768xf32> to vector<2x128x128xf32>
    %40 = arith.truncf %39 : vector<2x128x128xf32> to vector<2x128x128xbf16>
    "tpu.trace_start"() <{level = 10 : i32, message = "bqe,bke->bqk"}> : () -> ()
    %cst_15 = arith.constant dense<0.000000e+00> : vector<2x128x128xf32>
    %41 = tpu.matmul %36, %38, %cst_15 {dimension_numbers = #tpu.dot_dimension_numbers<[2], [2], [1], [1], [0, 0, 0, 1, 1, 1], [0], [0]>} : vector<2x128x128xbf16>, vector<2x128x128xbf16>, vector<2x128x128xf32> -> vector<2x128x128xf32>
    "tpu.trace_stop"() : () -> ()
    %cst_16 = arith.constant dense<0xFF800000> : vector<2x128xf32>
    %42 = vector.multi_reduction <maximumf>, %41, %cst_16 [2] : vector<2x128x128xf32> to vector<2x128xf32>
    %43 = vector.shape_cast %42 : vector<2x128xf32> to vector<2x128x1xf32>
    %44 = vector.broadcast %43 : vector<2x128x1xf32> to vector<2x128x128xf32>
    %45 = arith.subf %41, %44 : vector<2x128x128xf32>
    %46 = math.exp %45 : vector<2x128x128xf32>
    %cst_17 = arith.constant dense<0.000000e+00> : vector<2x128xf32>
    %47 = vector.multi_reduction <add>, %46, %cst_17 [2] : vector<2x128x128xf32> to vector<2x128xf32>
    %48 = vector.shape_cast %47 : vector<2x128xf32> to vector<2x128x1xf32>
    %49 = tpu.reciprocal %48 {approx = true} : vector<2x128x1xf32> -> vector<2x128x1xf32>
    %50 = vector.broadcast %49 : vector<2x128x1xf32> to vector<2x128x128xf32>
    %51 = arith.mulf %46, %50 : vector<2x128x128xf32>
    %52 = arith.truncf %51 : vector<2x128x128xf32> to vector<2x128x128xbf16>
    "tpu.trace_start"() <{level = 10 : i32, message = "bqk,bke->bqe"}> : () -> ()
    %cst_18 = arith.constant dense<0.000000e+00> : vector<2x128x128xf32>
    %53 = tpu.matmul %52, %40, %cst_18 {dimension_numbers = #tpu.dot_dimension_numbers<[2], [1], [1], [2], [0, 0, 0, 1, 1, 2], [0], [0]>} : vector<2x128x128xbf16>, vector<2x128x128xbf16>, vector<2x128x128xf32> -> vector<2x128x128xf32>
    "tpu.trace_stop"() : () -> ()
    %54 = arith.truncf %53 : vector<2x128x128xf32> to vector<2x128x128xbf16>
    %c1 = arith.constant 1 : index
    %c0_19 = arith.constant 0 : index
    %c0_20 = arith.constant 0 : index
    %55 = vector.load %arg3[%c1, %c0_19, %c0_20] : memref<2x128x256xbf16, #tpu.memory_space<vmem>>, vector<1x128x256xbf16>
    %56 = vector.shape_cast %55 : vector<1x128x256xbf16> to vector<128x256xbf16>
    "tpu.trace_start"() <{level = 10 : i32, message = "bse,ed->bsd"}> : () -> ()
    %cst_21 = arith.constant dense<0.000000e+00> : vector<2x128x256xf32>
    %57 = tpu.matmul %54, %56, %cst_21 {dimension_numbers = #tpu.dot_dimension_numbers<[2], [0], [0, 1], [1], [0, 0, 0, 1, 1, 1], [], []>} : vector<2x128x128xbf16>, vector<128x256xbf16>, vector<2x128x256xf32> -> vector<2x128x256xf32>
    "tpu.trace_stop"() : () -> ()
    %58 = arith.addf %32, %57 : vector<2x128x256xf32>
    %c0_22 = arith.constant 0 : index
    %c0_23 = arith.constant 0 : index
    %59 = vector.load %arg4[%c0_22, %c0_23] : memref<1x256xf32, #tpu.memory_space<vmem>>, vector<1x256xf32>
    %60 = vector.shape_cast %59 : vector<1x256xf32> to vector<1x1x256xf32>
    %61 = vector.broadcast %60 : vector<1x1x256xf32> to vector<2x128x256xf32>
    %62 = arith.addf %58, %61 : vector<2x128x256xf32>
    %c0_24 = arith.constant 0 : index
    %c0_25 = arith.constant 0 : index
    %c0_26 = arith.constant 0 : index
    %63 = vector.load %arg5[%c0_24, %c0_25, %c0_26] : memref<2x128x256xf32, #tpu.memory_space<vmem>>, vector<2x128x256xf32>
    tpu.vector_store %arg5[%c0_24, %c0_25, %c0_26], %62 {strides = array<i32>} : memref<2x128x256xf32, #tpu.memory_space<vmem>>, vector<2x128x256xf32>,
    return
  }
  func.func @transform_0(%arg0: i32) -> (i32, i32, i32) {
    %c0_i32 = arith.constant 0 : i32
    %c0_i32_0 = arith.constant 0 : i32
    %c0_i32_1 = arith.constant 0 : i32
    return %arg0, %c0_i32, %c0_i32_0 : i32, i32, i32
  }
  func.func @transform_1(%arg0: i32) -> (i32, i32) {
    %c0_i32 = arith.constant 0 : i32
    %c0_i32_0 = arith.constant 0 : i32
    %c0_i32_1 = arith.constant 0 : i32
    return %c0_i32, %c0_i32_0 : i32, i32
  }
  func.func @transform_2(%arg0: i32) -> (i32, i32, i32) {
    %c0_i32 = arith.constant 0 : i32
    %c0_i32_0 = arith.constant 0 : i32
    %c0_i32_1 = arith.constant 0 : i32
    %c0_i32_2 = arith.constant 0 : i32
    return %c0_i32, %c0_i32_0, %c0_i32_1 : i32, i32, i32
  }
  func.func @transform_3(%arg0: i32) -> (i32, i32) {
    %c0_i32 = arith.constant 0 : i32
    %c0_i32_0 = arith.constant 0 : i32
    %c0_i32_1 = arith.constant 0 : i32
    return %c0_i32, %c0_i32_0 : i32, i32
  }
  func.func @transform_4(%arg0: i32) -> (i32, i32, i32) {
    %c0_i32 = arith.constant 0 : i32
    %c0_i32_0 = arith.constant 0 : i32
    %c0_i32_1 = arith.constant 0 : i32
    return %arg0, %c0_i32, %c0_i32_0 : i32, i32, i32
  }
}

</mosaic_0001>

<bundles_post_ra>
// kernel: tpu_custom_call.1
= control target key start
LH: loop header
LB: loop body
LE: loop exit
PB: predicated region body
PF: predicated region fallthrough
CT: control target
= control target key end

     0   :  { %9 = vsyncpa [#allocation3], 0  ;;  %s7097_s0 = inlined_call_operand.hbm [shape: f32[4,128,256], index: 0, kind: input, shape index: {}]   ;;  %s7098_s1 = inlined_call_operand.hbm [shape: bf16[256,768], index: 1, kind: input, shape index: {}]   ;;  %s7099_s2 = inlined_call_operand.hbm [shape: bf16[2,128,256], index: 2, kind: input, shape index: {}]   ;;  %s7100_s3 = inlined_call_operand.vmem [shape: f32[1,256], index: 3, kind: input, shape index: {}]   ;;  %s7101_s4 = inlined_call_operand.hbm [shape: f32[4,128,256], index: 4, kind: output, shape index: {}]  }
   0x1   :  { %11 = vsyncpa [#allocation3 + $0x1], 0 }
   0x2   :  { %12 = vsyncpa [#allocation6], 0 }
   0x3   :  { %13 = vsyncpa [#allocation4], 0 }
   0x4   :  { %15 = vsyncpa [#allocation4 + $0x1], 0  ;;  %s5238_s15 = smov 0   ;;  %s5240_s16 = smov 0  }
   0x5   :  { %s5242_s17 = smov 0   ;;  %s5244_s18 = smov 0  }
   0x6 LB: > { %s5259_s19 = sadd.s32 4294967295, %s5198_s18   ;;  %s3902_s20 = sadd.s32 4294967294, %s5198_s18   ;;  %s5198_s18 = sphi %s5244_s18, %s7350_s18   ;;  %s5194_s17 = sphi %s5242_s17, %s7349_s17   ;;  %s5190_s16 = sphi %s5240_s16, %s7348_s16   ;;  %s5186_s15 = sphi %s5238_s15, %s7347_s15  }
   0x7   : > { %p41_p0 = scmp.ne.s32.totalorder %s5190_s16, %s5186_s15  ;;  %p7102_p1 = scmp.eq.s32.totalorder %s5259_s19, 0 }
   0x8   : > { %p134_p3 = scmp.eq.s32.totalorder %s3902_s20, 1  ;;  %p3903_p5 = scmp.ge.s32.totalorder %s5198_s18, 1 }
   0x9   : > { %p5268_p4 = por %p7102_p1, %p41_p0  ;;  %p141_p7 = scmp.lt.s32.totalorder %s5198_s18, 3 }
   0xa   : > { %p5273_p6 = por %p134_p3, %p41_p0  ;;  %s5200_s24 = smov [#allocation5]  }
   0xb   : > { %s7169_s21 = scalar_select %p5268_p4, 1, 0 }
   0xc   : > { %s7170_s22 = scalar_select %p5273_p6, 1, 0 }
   0xd   : > { %p5278_p8 = pnand %p3903_p5, %p141_p7  ;;  %s153_s25 = sshll.u32 %s5200_s24, 4  ;;  %s5282_s25 = int_to_ptr.vmem [resolvable:$true] %s153_s25 }
   0xe   : > { %s5201_s27 = smov [#allocation7]   ;;  %s5042_s5 = scalar_lea.hbm %s7098_s1, 12288 }
   0xf   : > { %p4530_p9 = pneg %p5278_p8  ;;  %s166_s28 = sshll.u32 %s5201_s27, 4  ;;  %s5293_s28 = int_to_ptr.vmem [resolvable:$true] %s166_s28 }
  0x10   : > { %p5043_p12 = scmp.ne.s32.totalorder %s7098_s1, %s5042_s5  ;;  %p5049_p5 = scmp.lt.u32.totalorder %s5042_s5, %s7098_s1 }
  0x11   : > { %p5289_p11 = pnand %p4530_p9, %p7102_p1 }
  0x13   : > { %p5044_p13 = pneg %p5289_p11 }
  0x15   : > { %p5045_p0 = pnand %p5044_p13, %p5043_p12 }
  0x17   : > { %p5046_p3 = pneg %p5045_p0 }
  0x19   : > { %p5051_p7 = pnand %p5049_p5, %p5046_p3 }
  0x1b   : > { %5054 = shalt.err (!%p5051_p7)
}
  0x1c   : > { %s5055_s10 = scalar_lea.vmem %s5282_s25, 12288  ;;  %p5063_p2 = scmp.lt.s32.totalorder %s5282_s25, %s5282_s25 }
  0x1d   : > { %p5056_p9 = scmp.ne.s32.totalorder %s5282_s25, %s5055_s10  ;;  %p5064_p12 = scmp.lt.s32.totalorder %s5055_s10, %s5055_s10 }
  0x1f   : > { %p5058_p10 = pnand %p5056_p9, %p5044_p13  ;;  %p5065_p0 = por %p5064_p12, %p5063_p2 }
  0x21   : > { %p5059_p1 = pneg %p5058_p10 }
  0x23   : > { %p5066_p6 = pnand %p5065_p0, %p5059_p1 }
  0x25   : > { %5069 = shalt.err (!%p5066_p6)
}
  0x26   : > { %s5202_s11 = smov 384   ;;  %s5203_s12 = smov 24  }
  0x27   : > { %4533 = dma.hbm_to_vmem [thread:$0]  (!%p5289_p11), %s7098_s1, 12288, %s5282_s25, [#allocation6], %s5202_s11, %s5202_s11, %s5203_s12  }
  0x28   : > { %s5070_s27 = scalar_lea.hbm %s7099_s2, 4096 }
  0x29   : > { %p5071_p2 = scmp.ne.s32.totalorder %s7099_s2, %s5070_s27  ;;  %p5077_p10 = scmp.lt.u32.totalorder %s5070_s27, %s7099_s2 }
  0x2b   : > { %p5073_p1 = pnand %p5071_p2, %p5044_p13 }
  0x2d   : > { %p5074_p6 = pneg %p5073_p1 }
  0x2f   : > { %p5079_p3 = pnand %p5077_p10, %p5074_p6 }
  0x31   : > { %5082 = shalt.err (!%p5079_p3)
}
  0x32   : > { %s5083_s25 = scalar_lea.vmem %s5293_s28, 4096  ;;  %p5091_p12 = scmp.lt.s32.totalorder %s5293_s28, %s5293_s28 }
  0x33   : > { %p5084_p5 = scmp.ne.s32.totalorder %s5293_s28, %s5083_s25  ;;  %p5092_p0 = scmp.lt.s32.totalorder %s5083_s25, %s5083_s25 }
  0x35   : > { %p5086_p7 = pnand %p5084_p5, %p5044_p13  ;;  %p5093_p2 = por %p5092_p0, %p5091_p12 }
  0x37   : > { %p5087_p9 = pneg %p5086_p7 }
  0x39   : > { %p5094_p1 = pnand %p5093_p2, %p5087_p9 }
  0x3b   : > { %5097 = shalt.err (!%p5094_p1)
}
  0x3c   : > { %s5204_s7 = smov 128   ;;  %s5205_s8 = smov 8  }
  0x3d   : > { %4536 = dma.hbm_to_vmem [thread:$0]  (!%p5289_p11), %s7099_s2, 4096, %s5293_s28, [#allocation6], %s5204_s7, %s5204_s7, %s5205_s8  }
  0x3e   : > { %s5348_s11 = sadd.s32 1, %s5198_s18   ;;  %s28_s13 = sadd.s32 1, %s5194_s17 }
  0x3f   : > { %s25_s12 = ssub.s32 %s5198_s18, %s5348_s11  ;;  %p35_p6 = scmp.ne.s32.totalorder %s5194_s17, %s5190_s16 }
  0x40   : > { %p26_p13 = scmp.eq.s32.totalorder %s25_s12, 0  ;;  %p36_p10 = scmp.eq.s32.totalorder %s5198_s18, 0 }
  0x41   : > { %p7173_p5 = scmp.eq.s32.totalorder %s5259_s19, 1  ;;  %p4547_p9 = scmp.lt.s32.totalorder %s5198_s18, 2 }
  0x42   : > { %s5357_s14 = scalar_select %p26_p13, %s5194_s17, %s28_s13  }
  0x43   : > { %p37_p3 = por %p36_p10, %p35_p6  ;;  %p5361_p7 = por %p7173_p5, %p35_p6 }
  0x44   : > { %s183_s26 = sand.u32 1, %s5194_s17   ;;  %s4051_s28 = sshll.u32 %s5198_s18, 13 }
  0x45   : > { %s7174_s20 = scalar_select %p5361_p7, 1, 0 }
  0x46   : > { %s3907_s24 = sshll.u32 %s183_s26, 9  ;;  %s5371_s30 = scalar_lea.hbm %s7097_s0, %s4051_s28 }
  0x47   : > { %s187_s5 = scalar_lea.vmem [#allocation2], %s3907_s24  ;;  %p5375_p11 = pnand %p4547_p9, %p37_p3 }
  0x48   : > { %s195_s6 = sshll.u32 %s187_s5, 4  ;;  %s5379_s7 = scalar_lea.sflag [#allocation3], %s183_s26  ;;  %s5373_s6 = int_to_ptr.vmem [resolvable:$true] %s195_s6 }
  0x49   : > { %s5098_s8 = scalar_lea.hbm %s5371_s30, 8192  ;;  %p5100_p0 = pneg %p5375_p11 }
  0x4a   : > { %p5099_p12 = scmp.ne.s32.totalorder %s5371_s30, %s5098_s8  ;;  %s5103_s12 = scalar_lea.hbm %s7097_s0, 16384 }
  0x4b   : > { %p5104_p13 = scmp.lt.u32.totalorder %s5371_s30, %s7097_s0  ;;  %p5105_p6 = scmp.lt.u32.totalorder %s5103_s12, %s5098_s8 }
  0x4c   : > { %p5101_p2 = pnand %p5100_p0, %p5099_p12  ;;  %p5107_p3 = scmp.lt.u32.totalorder %s5098_s8, %s5371_s30 }
  0x4d   : > { %p5106_p10 = por %p5105_p6, %p5104_p13 }
  0x4e   : > { %p5102_p1 = pneg %p5101_p2 }
  0x4f   : > { %p5108_p5 = por %p5107_p3, %p5106_p10 }
  0x51   : > { %p5109_p9 = pnand %p5108_p5, %p5102_p1 }
  0x53   : > { %5112 = shalt.err (!%p5109_p9)
}
  0x54   : > { %s5113_s26 = scalar_lea.vmem %s5373_s6, 8192  ;;  %s5206_s28 = smov [#allocation2]  }
  0x55   : > { %p5114_p12 = scmp.ne.s32.totalorder %s5373_s6, %s5113_s26  ;;  %s5118_s27 = sshll.u32 %s5206_s28, 4  ;;  %s5119_s27 = int_to_ptr.vmem [resolvable:$false] %s5118_s27 }
  0x56   : > { %s5120_s29 = scalar_lea.vmem %s5119_s27, 16384  ;;  %p5121_p4 = scmp.lt.s32.totalorder %s5373_s6, %s5119_s27 }
  0x57   : > { %p5116_p2 = pnand %p5114_p12, %p5100_p0  ;;  %p5122_p13 = scmp.lt.s32.totalorder %s5120_s29, %s5113_s26 }
  0x59   : > { %p5117_p7 = pneg %p5116_p2  ;;  %p5123_p6 = por %p5122_p13, %p5121_p4 }
  0x5b   : > { %p5124_p10 = pnand %p5123_p6, %p5117_p7 }
  0x5d   : > { %5127 = shalt.err (!%p5124_p10)
}
  0x5e   : > { %s5207_s5 = smov 256   ;;  %s5208_s8 = smov 16  }
  0x5f   : > { %4540 = dma.hbm_to_vmem [thread:$0]  (!%p5375_p11), %s5371_s30, 8192, %s5373_s6, %s5379_s7, %s5207_s5, %s5207_s5, %s5208_s8  }
  0x60   : > { %207 = sbr.rel (%p5278_p8) target bundleno = 2243 (0x8c3), region = 36 }
  0x67   : > { %s5410_s9 = sand.u32 1, %s5190_s16   ;;  %p7176_p4 = scmp.ne.s32.totalorder %s7169_s21, 0 }
  0x68   : > { %s3912_s10 = sshll.u32 %s5410_s9, 9  ;;  %s210_s12 = scalar_lea.sflag [#allocation3], %s5410_s9 }
  0x69   : > { %s5416_s13 = scalar_lea.vmem [#allocation2], %s3912_s10 }
  0x6a   : > { %5173 = dma.done.wait (%p7176_p4), %s210_s12, 8192  }
  0x6b   : > { %5175 = vsyncadd (%p7176_p4), %s210_s12, 4294959104  ;;  %p7177_p7 = scmp.eq.s32.totalorder %s5259_s19, 0 }
  0x6d   : > { %5177 = dma.done.wait (%p7177_p7), [#allocation6], 16384   ;;  %p7178_p8 = pmov %p7177_p7 }
  0x6e   : > { %v4594_v0 = vld [vmem:[#allocation5 + $0x4] ss:$24 sps:$4 sm:$0xff]   ;;  %v4598_v2 = vld [vmem:[#allocation5] ss:$24 sps:$4 sm:$0xff]   ;;  %v4600_v4 = vld [vmem:[#allocation5 + $0x34] ss:$24 sps:$4 sm:$0xff]  }
  0x6f   : > { %5179 = vsyncadd (%p7178_p8), [#allocation6], 4294950912  ;;  %v4596_v1 = vld [vmem:[#allocation5 + $0xc] ss:$24 sps:$4 sm:$0xff]   ;;  %921 = vmatprep.subr.bf16.mxu0 %v4594_v0  ;;  %v4599_v3 = vld [vmem:[#allocation5 + $0x8] ss:$24 sps:$4 sm:$0xff]  }
  0x70   : > { %1114 = vmatprep.subr.bf16.mxu1 %v4596_v1  ;;  %922 = vmatpush1.bf16.msra.mxu0 %v4598_v2  ;;  %v4602_v5 = vld [vmem:[#allocation5 + $0x3c] ss:$24 sps:$4 sm:$0xff]   ;;  %v4604_v6 = vld [vmem:[#allocation5 + $0x30] ss:$24 sps:$4 sm:$0xff]   ;;  %v4608_v9 = vld [vmem:[#allocation5 + $0x6c] ss:$24 sps:$4 sm:$0xff]  }
  0x71   : > { %1115 = vmatpush1.bf16.msra.mxu1 %v4599_v3  ;;  %923 = vmatprep.subr.bf16.mxu0 %v4600_v4  ;;  %v4605_v7 = vld [vmem:[#allocation5 + $0x38] ss:$24 sps:$4 sm:$0xff]   ;;  %v4606_v8 = vld [vmem:[#allocation5 + $0x64] ss:$24 sps:$4 sm:$0xff]   ;;  %v4611_v11 = vld [vmem:[#allocation5 + $0x68] ss:$24 sps:$4 sm:$0xff]  }
  0x72   : > { %1116 = vmatprep.subr.bf16.mxu1 %v4602_v5  ;;  %v4610_v10 = vld [vmem:[#allocation5 + $0x60] ss:$24 sps:$4 sm:$0xff]   ;;  %v4612_v12 = vld [vmem:[#allocation5 + $0x94] ss:$24 sps:$4 sm:$0xff]   ;;  %v4616_v14 = vld [vmem:[#allocation5 + $0x90] ss:$24 sps:$4 sm:$0xff]  }
  0x73   : > { %v4614_v13 = vld [vmem:[#allocation5 + $0x9c] ss:$24 sps:$4 sm:$0xff]   ;;  %v4617_v15 = vld [vmem:[#allocation5 + $0x98] ss:$24 sps:$4 sm:$0xff]   ;;  %v4620_v17 = vld [vmem:[#allocation5 + $0xcc] ss:$24 sps:$4 sm:$0xff]  }
  0x74   : > { %924 = vmatpush1.bf16.msra.mxu0 %v4604_v6  ;;  %v4618_v16 = vld [vmem:[#allocation5 + $0xc4] ss:$24 sps:$4 sm:$0xff]   ;;  %v4622_v18 = vld [vmem:[#allocation5 + $0xc0] ss:$24 sps:$4 sm:$0xff]   ;;  %v4624_v20 = vld [vmem:[#allocation5 + $0xf4] ss:$24 sps:$4 sm:$0xff]  }
  0x75   : > { %1117 = vmatpush1.bf16.msra.mxu1 %v4605_v7  ;;  %925 = vmatprep.subr.bf16.mxu0 %v4606_v8  ;;  %v4623_v19 = vld [vmem:[#allocation5 + $0xc8] ss:$24 sps:$4 sm:$0xff]   ;;  %v4626_v21 = vld [vmem:[#allocation5 + $0xfc] ss:$24 sps:$4 sm:$0xff]   ;;  %v4629_v23 = vld [vmem:[#allocation5 + $0xf8] ss:$24 sps:$4 sm:$0xff]  }
  0x76   : > { %1118 = vmatprep.subr.bf16.mxu1 %v4608_v9  ;;  %v4628_v22 = vld [vmem:[#allocation5 + $0xf0] ss:$24 sps:$4 sm:$0xff]   ;;  %v4630_v24 = vld [vmem:[#allocation5 + $0x124] ss:$24 sps:$4 sm:$0xff]   ;;  %v4634_v26 = vld [vmem:[#allocation5 + $0x120] ss:$24 sps:$4 sm:$0xff]  }
  0x77   : > { %v4632_v25 = vld [vmem:[#allocation5 + $0x12c] ss:$24 sps:$4 sm:$0xff]   ;;  %v4635_v27 = vld [vmem:[#allocation5 + $0x128] ss:$24 sps:$4 sm:$0xff]   ;;  %v4638_v29 = vld [vmem:[#allocation5 + $0x15c] ss:$24 sps:$4 sm:$0xff]  }
  0x78   : > { %926 = vmatpush1.bf16.msra.mxu0 %v4610_v10  ;;  %v4636_v28 = vld [vmem:[#allocation5 + $0x154] ss:$24 sps:$4 sm:$0xff]   ;;  %v4640_v30 = vld [vmem:[#allocation5 + $0x150] ss:$24 sps:$4 sm:$0xff]   ;;  %v4642_v32 = vld [vmem:[#allocation5 + $0x184] ss:$24 sps:$4 sm:$0xff]  }
  0x79   : > { %1119 = vmatpush1.bf16.msra.mxu1 %v4611_v11  ;;  %927 = vmatprep.subr.bf16.mxu0 %v4612_v12  ;;  %v4641_v31 = vld [vmem:[#allocation5 + $0x158] ss:$24 sps:$4 sm:$0xff]   ;;  %v4644_v33 = vld [vmem:[#allocation5 + $0x18c] ss:$24 sps:$4 sm:$0xff]   ;;  %v4647_v35 = vld [vmem:[#allocation5 + $0x188] ss:$24 sps:$4 sm:$0xff]  }
  0x7a   : > { %1120 = vmatprep.subr.bf16.mxu1 %v4614_v13  ;;  %v4646_v34 = vld [vmem:[#allocation5 + $0x180] ss:$24 sps:$4 sm:$0xff]   ;;  %v4648_v36 = vld [vmem:[#allocation5 + $0x1b4] ss:$24 sps:$4 sm:$0xff]   ;;  %v4652_v38 = vld [vmem:[#allocation5 + $0x1b0] ss:$24 sps:$4 sm:$0xff]  }
  0x7b   : > { %v4650_v37 = vld [vmem:[#allocation5 + $0x1bc] ss:$24 sps:$4 sm:$0xff]   ;;  %v4653_v39 = vld [vmem:[#allocation5 + $0x1b8] ss:$24 sps:$4 sm:$0xff]   ;;  %v4656_v41 = vld [vmem:[#allocation5 + $0x1ec] ss:$24 sps:$4 sm:$0xff]  }
  0x7c   : > { %928 = vmatpush1.bf16.msra.mxu0 %v4616_v14  ;;  %v4654_v40 = vld [vmem:[#allocation5 + $0x1e4] ss:$24 sps:$4 sm:$0xff]   ;;  %v4658_v42 = vld [vmem:[#allocation5 + $0x1e0] ss:$24 sps:$4 sm:$0xff]   ;;  %v4660_v44 = vld [vmem:[#allocation5 + $0x214] ss:$24 sps:$4 sm:$0xff]  }
  0x7d   : > { %1121 = vmatpush1.bf16.msra.mxu1 %v4617_v15  ;;  %929 = vmatprep.subr.bf16.mxu0 %v4618_v16  ;;  %v4659_v43 = vld [vmem:[#allocation5 + $0x1e8] ss:$24 sps:$4 sm:$0xff]   ;;  %v4662_v45 = vld [vmem:[#allocation5 + $0x21c] ss:$24 sps:$4 sm:$0xff]   ;;  %v4665_v49 = vld [vmem:[#allocation5 + $0x218] ss:$24 sps:$4 sm:$0xff]  }
  0x7e   : > { %1122 = vmatprep.subr.bf16.mxu1 %v4620_v17  ;;  %v250_v46 = vld [vmem:[%s5416_s13 + $0x8] sm:$0xff]  ;;  %v252_v47 = vld [vmem:[%s5416_s13 + $0x18] sm:$0xff]  ;;  %v249_v3 = vld [vmem:[%s5416_s13] sm:$0xff]  ;;  %s6796_s30 = scalar_lea.vmem [#allocation8], %s3912_s10  ;;  %s4053_s6 = sshll.u32 %s5259_s19, 13 }
  0x7f   : > { %v4664_v48 = vld [vmem:[#allocation5 + $0x210] ss:$24 sps:$4 sm:$0xff]   ;;  %v5428_v50 = vpack.c.bf16 %v252_v47, %v250_v46  ;;  %v4666_v51 = vld [vmem:[#allocation5 + $0x244] ss:$24 sps:$4 sm:$0xff]   ;;  %v4670_v53 = vld [vmem:[#allocation5 + $0x240] ss:$24 sps:$4 sm:$0xff]   ;;  %s7047_s26 = scalar_lea.hbm %s7101_s4, %s4053_s6 }
  0x80   : > { %930 = vmatpush1.bf16.msra.mxu0 %v4622_v18  ;;  %v4668_v52 = vld [vmem:[#allocation5 + $0x24c] ss:$24 sps:$4 sm:$0xff]   ;;  %v4671_v54 = vld [vmem:[#allocation5 + $0x248] ss:$24 sps:$4 sm:$0xff]   ;;  %v4674_v56 = vld [vmem:[#allocation5 + $0x27c] ss:$24 sps:$4 sm:$0xff]  }
  0x81   : > { %1123 = vmatpush1.bf16.msra.mxu1 %v4623_v19  ;;  %931 = vmatprep.subr.bf16.mxu0 %v4624_v20  ;;  %v4672_v55 = vld [vmem:[#allocation5 + $0x274] ss:$24 sps:$4 sm:$0xff]   ;;  %v4676_v57 = vld [vmem:[#allocation5 + $0x270] ss:$24 sps:$4 sm:$0xff]   ;;  %v4678_v59 = vld [vmem:[#allocation5 + $0x2a4] ss:$24 sps:$4 sm:$0xff]  }
  0x82   : > { %1124 = vmatprep.subr.bf16.mxu1 %v4626_v21  ;;  %953 = vmatprep.mubr.bf16.mxu0 %v5428_v50  ;;  %v4677_v58 = vld [vmem:[#allocation5 + $0x278] ss:$24 sps:$4 sm:$0xff]   ;;  %v4680_v60 = vld [vmem:[#allocation5 + $0x2ac] ss:$24 sps:$4 sm:$0xff]   ;;  %v4683_v62 = vld [vmem:[#allocation5 + $0x2a8] ss:$24 sps:$4 sm:$0xff]  }
  0x83   : > { %1146 = vmatprep.mubr.bf16.mxu1 %v5428_v50  ;;  %v4682_v61 = vld [vmem:[#allocation5 + $0x2a0] ss:$24 sps:$4 sm:$0xff]   ;;  %v4684_v63 = vld [vmem:[#allocation5 + $0x2d4] ss:$24 sps:$4 sm:$0xff]   ;;  %v4688_v1 = vld [vmem:[#allocation5 + $0x2d0] ss:$24 sps:$4 sm:$0xff]  }
  0x84   : > { %932 = vmatpush1.bf16.msra.mxu0 %v4628_v22  ;;  %v4686_v0 = vld [vmem:[#allocation5 + $0x2dc] ss:$24 sps:$4 sm:$0xff]   ;;  %v4689_v2 = vld [vmem:[#allocation5 + $0x2d8] ss:$24 sps:$4 sm:$0xff]   ;;  %v254_v5 = vld [vmem:[%s5416_s13 + $0x28] sm:$0xff]  ;;  %s3810_s25 = sshll.u32 %s6796_s30, 4  ;;  %s7049_s25 = int_to_ptr.vmem [resolvable:$true] %s3810_s25 }
  0x85   : > { %1125 = vmatpush1.bf16.msra.mxu1 %v4629_v23  ;;  %933 = vmatprep.subr.bf16.mxu0 %v4630_v24  ;;  %v251_v4 = vld [vmem:[%s5416_s13 + $0x10] sm:$0xff]  ;;  %v256_v6 = vld [vmem:[%s5416_s13 + $0x38] sm:$0xff]  ;;  %v253_v12 = vld [vmem:[%s5416_s13 + $0x20] sm:$0xff]  ;;  %s3796_s19 = scalar_lea.sflag [#allocation4], %s5410_s9  ;;  %s5128_s28 = scalar_lea.vmem %s7049_s25, 8192 }
  0x86   : > { %1126 = vmatprep.subr.bf16.mxu1 %v4632_v25  ;;  %v4692_v7 = vld [vmem:[#allocation5 + $0x14] ss:$24 sps:$4 sm:$0xff]   ;;  %v5436_v8 = vpack.c.bf16 %v251_v4, %v249_v3  ;;  %v5438_v9 = vpack.c.bf16 %v256_v6, %v254_v5  ;;  %v4690_v10 = vld [vmem:[#allocation5 + $0x10] ss:$24 sps:$4 sm:$0xff]   ;;  %v4695_v11 = vld [vmem:[#allocation5 + $0x44] ss:$24 sps:$4 sm:$0xff]   ;;  %p5129_p11 = scmp.ne.s32.totalorder %s7049_s25, %s5128_s28 }
  0x87   : > { %v255_v13 = vld [vmem:[%s5416_s13 + $0x30] sm:$0xff]  ;;  %v258_v14 = vld [vmem:[%s5416_s13 + $0x48] sm:$0xff]  ;;  %v260_v15 = vld [vmem:[%s5416_s13 + $0x58] sm:$0xff]  ;;  %p7344_p0 = scmp.ne.s32.totalorder %s7174_s20, 0  ;;  %s5210_s27 = smov [#allocation8]  }
  0x88   : > { %934 = vmatpush1.bf16.msra.mxu0 %v4634_v26  ;;  %v4693_v16 = vld [vmem:[#allocation5 + $0x40] ss:$24 sps:$4 sm:$0xff]   ;;  %v4698_v17 = vld [vmem:[#allocation5 + $0x74] ss:$24 sps:$4 sm:$0xff]   ;;  %v5448_v18 = vpack.c.bf16 %v255_v13, %v253_v12  ;;  %v5450_v19 = vpack.c.bf16 %v260_v15, %v258_v14  ;;  %v4696_v20 = vld [vmem:[#allocation5 + $0x70] ss:$24 sps:$4 sm:$0xff]  }
  0x89   : > { %1127 = vmatpush1.bf16.msra.mxu1 %v4635_v27  ;;  %935 = vmatprep.subr.bf16.mxu0 %v4636_v28  ;;  %v4701_v21 = vld [vmem:[#allocation5 + $0xa4] ss:$24 sps:$4 sm:$0xff]   ;;  %v259_v23 = vld [vmem:[%s5416_s13 + $0x50] sm:$0xff]  ;;  %v262_v24 = vld [vmem:[%s5416_s13 + $0x68] sm:$0xff]  ;;  %p5130_p1 = pnand %p5129_p11, %p7344_p0  ;;  %s5132_s29 = sshll.u32 %s5210_s27, 4  ;;  %s5133_s29 = int_to_ptr.vmem [resolvable:$false] %s5132_s29 }
  0x8a   : > { %1128 = vmatprep.subr.bf16.mxu1 %v4638_v29  ;;  %v257_v22 = vld [vmem:[%s5416_s13 + $0x40] sm:$0xff]  ;;  %v264_v25 = vld [vmem:[%s5416_s13 + $0x78] sm:$0xff]  ;;  %v4704_v27 = vld [vmem:[#allocation5 + $0xd4] ss:$24 sps:$4 sm:$0xff]   ;;  %s5134_s5 = scalar_lea.vmem %s5133_s29, 16384  ;;  %p5135_p5 = scmp.lt.s32.totalorder %s7049_s25, %s5133_s29 }
  0x8b   : > { %v4699_v26 = vld [vmem:[#allocation5 + $0xa0] ss:$24 sps:$4 sm:$0xff]   ;;  %v5460_v28 = vpack.c.bf16 %v259_v23, %v257_v22  ;;  %v5462_v29 = vpack.c.bf16 %v264_v25, %v262_v24  ;;  %v4716_v47 = vld [vmem:[#allocation5 + $0x194] ss:$24 sps:$4 sm:$0xff]   ;;  %v4737_v22 = vld [vmem:[#allocation5 + $0x2e4] ss:$24 sps:$4 sm:$0xff]   ;;  %p5131_p3 = pneg %p5130_p1  ;;  %p5136_p9 = scmp.lt.s32.totalorder %s5134_s5, %s5128_s28 }
  0x8c   : > { %936 = vmatpush1.bf16.msra.mxu0 %v4640_v30  ;;  %v4702_v30 = vld [vmem:[#allocation5 + $0xd0] ss:$24 sps:$4 sm:$0xff]   ;;  %v4711_v46 = vld [vmem:[#allocation5 + $0x160] ss:$24 sps:$4 sm:$0xff]   ;;  %v4728_v4 = vld [vmem:[#allocation5 + $0x254] ss:$24 sps:$4 sm:$0xff]  }
  0x8d   : > { %1129 = vmatpush1.bf16.msra.mxu1 %v4641_v31  ;;  %937 = vmatprep.subr.bf16.mxu0 %v4642_v32  ;;  %v261_v31 = vld [vmem:[%s5416_s13 + $0x60] sm:$0xff]  ;;  %v263_v32 = vld [vmem:[%s5416_s13 + $0x70] sm:$0xff]  ;;  %v282_v13 = vld [vmem:[%s5416_s13 + $0x108] sm:$0xff]  ;;  %p5137_p12 = por %p5136_p9, %p5135_p5 }
  0x8e   : > { %1130 = vmatprep.subr.bf16.mxu1 %v4644_v33  ;;  %v4707_v33 = vld [vmem:[#allocation5 + $0x104] ss:$24 sps:$4 sm:$0xff]   ;;  %v4723_v3 = vld [vmem:[#allocation5 + $0x220] ss:$24 sps:$4 sm:$0xff]   ;;  %v279_v12 = vld [vmem:[%s5416_s13 + $0xf0] sm:$0xff] }
  0x8f   : > { %v284_v14 = vld [vmem:[%s5416_s13 + $0x118] sm:$0xff]  ;;  %v281_v23 = vld [vmem:[%s5416_s13 + $0x100] sm:$0xff]  ;;  %v283_v24 = vld [vmem:[%s5416_s13 + $0x110] sm:$0xff]  ;;  %p5138_p2 = pnand %p5137_p12, %p5131_p3 }
  0x90   : > { %938 = vmatpush1.bf16.msra.mxu0 %v4646_v34  ;;  %v266_v34 = vld [vmem:[%s5416_s13 + $0x88] sm:$0xff]  ;;  %v4729_v15 = vld [vmem:[#allocation5 + $0x280] ss:$24 sps:$4 sm:$0xff]  }
  0x91   : > { %1131 = vmatpush1.bf16.msra.mxu1 %v4647_v35  ;;  %939 = vmatprep.subr.bf16.mxu0 %v4648_v36  ;;  %v268_v35 = vld [vmem:[%s5416_s13 + $0x98] sm:$0xff]  ;;  %v286_v25 = vld [vmem:[%s5416_s13 + $0x128] sm:$0xff] }
  0x92   : > { %1132 = vmatprep.subr.bf16.mxu1 %v4650_v37  ;;  %v4705_v36 = vld [vmem:[#allocation5 + $0x100] ss:$24 sps:$4 sm:$0xff]   ;;  %v4710_v37 = vld [vmem:[#allocation5 + $0x134] ss:$24 sps:$4 sm:$0xff]  }
  0x94   : > { %940 = vmatpush1.bf16.msra.mxu0 %v4652_v38  ;;  %v5472_v38 = vpack.c.bf16 %v263_v32, %v261_v31  ;;  %v285_v32 = vld [vmem:[%s5416_s13 + $0x120] sm:$0xff] }
  0x95   : > { %1133 = vmatpush1.bf16.msra.mxu1 %v4653_v39  ;;  %941 = vmatprep.subr.bf16.mxu0 %v4654_v40  ;;  %v4708_v39 = vld [vmem:[#allocation5 + $0x130] ss:$24 sps:$4 sm:$0xff]   ;;  %v5474_v40 = vpack.c.bf16 %v268_v35, %v266_v34  ;;  %v292_v35 = vld [vmem:[%s5416_s13 + $0x158] sm:$0xff] }
  0x96   : > { %1134 = vmatprep.subr.bf16.mxu1 %v4656_v41  ;;  %v4713_v41 = vld [vmem:[#allocation5 + $0x164] ss:$24 sps:$4 sm:$0xff]   ;;  %v290_v34 = vld [vmem:[%s5416_s13 + $0x148] sm:$0xff] }
  0x98   : > { %942 = vmatpush1.bf16.msra.mxu0 %v4658_v42  ;;  %v265_v42 = vld [vmem:[%s5416_s13 + $0x80] sm:$0xff] }
  0x99   : > { %1135 = vmatpush1.bf16.msra.mxu1 %v4659_v43  ;;  %943 = vmatprep.subr.bf16.mxu0 %v4660_v44  ;;  %v267_v43 = vld [vmem:[%s5416_s13 + $0x90] sm:$0xff]  ;;  %v270_v44 = vld [vmem:[%s5416_s13 + $0xa8] sm:$0xff] }
  0x9a   : > { %1136 = vmatprep.subr.bf16.mxu1 %v4662_v45  ;;  %v272_v45 = vld [vmem:[%s5416_s13 + $0xb8] sm:$0xff] }
  0x9c   : > { %944 = vmatpush1.bf16.msra.mxu0 %v4664_v48  ;;  %v5484_v48 = vpack.c.bf16 %v267_v43, %v265_v42  ;;  %v294_v42 = vld [vmem:[%s5416_s13 + $0x168] sm:$0xff]  ;;  %v296_v43 = vld [vmem:[%s5416_s13 + $0x178] sm:$0xff] }
  0x9d   : > { %1137 = vmatpush1.bf16.msra.mxu1 %v4665_v49  ;;  %945 = vmatprep.subr.bf16.mxu0 %v4666_v51  ;;  %v5486_v49 = vpack.c.bf16 %v272_v45, %v270_v44  ;;  %v4714_v51 = vld [vmem:[#allocation5 + $0x190] ss:$24 sps:$4 sm:$0xff]   ;;  %v5558_v45 = vpack.c.bf16 %v296_v43, %v294_v42 }
  0x9e   : > { %1138 = vmatprep.subr.bf16.mxu1 %v4668_v52  ;;  %v4719_v52 = vld [vmem:[#allocation5 + $0x1c4] ss:$24 sps:$4 sm:$0xff]  }
  0xa0   : > { %946 = vmatpush1.bf16.msra.mxu0 %v4670_v53  ;;  %v269_v53 = vld [vmem:[%s5416_s13 + $0xa0] sm:$0xff] }
  0xa1   : > { %1139 = vmatpush1.bf16.msra.mxu1 %v4671_v54  ;;  %947 = vmatprep.subr.bf16.mxu0 %v4672_v55  ;;  %v271_v54 = vld [vmem:[%s5416_s13 + $0xb0] sm:$0xff]  ;;  %v274_v55 = vld [vmem:[%s5416_s13 + $0xc8] sm:$0xff] }
  0xa2   : > { %1140 = vmatprep.subr.bf16.mxu1 %v4674_v56  ;;  %v276_v56 = vld [vmem:[%s5416_s13 + $0xd8] sm:$0xff] }
  0xa4   : > { %948 = vmatpush1.bf16.msra.mxu0 %v4676_v57  ;;  %v4717_v57 = vld [vmem:[#allocation5 + $0x1c0] ss:$24 sps:$4 sm:$0xff]  }
  0xa5   : > { %1141 = vmatpush1.bf16.msra.mxu1 %v4677_v58  ;;  %949 = vmatprep.subr.bf16.mxu0 %v4678_v59  ;;  %v4722_v58 = vld [vmem:[#allocation5 + $0x1f4] ss:$24 sps:$4 sm:$0xff]   ;;  %v5496_v59 = vpack.c.bf16 %v271_v54, %v269_v53 }
  0xa6   : > { %1142 = vmatprep.subr.bf16.mxu1 %v4680_v60  ;;  %v5498_v60 = vpack.c.bf16 %v276_v56, %v274_v55  ;;  %v297_v55 = vld [vmem:[%s5416_s13 + $0x180] sm:$0xff]  ;;  %v299_v56 = vld [vmem:[%s5416_s13 + $0x190] sm:$0xff] }
  0xa8   : > { %950 = vmatpush1.bf16.msra.mxu0 %v4682_v61  ;;  %v4720_v61 = vld [vmem:[#allocation5 + $0x1f0] ss:$24 sps:$4 sm:$0xff]  }
  0xa9   : > { %1143 = vmatpush1.bf16.msra.mxu1 %v4683_v62  ;;  %951 = vmatprep.subr.bf16.mxu0 %v4684_v63  ;;  %v4725_v62 = vld [vmem:[#allocation5 + $0x224] ss:$24 sps:$4 sm:$0xff]  }
  0xaa   : > { %1144 = vmatprep.subr.bf16.mxu1 %v4686_v0  ;;  %v273_v63 = vld [vmem:[%s5416_s13 + $0xc0] sm:$0xff]  ;;  %v275_v0 = vld [vmem:[%s5416_s13 + $0xd0] sm:$0xff] }
  0xab   : > { %v5508_v5 = vpack.c.bf16 %v275_v0, %v273_v63  ;;  %v301_v63 = vld [vmem:[%s5416_s13 + $0x1a0] sm:$0xff]  ;;  %v303_v0 = vld [vmem:[%s5416_s13 + $0x1b0] sm:$0xff] }
  0xac   : > { %952 = vmatpush1.bf16.msra.mxu0 %v4688_v1  ;;  %v278_v1 = vld [vmem:[%s5416_s13 + $0xe8] sm:$0xff] }
  0xad   : > { %1145 = vmatpush1.bf16.msra.mxu1 %v4689_v2  ;;  %1307 = vmatprep.subr.bf16.mxu0 %v4692_v7  ;;  %v280_v2 = vld [vmem:[%s5416_s13 + $0xf8] sm:$0xff]  ;;  %v4726_v7 = vld [vmem:[#allocation5 + $0x250] ss:$24 sps:$4 sm:$0xff]  }
  0xae   : > { %v5510_v6 = vpack.c.bf16 %v280_v2, %v278_v1  ;;  %v306_v1 = vld [vmem:[%s5416_s13 + $0x1c8] sm:$0xff]  ;;  %v308_v2 = vld [vmem:[%s5416_s13 + $0x1d8] sm:$0xff] }
  0xaf   : > { %954 = vmatmul.mubr.bf16.vlgmr.msra.gmra.mrb[0].mxu0 %v5436_v8 }
  0xb0   : > { %1147 = vmatmul.mubr.bf16.vlgmr.msra.gmra.mrb[0].mxu1 %v5436_v8  ;;  %963 = vmatprep.mubr.bf16.mxu0 %v5438_v9 }
  0xb1   : > { %1156 = vmatprep.mubr.bf16.mxu1 %v5438_v9  ;;  %1308 = vmatpush1.bf16.msra.mxu0 %v4690_v10  ;;  %v4731_v10 = vld [vmem:[#allocation5 + $0x284] ss:$24 sps:$4 sm:$0xff]  }
  0xb2   : > { %1309 = vmatprep.subr.bf16.mxu0 %v4695_v11  ;;  %v277_v11 = vld [vmem:[%s5416_s13 + $0xe0] sm:$0xff] }
  0xb5   : > { %1310 = vmatpush1.bf16.msra.mxu0 %v4693_v16  ;;  %v4734_v16 = vld [vmem:[#allocation5 + $0x2b4] ss:$24 sps:$4 sm:$0xff]  }
  0xb6   : > { %1311 = vmatprep.subr.bf16.mxu0 %v4698_v17  ;;  %v5520_v17 = vpack.c.bf16 %v279_v12, %v277_v11  ;;  %v310_v11 = vld [vmem:[%s5416_s13 + $0x1e8] sm:$0xff]  ;;  %v312_v12 = vld [vmem:[%s5416_s13 + $0x1f8] sm:$0xff] }
  0xb7   : > { %964 = vmatmul.mubr.bf16.gmra.mrb[4].mxu0 %v5448_v18 }
  0xb8   : > { %1157 = vmatmul.mubr.bf16.gmra.mrb[4].mxu1 %v5448_v18  ;;  %973 = vmatprep.mubr.bf16.mxu0 %v5450_v19 }
  0xb9   : > { %1166 = vmatprep.mubr.bf16.mxu1 %v5450_v19  ;;  %1312 = vmatpush1.bf16.msra.mxu0 %v4696_v20  ;;  %v5522_v20 = vpack.c.bf16 %v284_v14, %v282_v13  ;;  %v5606_v14 = vpack.c.bf16 %v312_v12, %v310_v11 }
  0xba   : > { %1313 = vmatprep.subr.bf16.mxu0 %v4701_v21  ;;  %v4732_v21 = vld [vmem:[#allocation5 + $0x2b0] ss:$24 sps:$4 sm:$0xff]  }
  0xbd   : > { %1314 = vmatpush1.bf16.msra.mxu0 %v4699_v26  ;;  %v288_v26 = vld [vmem:[%s5416_s13 + $0x138] sm:$0xff] }
  0xbe   : > { %1315 = vmatprep.subr.bf16.mxu0 %v4704_v27  ;;  %v4735_v27 = vld [vmem:[#allocation5 + $0x2e0] ss:$24 sps:$4 sm:$0xff]   ;;  %v5534_v31 = vpack.c.bf16 %v288_v26, %v286_v25 }
  0xbf   : > { %974 = vmatmul.mubr.bf16.gmra.mrb[8].mxu0 %v5460_v28 }
  0xc0   : > { %1167 = vmatmul.mubr.bf16.gmra.mrb[8].mxu1 %v5460_v28  ;;  %983 = vmatprep.mubr.bf16.mxu0 %v5462_v29 }
  0xc1   : > { %1176 = vmatprep.mubr.bf16.mxu1 %v5462_v29  ;;  %1316 = vmatpush1.bf16.msra.mxu0 %v4702_v30  ;;  %v5532_v30 = vpack.c.bf16 %v283_v24, %v281_v23 }
  0xc2   : > { %1317 = vmatprep.subr.bf16.mxu0 %v4707_v33  ;;  %v287_v33 = vld [vmem:[%s5416_s13 + $0x130] sm:$0xff] }
  0xc5   : > { %1318 = vmatpush1.bf16.msra.mxu0 %v4705_v36  ;;  %v5544_v36 = vpack.c.bf16 %v287_v33, %v285_v32 }
  0xc6   : > { %1319 = vmatprep.subr.bf16.mxu0 %v4710_v37  ;;  %v5546_v37 = vpack.c.bf16 %v292_v35, %v290_v34 }
  0xc7   : > { %984 = vmatmul.mubr.bf16.gmra.mrb[12].mxu0 %v5472_v38 }
  0xc8   : > { %1177 = vmatmul.mubr.bf16.gmra.mrb[12].mxu1 %v5472_v38  ;;  %993 = vmatprep.mubr.bf16.mxu0 %v5474_v40 }
  0xc9   : > { %1186 = vmatprep.mubr.bf16.mxu1 %v5474_v40  ;;  %1320 = vmatpush1.bf16.msra.mxu0 %v4708_v39  ;;  %v289_v39 = vld [vmem:[%s5416_s13 + $0x140] sm:$0xff] }
  0xca   : > { %1321 = vmatprep.subr.bf16.mxu0 %v4713_v41  ;;  %v291_v41 = vld [vmem:[%s5416_s13 + $0x150] sm:$0xff] }
  0xcb   : > { %v5556_v44 = vpack.c.bf16 %v291_v41, %v289_v39 }
  0xcd   : > { %1322 = vmatpush1.bf16.msra.mxu0 %v4711_v46  ;;  %v293_v46 = vld [vmem:[%s5416_s13 + $0x160] sm:$0xff] }
  0xce   : > { %1323 = vmatprep.subr.bf16.mxu0 %v4716_v47  ;;  %v295_v47 = vld [vmem:[%s5416_s13 + $0x170] sm:$0xff] }
  0xcf   : > { %994 = vmatmul.mubr.bf16.gmra.mrb[16].mxu0 %v5484_v48  ;;  %v5568_v53 = vpack.c.bf16 %v295_v47, %v293_v46 }
  0xd0   : > { %1187 = vmatmul.mubr.bf16.gmra.mrb[16].mxu1 %v5484_v48  ;;  %1003 = vmatprep.mubr.bf16.mxu0 %v5486_v49 }
  0xd1   : > { %1196 = vmatprep.mubr.bf16.mxu1 %v5486_v49  ;;  %1324 = vmatpush1.bf16.msra.mxu0 %v4714_v51  ;;  %v298_v51 = vld [vmem:[%s5416_s13 + $0x188] sm:$0xff] }
  0xd2   : > { %1325 = vmatprep.subr.bf16.mxu0 %v4719_v52  ;;  %v300_v52 = vld [vmem:[%s5416_s13 + $0x198] sm:$0xff] }
  0xd3   : > { %v5570_v54 = vpack.c.bf16 %v300_v52, %v298_v51 }
  0xd5   : > { %1326 = vmatpush1.bf16.msra.mxu0 %v4717_v57  ;;  %v302_v57 = vld [vmem:[%s5416_s13 + $0x1a8] sm:$0xff] }
  0xd6   : > { %1327 = vmatprep.subr.bf16.mxu0 %v4722_v58  ;;  %v304_v58 = vld [vmem:[%s5416_s13 + $0x1b8] sm:$0xff] }
  0xd7   : > { %1004 = vmatmul.mubr.bf16.gmra.mrb[20].mxu0 %v5496_v59 }
  0xd8   : > { %1197 = vmatmul.mubr.bf16.gmra.mrb[20].mxu1 %v5496_v59  ;;  %1013 = vmatprep.mubr.bf16.mxu0 %v5498_v60 }
  0xd9   : > { %1206 = vmatprep.mubr.bf16.mxu1 %v5498_v60  ;;  %1328 = vmatpush1.bf16.msra.mxu0 %v4720_v61  ;;  %v5580_v61 = vpack.c.bf16 %v299_v56, %v297_v55 }
  0xda   : > { %1329 = vmatprep.subr.bf16.mxu0 %v4725_v62  ;;  %v5582_v62 = vpack.c.bf16 %v304_v58, %v302_v57 }
  0xdd   : > { %1330 = vmatpush1.bf16.msra.mxu0 %v4723_v3  ;;  %v5592_v3 = vpack.c.bf16 %v303_v0, %v301_v63 }
  0xde   : > { %1331 = vmatprep.subr.bf16.mxu0 %v4728_v4  ;;  %v5594_v4 = vpack.c.bf16 %v308_v2, %v306_v1 }
  0xdf   : > { %1014 = vmatmul.mubr.bf16.gmra.mrb[24].mxu0 %v5508_v5 }
  0xe0   : > { %1207 = vmatmul.mubr.bf16.gmra.mrb[24].mxu1 %v5508_v5  ;;  %1023 = vmatprep.mubr.bf16.mxu0 %v5510_v6 }
  0xe1   : > { %1216 = vmatprep.mubr.bf16.mxu1 %v5510_v6  ;;  %1332 = vmatpush1.bf16.msra.mxu0 %v4726_v7  ;;  %v305_v7 = vld [vmem:[%s5416_s13 + $0x1c0] sm:$0xff] }
  0xe2   : > { %1333 = vmatprep.subr.bf16.mxu0 %v4731_v10  ;;  %v307_v10 = vld [vmem:[%s5416_s13 + $0x1d0] sm:$0xff] }
  0xe3   : > { %v5604_v13 = vpack.c.bf16 %v307_v10, %v305_v7 }
  0xe5   : > { %1334 = vmatpush1.bf16.msra.mxu0 %v4729_v15  ;;  %v309_v15 = vld [vmem:[%s5416_s13 + $0x1e0] sm:$0xff] }
  0xe6   : > { %1335 = vmatprep.subr.bf16.mxu0 %v4734_v16  ;;  %v311_v16 = vld [vmem:[%s5416_s13 + $0x1f0] sm:$0xff] }
  0xe7   : > { %1024 = vmatmul.mubr.bf16.gmra.mrb[28].mxu0 %v5520_v17 }
  0xe8   : > { %1217 = vmatmul.mubr.bf16.gmra.mrb[28].mxu1 %v5520_v17  ;;  %1033 = vmatprep.mubr.bf16.mxu0 %v5522_v20 }
  0xe9   : > { %1226 = vmatprep.mubr.bf16.mxu1 %v5522_v20  ;;  %1336 = vmatpush1.bf16.msra.mxu0 %v4732_v21  ;;  %v5614_v21 = vpack.c.bf16 %v311_v16, %v309_v15 }
  0xea   : > { %1337 = vmatprep.subr.bf16.mxu0 %v4737_v22 }
  0xed   : > { %1338 = vmatpush1.bf16.msra.mxu0 %v4735_v27 }
  0xef   : > { %1034 = vmatmul.mubr.bf16.gmra.mrb[32].mxu0 %v5532_v30 }
  0xf0   : > { %1227 = vmatmul.mubr.bf16.gmra.mrb[32].mxu1 %v5532_v30  ;;  %1043 = vmatprep.mubr.bf16.mxu0 %v5534_v31 }
  0xf1   : > { %1236 = vmatprep.mubr.bf16.mxu1 %v5534_v31 }
  0xf7   : > { %1044 = vmatmul.mubr.bf16.gmra.mrb[36].mxu0 %v5544_v36 }
  0xf8   : > { %1237 = vmatmul.mubr.bf16.gmra.mrb[36].mxu1 %v5544_v36  ;;  %1053 = vmatprep.mubr.bf16.mxu0 %v5546_v37 }
  0xf9   : > { %1246 = vmatprep.mubr.bf16.mxu1 %v5546_v37 }
  0xff   : > { %1054 = vmatmul.mubr.bf16.gmra.mrb[40].mxu0 %v5556_v44 }
 0x100   : > { %1247 = vmatmul.mubr.bf16.gmra.mrb[40].mxu1 %v5556_v44  ;;  %1063 = vmatprep.mubr.bf16.mxu0 %v5558_v45 }
 0x101   : > { %1256 = vmatprep.mubr.bf16.mxu1 %v5558_v45 }
 0x107   : > { %1064 = vmatmul.mubr.bf16.gmra.mrb[44].mxu0 %v5568_v53 }
 0x108   : > { %1257 = vmatmul.mubr.bf16.gmra.mrb[44].mxu1 %v5568_v53  ;;  %1073 = vmatprep.mubr.bf16.mxu0 %v5570_v54 }
 0x109   : > { %1266 = vmatprep.mubr.bf16.mxu1 %v5570_v54 }
 0x10f   : > { %1074 = vmatmul.mubr.bf16.gmra.mrb[48].mxu0 %v5580_v61 }
 0x110   : > { %1267 = vmatmul.mubr.bf16.gmra.mrb[48].mxu1 %v5580_v61  ;;  %1083 = vmatprep.mubr.bf16.mxu0 %v5582_v62 }
 0x111   : > { %1276 = vmatprep.mubr.bf16.mxu1 %v5582_v62 }
 0x117   : > { %1084 = vmatmul.mubr.bf16.gmra.mrb[52].mxu0 %v5592_v3 }
 0x118   : > { %1277 = vmatmul.mubr.bf16.gmra.mrb[52].mxu1 %v5592_v3  ;;  %1093 = vmatprep.mubr.bf16.mxu0 %v5594_v4 }
 0x119   : > { %1286 = vmatprep.mubr.bf16.mxu1 %v5594_v4 }
 0x11f   : > { %1094 = vmatmul.mubr.bf16.gmra.mrb[56].mxu0 %v5604_v13 }
 0x120   : > { %1287 = vmatmul.mubr.bf16.gmra.mrb[56].mxu1 %v5604_v13  ;;  %1103 = vmatprep.mubr.bf16.mxu0 %v5606_v14 }
 0x121   : > { %1296 = vmatprep.mubr.bf16.mxu1 %v5606_v14 }
 0x127   : > { %1104 = vmatmul.mubr.bf16.gmra.mrb[60].mxu0 %v5614_v21 }
 0x128   : > { %1297 = vmatmul.mubr.bf16.gmra.mrb[60].mxu1 %v5614_v21  ;;  %1339 = vmatprep.mubr.bf16.mxu0 %v5428_v50 }
 0x12f   : > { %1340 = vmatmul.mubr.bf16.vlgmr.msra.gmra.mrb[64].mxu0 %v5436_v8 }
 0x130   : > { %1349 = vmatprep.mubr.bf16.mxu0 %v5438_v9 }
 0x137   : > { %1350 = vmatmul.mubr.bf16.gmra.mrb[68].mxu0 %v5448_v18 }
 0x138   : > { %1359 = vmatprep.mubr.bf16.mxu0 %v5450_v19 }
 0x13f   : > { %1360 = vmatmul.mubr.bf16.gmra.mrb[72].mxu0 %v5460_v28 }
 0x140   : > { %1369 = vmatprep.mubr.bf16.mxu0 %v5462_v29 }
 0x147   : > { %1370 = vmatmul.mubr.bf16.gmra.mrb[76].mxu0 %v5472_v38 }
 0x148   : > { %1379 = vmatprep.mubr.bf16.mxu0 %v5474_v40 }
 0x14f   : > { %1380 = vmatmul.mubr.bf16.gmra.mrb[80].mxu0 %v5484_v48 }
 0x150   : > { %1389 = vmatprep.mubr.bf16.mxu0 %v5486_v49 }
 0x157   : > { %1390 = vmatmul.mubr.bf16.gmra.mrb[84].mxu0 %v5496_v59 }
 0x158   : > { %1399 = vmatprep.mubr.bf16.mxu0 %v5498_v60 }
 0x15f   : > { %1400 = vmatmul.mubr.bf16.gmra.mrb[88].mxu0 %v5508_v5 }
 0x160   : > { %1409 = vmatprep.mubr.bf16.mxu0 %v5510_v6 }
 0x167   : > { %1410 = vmatmul.mubr.bf16.gmra.mrb[92].mxu0 %v5520_v17 }
 0x168   : > { %1419 = vmatprep.mubr.bf16.mxu0 %v5522_v20 }
 0x16f   : > { %1420 = vmatmul.mubr.bf16.gmra.mrb[96].mxu0 %v5532_v30 }
 0x170   : > { %1429 = vmatprep.mubr.bf16.mxu0 %v5534_v31 }
 0x177   : > { %1430 = vmatmul.mubr.bf16.gmra.mrb[100].mxu0 %v5544_v36 }
 0x178   : > { %1439 = vmatprep.mubr.bf16.mxu0 %v5546_v37 }
 0x17f   : > { %1440 = vmatmul.mubr.bf16.gmra.mrb[104].mxu0 %v5556_v44 }
 0x180   : > { %1449 = vmatprep.mubr.bf16.mxu0 %v5558_v45 }
 0x182   : > { %v955_v8 = vpop.f32.mrb[0].mxu0 }
 0x183   : > { %v1148_v50 = vpop.f32.mrb[0].mxu1  ;;  %v1500_v18 = vmul.f32 0.088388346, %v955_v8  ;;  %v957_v19 = vpop.f32.mrb[1].mxu0 }
 0x184   : > { %v1150_v9 = vpop.f32.mrb[1].mxu1  ;;  %v5641_v29 = vmul.f32 0.088388346, %v957_v19  ;;  %v959_v38 = vpop.f32.mrb[2].mxu0 }
 0x185   : > { %v1152_v28 = vpop.f32.mrb[2].mxu1  ;;  %v1501_v49 = vmul.f32 0.088388346, %v959_v38  ;;  %v961_v59 = vpop.f32.mrb[3].mxu0 }
 0x186   : > { %v1548_v40 = vpack.c.bf16 %v1152_v28, %v1148_v50  ;;  %v1154_v48 = vpop.f32.mrb[3].mxu1  ;;  %v5645_v5 = vmul.f32 0.088388346, %v961_v59 }
 0x187   : > { %v5643_v60 = vpack.c.bf16 %v1154_v48, %v1150_v9  ;;  %1450 = vmatmul.mubr.bf16.gmra.mrb[108].mxu0 %v5568_v53  ;;  %v1532_v6 = vpack.c.bf16 %v1501_v49, %v1500_v18 }
 0x188   : > { %4182 = vmatprep.subr.bf16.mxu1 %v1548_v40  ;;  %1459 = vmatprep.mubr.bf16.mxu0 %v5570_v54 }
 0x189   : > { %4183 = vmatpush3.bf16.xpose.msra.mxu1 %v1548_v40  ;;  %4198 = vmatprep.mubr.bf16.mxu1 %v1532_v6 }
 0x18a   : > { %v965_v22 = vpop.f32.mrb[4].mxu0 }
 0x18b   : > { %v1158_v20 = vpop.f32.mrb[4].mxu1  ;;  %v5651_v24 = vmul.f32 0.088388346, %v965_v22  ;;  %v967_v25 = vpop.f32.mrb[5].mxu0 }
 0x18c   : > { %v1160_v23 = vpop.f32.mrb[5].mxu1  ;;  %v5653_v27 = vmul.f32 0.088388346, %v967_v25  ;;  %v969_v30 = vpop.f32.mrb[6].mxu0 }
 0x18d   : > { %v1162_v26 = vpop.f32.mrb[6].mxu1  ;;  %v5655_v33 = vmul.f32 0.088388346, %v969_v30  ;;  %v971_v34 = vpop.f32.mrb[7].mxu0 }
 0x18e   : > { %v1549_v31 = vpack.c.bf16 %v1162_v26, %v1158_v20  ;;  %v1164_v32 = vpop.f32.mrb[7].mxu1  ;;  %v5659_v36 = vmul.f32 0.088388346, %v971_v34 }
 0x18f   : > { %v5657_v35 = vpack.c.bf16 %v1164_v32, %v1160_v23  ;;  %1460 = vmatmul.mubr.bf16.gmra.mrb[112].mxu0 %v5580_v61  ;;  %v1533_v37 = vpack.c.bf16 %v5655_v33, %v5651_v24 }
 0x190   : > { %4184 = vmatprep.subr.bf16.mxu1 %v1549_v31  ;;  %1469 = vmatprep.mubr.bf16.mxu0 %v5582_v62 }
 0x191   : > { %4185 = vmatpush3.bf16.xpose.msra.mxu1 %v1549_v31 }
 0x192   : > { %v975_v42 = vpop.f32.mrb[8].mxu0 }
 0x193   : > { %v1168_v41 = vpop.f32.mrb[8].mxu1  ;;  %v5667_v44 = vmul.f32 0.088388346, %v975_v42  ;;  %v977_v45 = vpop.f32.mrb[9].mxu0 }
 0x194   : > { %v1170_v43 = vpop.f32.mrb[9].mxu1  ;;  %v5669_v47 = vmul.f32 0.088388346, %v977_v45  ;;  %v979_v51 = vpop.f32.mrb[10].mxu0 }
 0x195   : > { %v1172_v46 = vpop.f32.mrb[10].mxu1  ;;  %v5671_v54 = vmul.f32 0.088388346, %v979_v51  ;;  %v981_v55 = vpop.f32.mrb[11].mxu0 }
 0x196   : > { %7179 = vst [vmem:[#allocation12_spill] sm:$0xff] %v5669_v47  ;;  %v1550_v52 = vpack.c.bf16 %v1172_v46, %v1168_v41  ;;  %v1174_v53 = vpop.f32.mrb[11].mxu1  ;;  %v5675_v57 = vmul.f32 0.088388346, %v981_v55 }
 0x197   : > { %v5673_v56 = vpack.c.bf16 %v1174_v53, %v1170_v43  ;;  %1470 = vmatmul.mubr.bf16.gmra.mrb[116].mxu0 %v5592_v3  ;;  %v1534_v58 = vpack.c.bf16 %v5671_v54, %v5667_v44 }
 0x198   : > { %7180 = vst [vmem:[#allocation13_spill] sm:$0xff] %v5675_v57  ;;  %4186 = vmatprep.subr.bf16.mxu1 %v1550_v52  ;;  %1479 = vmatprep.mubr.bf16.mxu0 %v5594_v4 }
 0x199   : > { %4187 = vmatpush3.bf16.xpose.msra.mxu1 %v1550_v52 }
 0x19a   : > { %v985_v63 = vpop.f32.mrb[12].mxu0 }
 0x19b   : > { %v1178_v62 = vpop.f32.mrb[12].mxu1  ;;  %v5683_v1 = vmul.f32 0.088388346, %v985_v63  ;;  %v987_v2 = vpop.f32.mrb[13].mxu0 }
 0x19c   : > { %v1180_v0 = vpop.f32.mrb[13].mxu1  ;;  %v5685_v10 = vmul.f32 0.088388346, %v987_v2  ;;  %v989_v3 = vpop.f32.mrb[14].mxu0 }
 0x19d   : > { %v1182_v7 = vpop.f32.mrb[14].mxu1  ;;  %v5687_v15 = vmul.f32 0.088388346, %v989_v3  ;;  %v991_v16 = vpop.f32.mrb[15].mxu0 }
 0x19e   : > { %7181 = vst [vmem:[#allocation14_spill] sm:$0xff] %v5685_v10  ;;  %v1551_v11 = vpack.c.bf16 %v1182_v7, %v1178_v62  ;;  %v1184_v12 = vpop.f32.mrb[15].mxu1  ;;  %v5691_v4 = vmul.f32 0.088388346, %v991_v16 }
 0x19f   : > { %v5689_v50 = vpack.c.bf16 %v1184_v12, %v1180_v0  ;;  %1480 = vmatmul.mubr.bf16.gmra.mrb[120].mxu0 %v5604_v13  ;;  %v1535_v8 = vpack.c.bf16 %v5687_v15, %v5683_v1 }
 0x1a0   : > { %7182 = vst [vmem:[#allocation15_spill] sm:$0xff] %v5691_v4  ;;  %4188 = vmatprep.subr.bf16.mxu1 %v1551_v11  ;;  %1489 = vmatprep.mubr.bf16.mxu0 %v5606_v14 }
 0x1a1   : > { %4189 = vmatpush3.bf16.xpose.msra.mxu1 %v1551_v11 }
 0x1a2   : > { %v995_v19 = vpop.f32.mrb[16].mxu0 }
 0x1a3   : > { %v1188_v18 = vpop.f32.mrb[16].mxu1  ;;  %v5699_v38 = vmul.f32 0.088388346, %v995_v19  ;;  %v997_v40 = vpop.f32.mrb[17].mxu0 }
 0x1a4   : > { %v1190_v28 = vpop.f32.mrb[17].mxu1  ;;  %v5701_v49 = vmul.f32 0.088388346, %v997_v40  ;;  %v999_v13 = vpop.f32.mrb[18].mxu0 }
 0x1a5   : > { %v1192_v48 = vpop.f32.mrb[18].mxu1  ;;  %v5703_v20 = vmul.f32 0.088388346, %v999_v13  ;;  %v1001_v22 = vpop.f32.mrb[19].mxu0 }
 0x1a6   : > { %7183 = vst [vmem:[#allocation16_spill] sm:$0xff] %v5701_v49  ;;  %v1552_v59 = vpack.c.bf16 %v1192_v48, %v1188_v18  ;;  %v1194_v6 = vpop.f32.mrb[19].mxu1  ;;  %v5707_v14 = vmul.f32 0.088388346, %v1001_v22 }
 0x1a7   : > { %v5705_v23 = vpack.c.bf16 %v1194_v6, %v1190_v28  ;;  %1490 = vmatmul.mubr.bf16.gmra.mrb[124].mxu0 %v5614_v21  ;;  %v1536_v25 = vpack.c.bf16 %v5703_v20, %v5699_v38 }
 0x1a8   : > { %7184 = vst [vmem:[#allocation17_spill] sm:$0xff] %v5707_v14  ;;  %4190 = vmatprep.subr.bf16.mxu1 %v1552_v59 }
 0x1a9   : > { %4191 = vmatpush3.bf16.xpose.msra.mxu1 %v1552_v59 }
 0x1aa   : > { %v1005_v31 = vpop.f32.mrb[20].mxu0 }
 0x1ab   : > { %v1198_v30 = vpop.f32.mrb[20].mxu1  ;;  %v5714_v34 = vmul.f32 0.088388346, %v1005_v31  ;;  %v1007_v41 = vpop.f32.mrb[21].mxu0 }
 0x1ac   : > { %v1200_v32 = vpop.f32.mrb[21].mxu1  ;;  %v5716_v43 = vmul.f32 0.088388346, %v1007_v41  ;;  %v1009_v45 = vpop.f32.mrb[22].mxu0 }
 0x1ad   : > { %v1202_v42 = vpop.f32.mrb[22].mxu1  ;;  %v5718_v51 = vmul.f32 0.088388346, %v1009_v45  ;;  %v1011_v52 = vpop.f32.mrb[23].mxu0 }
 0x1ae   : > { %7185 = vst [vmem:[#allocation18_spill] sm:$0xff] %v5716_v43  ;;  %v1553_v46 = vpack.c.bf16 %v1202_v42, %v1198_v30  ;;  %v1204_v21 = vpop.f32.mrb[23].mxu1  ;;  %v5722_v55 = vmul.f32 0.088388346, %v1011_v52 }
 0x1af   : > { %v5720_v53 = vpack.c.bf16 %v1204_v21, %v1200_v32  ;;  %v1537_v62 = vpack.c.bf16 %v5718_v51, %v5714_v34 }
 0x1b0   : > { %7186 = vst [vmem:[#allocation19_spill] sm:$0xff] %v5722_v55  ;;  %4192 = vmatprep.subr.bf16.mxu1 %v1553_v46 }
 0x1b1   : > { %4193 = vmatpush3.bf16.xpose.msra.mxu1 %v1553_v46 }
 0x1b2   : > { %v1015_v2 = vpop.f32.mrb[24].mxu0 }
 0x1b3   : > { %v1208_v0 = vpop.f32.mrb[24].mxu1  ;;  %v5728_v3 = vmul.f32 0.088388346, %v1015_v2  ;;  %v1017_v11 = vpop.f32.mrb[25].mxu0 }
 0x1b4   : > { %v1210_v7 = vpop.f32.mrb[25].mxu1  ;;  %v5730_v16 = vmul.f32 0.088388346, %v1017_v11  ;;  %v1019_v18 = vpop.f32.mrb[26].mxu0 }
 0x1b5   : > { %v1212_v12 = vpop.f32.mrb[26].mxu1  ;;  %v5732_v40 = vmul.f32 0.088388346, %v1019_v18  ;;  %v1021_v48 = vpop.f32.mrb[27].mxu0 }
 0x1b6   : > { %7187 = vst [vmem:[#allocation20_spill] sm:$0xff] %v5730_v16  ;;  %v1554_v19 = vpack.c.bf16 %v1212_v12, %v1208_v0  ;;  %v1214_v28 = vpop.f32.mrb[27].mxu1  ;;  %v5736_v59 = vmul.f32 0.088388346, %v1021_v48 }
 0x1b7   : > { %v5734_v13 = vpack.c.bf16 %v1214_v28, %v1210_v7  ;;  %v1538_v6 = vpack.c.bf16 %v5732_v40, %v5728_v3 }
 0x1b8   : > { %7188 = vst [vmem:[#allocation21_spill] sm:$0xff] %v5736_v59  ;;  %4194 = vmatprep.subr.bf16.mxu1 %v1554_v19 }
 0x1b9   : > { %4195 = vmatpush3.bf16.xpose.msra.mxu1 %v1554_v19 }
 0x1ba   : > { %v1025_v31 = vpop.f32.mrb[28].mxu0 }
 0x1bb   : > { %v1218_v30 = vpop.f32.mrb[28].mxu1  ;;  %v5742_v41 = vmul.f32 0.088388346, %v1025_v31  ;;  %v1027_v42 = vpop.f32.mrb[29].mxu0 }
 0x1bc   : > { %v1220_v32 = vpop.f32.mrb[29].mxu1  ;;  %v5744_v46 = vmul.f32 0.088388346, %v1027_v42  ;;  %v1029_v21 = vpop.f32.mrb[30].mxu0 }
 0x1bd   : > { %v1222_v45 = vpop.f32.mrb[30].mxu1  ;;  %v5746_v2 = vmul.f32 0.088388346, %v1029_v21  ;;  %v1031_v7 = vpop.f32.mrb[31].mxu0 }
 0x1be   : > { %7189 = vst [vmem:[#allocation22_spill] sm:$0xff] %v5744_v46  ;;  %v1555_v52 = vpack.c.bf16 %v1222_v45, %v1218_v30  ;;  %v1224_v0 = vpop.f32.mrb[31].mxu1  ;;  %v5750_v12 = vmul.f32 0.088388346, %v1031_v7 }
 0x1bf   : > { %v5748_v11 = vpack.c.bf16 %v1224_v0, %v1220_v32  ;;  %v1539_v18 = vpack.c.bf16 %v5746_v2, %v5742_v41 }
 0x1c0   : > { %7190 = vst [vmem:[#allocation23_spill] sm:$0xff] %v5750_v12  ;;  %4196 = vmatprep.subr.bf16.mxu1 %v1555_v52 }
 0x1c1   : > { %4197 = vmatpush3.bf16.xpose.msra.mxu1 %v1555_v52 }
 0x1c2   : > { %v1035_v48 = vpop.f32.mrb[32].mxu0 }
 0x1c3   : > { %v1228_v28 = vpop.f32.mrb[32].mxu1  ;;  %v5756_v30 = vmul.f32 0.088388346, %v1035_v48  ;;  %v1037_v42 = vpop.f32.mrb[33].mxu0 }
 0x1c4   : > { %v1230_v31 = vpop.f32.mrb[33].mxu1  ;;  %v5758_v21 = vmul.f32 0.088388346, %v1037_v42  ;;  %v1039_v32 = vpop.f32.mrb[34].mxu0 }
 0x1c5   : > { %v1232_v45 = vpop.f32.mrb[34].mxu1  ;;  %v5760_v22 = vmul.f32 0.088388346, %v1039_v32  ;;  %v1041_v63 = vpop.f32.mrb[35].mxu0 }
 0x1c6   : > { %7191 = vst [vmem:[#allocation24_spill] sm:$0xff] %v5758_v21  ;;  %v1556_v0 = vpack.c.bf16 %v1232_v45, %v1228_v28  ;;  %v1234_v7 = vpop.f32.mrb[35].mxu1  ;;  %v5764_v52 = vmul.f32 0.088388346, %v1041_v63 }
 0x1c7   : > { %v5762_v26 = vpack.c.bf16 %v1234_v7, %v1230_v31  ;;  %v1540_v48 = vpack.c.bf16 %v5760_v22, %v5756_v30 }
 0x1c8   : > { %7192 = vst [vmem:[#allocation25_spill] sm:$0xff] %v5764_v52  ;;  %4199 = vmatmul.mubr.bf16.vlgmr.msra.gmra.mrb[64].mxu1 %v1533_v37  ;;  %4214 = vmatprep.subr.bf16.mxu1 %v1556_v0 }
 0x1c9   : > { %4215 = vmatpush3.bf16.xpose.msra.mxu1 %v1556_v0  ;;  %4202 = vmatprep.mubr.bf16.mxu1 %v1534_v58 }
 0x1ca   : > { %v1045_v42 = vpop.f32.mrb[36].mxu0 }
 0x1cb   : > { %v1238_v31 = vpop.f32.mrb[36].mxu1  ;;  %v5776_v45 = vmul.f32 0.088388346, %v1045_v42  ;;  %v1047_v32 = vpop.f32.mrb[37].mxu0 }
 0x1cc   : > { %v1240_v63 = vpop.f32.mrb[37].mxu1  ;;  %v5778_v33 = vmul.f32 0.088388346, %v1047_v32  ;;  %v1049_v37 = vpop.f32.mrb[38].mxu0 }
 0x1cd   : > { %v1242_v24 = vpop.f32.mrb[38].mxu1  ;;  %v5780_v30 = vmul.f32 0.088388346, %v1049_v37  ;;  %v1051_v0 = vpop.f32.mrb[39].mxu0 }
 0x1ce   : > { %7193 = vst [vmem:[#allocation26_spill] sm:$0xff] %v5778_v33  ;;  %v1557_v7 = vpack.c.bf16 %v1242_v24, %v1238_v31  ;;  %v1244_v22 = vpop.f32.mrb[39].mxu1  ;;  %v5784_v54 = vmul.f32 0.088388346, %v1051_v0 }
 0x1cf   : > { %v5782_v44 = vpack.c.bf16 %v1244_v22, %v1240_v63 }
 0x1d0   : > { %7194 = vst [vmem:[#allocation27_spill] sm:$0xff] %v5784_v54  ;;  %4203 = vmatmul.mubr.bf16.gmra.mrb[68].mxu1 %v1535_v8  ;;  %4216 = vmatprep.subr.bf16.mxu1 %v1557_v7 }
 0x1d1   : > { %4217 = vmatpush3.bf16.xpose.msra.mxu1 %v1557_v7  ;;  %4206 = vmatprep.mubr.bf16.mxu1 %v1536_v25 }
 0x1d2   : > { %v1055_v63 = vpop.f32.mrb[40].mxu0 }
 0x1d3   : > { %v1248_v42 = vpop.f32.mrb[40].mxu1  ;;  %v5796_v24 = vmul.f32 0.088388346, %v1055_v63  ;;  %v1057_v37 = vpop.f32.mrb[41].mxu0 }
 0x1d4   : > { %v1250_v32 = vpop.f32.mrb[41].mxu1  ;;  %v5798_v15 = vmul.f32 0.088388346, %v1057_v37  ;;  %v1059_v8 = vpop.f32.mrb[42].mxu0 }
 0x1d5   : > { %v1252_v1 = vpop.f32.mrb[42].mxu1  ;;  %v5800_v7 = vmul.f32 0.088388346, %v1059_v8  ;;  %v1061_v28 = vpop.f32.mrb[43].mxu0 }
 0x1d6   : > { %7195 = vst [vmem:[#allocation28_spill] sm:$0xff] %v5798_v15  ;;  %v1558_v22 = vpack.c.bf16 %v1252_v1, %v1248_v42  ;;  %v1254_v0 = vpop.f32.mrb[43].mxu1  ;;  %v5804_v20 = vmul.f32 0.088388346, %v1061_v28 }
 0x1d7   : > { %v5802_v38 = vpack.c.bf16 %v1254_v0, %v1250_v32 }
 0x1d8   : > { %7197 = vst [vmem:[#allocation30_spill] sm:$0xff] %v5804_v20  ;;  %4207 = vmatmul.mubr.bf16.gmra.mrb[72].mxu1 %v1537_v62  ;;  %4218 = vmatprep.subr.bf16.mxu1 %v1558_v22 }
 0x1d9   : > { %7196 = vst [vmem:[#allocation29_spill] sm:$0xff] %v5802_v38  ;;  %4219 = vmatpush3.bf16.xpose.msra.mxu1 %v1558_v22  ;;  %4210 = vmatprep.mubr.bf16.mxu1 %v1538_v6 }
 0x1da   : > { %v1065_v32 = vpop.f32.mrb[44].mxu0 }
 0x1db   : > { %v1258_v63 = vpop.f32.mrb[44].mxu1  ;;  %v5816_v37 = vmul.f32 0.088388346, %v1065_v32  ;;  %v1067_v1 = vpop.f32.mrb[45].mxu0 }
 0x1dc   : > { %v1260_v28 = vpop.f32.mrb[45].mxu1  ;;  %v5818_v51 = vmul.f32 0.088388346, %v1067_v1  ;;  %v1069_v62 = vpop.f32.mrb[46].mxu0 }
 0x1dd   : > { %v1262_v34 = vpop.f32.mrb[46].mxu1  ;;  %v5820_v22 = vmul.f32 0.088388346, %v1069_v62  ;;  %v1071_v31 = vpop.f32.mrb[47].mxu0 }
 0x1de   : > { %7198 = vst [vmem:[#allocation31_spill] sm:$0xff] %v5818_v51  ;;  %v1559_v8 = vpack.c.bf16 %v1262_v34, %v1258_v63  ;;  %v1264_v0 = vpop.f32.mrb[47].mxu1  ;;  %v5824_v40 = vmul.f32 0.088388346, %v1071_v31 }
 0x1df   : > { %v5822_v3 = vpack.c.bf16 %v1264_v0, %v1260_v28 }
 0x1e0   : > { %7200 = vst [vmem:[#allocation33_spill] sm:$0xff] %v5824_v40  ;;  %4211 = vmatmul.mubr.bf16.gmra.mrb[76].mxu1 %v1539_v18  ;;  %4220 = vmatprep.subr.bf16.mxu1 %v1559_v8 }
 0x1e1   : > { %7199 = vst [vmem:[#allocation32_spill] sm:$0xff] %v5822_v3  ;;  %4221 = vmatpush3.bf16.xpose.msra.mxu1 %v1559_v8  ;;  %4230 = vmatprep.mubr.bf16.mxu1 %v1540_v48 }
 0x1e2   : > { %v1075_v1 = vpop.f32.mrb[48].mxu0 }
 0x1e3   : > { %v1268_v32 = vpop.f32.mrb[48].mxu1  ;;  %v5833_v28 = vmul.f32 0.088388346, %v1075_v1  ;;  %v1077_v31 = vpop.f32.mrb[49].mxu0 }
 0x1e4   : > { %v1270_v34 = vpop.f32.mrb[49].mxu1  ;;  %v5835_v0 = vmul.f32 0.088388346, %v1077_v31  ;;  %v1079_v41 = vpop.f32.mrb[50].mxu0 }
 0x1e5   : > { %v1272_v62 = vpop.f32.mrb[50].mxu1  ;;  %v5837_v42 = vmul.f32 0.088388346, %v1079_v41  ;;  %v1081_v19 = vpop.f32.mrb[51].mxu0 }
 0x1e6   : > { %7201 = vst [vmem:[#allocation34_spill] sm:$0xff] %v5835_v0  ;;  %v1560_v2 = vpack.c.bf16 %v1272_v62, %v1268_v32  ;;  %v1274_v18 = vpop.f32.mrb[51].mxu1  ;;  %v5841_v48 = vmul.f32 0.088388346, %v1081_v19 }
 0x1e7   : > { %v5839_v8 = vpack.c.bf16 %v1274_v18, %v1270_v34 }
 0x1e8   : > { %7203 = vst [vmem:[#allocation36_spill] sm:$0xff] %v5841_v48  ;;  %4222 = vmatprep.subr.bf16.mxu1 %v1560_v2 }
 0x1e9   : > { %7202 = vst [vmem:[#allocation35_spill] sm:$0xff] %v5839_v8  ;;  %4223 = vmatpush3.bf16.xpose.msra.mxu1 %v1560_v2 }
 0x1ea   : > { %v1085_v9 = vpop.f32.mrb[52].mxu0 }
 0x1eb   : > { %v1278_v31 = vpop.f32.mrb[52].mxu1  ;;  %v5847_v32 = vmul.f32 0.088388346, %v1085_v9  ;;  %v1087_v62 = vpop.f32.mrb[53].mxu0 }
 0x1ec   : > { %v1280_v61 = vpop.f32.mrb[53].mxu1  ;;  %v5849_v39 = vmul.f32 0.088388346, %v1087_v62  ;;  %v1089_v34 = vpop.f32.mrb[54].mxu0 }
 0x1ed   : > { %v1282_v41 = vpop.f32.mrb[54].mxu1  ;;  %v5851_v17 = vmul.f32 0.088388346, %v1089_v34  ;;  %v1091_v6 = vpop.f32.mrb[55].mxu0 }
 0x1ee   : > { %7204 = vst [vmem:[#allocation37_spill] sm:$0xff] %v5849_v39  ;;  %v1561_v19 = vpack.c.bf16 %v1282_v41, %v1278_v31  ;;  %v1284_v18 = vpop.f32.mrb[55].mxu1  ;;  %v5855_v2 = vmul.f32 0.088388346, %v1091_v6 }
 0x1ef   : > { %v5853_v63 = vpack.c.bf16 %v1284_v18, %v1280_v61 }
 0x1f0   : > { %7206 = vst [vmem:[#allocation39_spill] sm:$0xff] %v5855_v2  ;;  %4224 = vmatprep.subr.bf16.mxu1 %v1561_v19 }
 0x1f1   : > { %7205 = vst [vmem:[#allocation38_spill] sm:$0xff] %v5853_v63  ;;  %4225 = vmatpush3.bf16.xpose.msra.mxu1 %v1561_v19 }
 0x1f2   : > { %v1095_v25 = vpop.f32.mrb[56].mxu0 }
 0x1f3   : > { %v1288_v62 = vpop.f32.mrb[56].mxu1  ;;  %v1528_v31 = vmul.f32 0.088388346, %v1095_v25  ;;  %v1097_v41 = vpop.f32.mrb[57].mxu0 }
 0x1f4   : > { %v1290_v58 = vpop.f32.mrb[57].mxu1  ;;  %v5861_v0 = vmul.f32 0.088388346, %v1097_v41  ;;  %v1099_v61 = vpop.f32.mrb[58].mxu0 }
 0x1f5   : > { %v1292_v34 = vpop.f32.mrb[58].mxu1  ;;  %v1529_v48 = vmul.f32 0.088388346, %v1099_v61  ;;  %v1101_v51 = vpop.f32.mrb[59].mxu0 }
 0x1f6   : > { %7207 = vst [vmem:[#allocation40_spill] sm:$0xff] %v5861_v0  ;;  %v1562_v18 = vpack.c.bf16 %v1292_v34, %v1288_v62  ;;  %v1294_v6 = vpop.f32.mrb[59].mxu1  ;;  %v5865_v1 = vmul.f32 0.088388346, %v1101_v51 }
 0x1f7   : > { %v5863_v40 = vpack.c.bf16 %v1294_v6, %v1290_v58  ;;  %v1546_v19 = vpack.c.bf16 %v1529_v48, %v1528_v31 }
 0x1f8   : > { %7209 = vst [vmem:[#allocation42_spill] sm:$0xff] %v5865_v1  ;;  %4226 = vmatprep.subr.bf16.mxu1 %v1562_v18 }
 0x1f9   : > { %7208 = vst [vmem:[#allocation41_spill] sm:$0xff] %v5863_v40  ;;  %4227 = vmatpush3.bf16.xpose.msra.mxu1 %v1562_v18 }
 0x1fa   : > { %v1105_v39 = vpop.f32.mrb[60].mxu0 }
 0x1fb   : > { %v1298_v25 = vpop.f32.mrb[60].mxu1  ;;  %v1530_v41 = vmul.f32 0.088388346, %v1105_v39  ;;  %v1107_v15 = vpop.f32.mrb[61].mxu0 }
 0x1fc   : > { %v1300_v2 = vpop.f32.mrb[61].mxu1  ;;  %v5869_v62 = vmul.f32 0.088388346, %v1107_v15  ;;  %v1109_v34 = vpop.f32.mrb[62].mxu0 }
 0x1fd   : > { %v1302_v20 = vpop.f32.mrb[62].mxu1  ;;  %v1531_v58 = vmul.f32 0.088388346, %v1109_v34  ;;  %v1111_v6 = vpop.f32.mrb[63].mxu0 }
 0x1fe   : > { %7210 = vst [vmem:[#allocation43_spill] sm:$0xff] %v5869_v62  ;;  %v1563_v61 = vpack.c.bf16 %v1302_v20, %v1298_v25  ;;  %v1304_v51 = vpop.f32.mrb[63].mxu1  ;;  %v5871_v33 = vmul.f32 0.088388346, %v1111_v6  ;;  %v7213_v20 = vpack.c.bf16 %v5780_v30, %v5776_v45  ;;  %v7217_v45 = vpack.c.bf16 %v5837_v42, %v5833_v28 }
 0x1ff   : > { %v5873_v48 = vpack.c.bf16 %v1304_v51, %v1300_v2  ;;  %v1547_v31 = vpack.c.bf16 %v1531_v58, %v1530_v41  ;;  %v7214_v2 = vpack.c.bf16 %v5800_v7, %v5796_v24 }
 0x200   : > { %7211 = vst [vmem:[#allocation44_spill] sm:$0xff] %v5871_v33  ;;  %4228 = vmatprep.subr.bf16.mxu1 %v1563_v61 }
 0x201   : > { %7212 = vst [vmem:[#allocation45_spill] sm:$0xff] %v5873_v48  ;;  %4229 = vmatpush3.bf16.xpose.msra.mxu1 %v1563_v61 }
 0x202   : > { %v1341_v39 = vpop.f32.mrb[64].mxu0 }
 0x203   : > { %v1343_v9 = vpop.f32.mrb[65].mxu0 }
 0x204   : > { %v1345_v0 = vpop.f32.mrb[66].mxu0 }
 0x205   : > { %v1564_v15 = vpack.c.bf16 %v1345_v0, %v1341_v39  ;;  %v1347_v1 = vpop.f32.mrb[67].mxu0  ;;  %v7216_v0 = vpack.c.bf16 %v5820_v22, %v5816_v37  ;;  %v7219_v39 = vpack.c.bf16 %v5851_v17, %v5847_v32 }
 0x206   : > { %v5877_v54 = vpack.c.bf16 %v1347_v1, %v1343_v9 }
 0x207   : > { %4246 = vmatprep.subr.bf16.mxu1 %v1564_v15 }
 0x208   : > { %4231 = vmatmul.mubr.bf16.vlgmr.msra.gmra.mrb[80].mxu1 %v7213_v20 }
 0x209   : > { %4247 = vmatpush3.bf16.msra.mxu1 %v1564_v15  ;;  %4234 = vmatprep.mubr.bf16.mxu1 %v7214_v2 }
 0x20a   : > { %v1351_v25 = vpop.f32.mrb[68].mxu0 }
 0x20b   : > { %v1353_v41 = vpop.f32.mrb[69].mxu0 }
 0x20c   : > { %v1355_v34 = vpop.f32.mrb[70].mxu0 }
 0x20d   : > { %v1565_v61 = vpack.c.bf16 %v1355_v34, %v1351_v25  ;;  %v1357_v58 = vpop.f32.mrb[71].mxu0 }
 0x20e   : > { %v5885_v6 = vpack.c.bf16 %v1357_v58, %v1353_v41 }
 0x20f   : > { %4248 = vmatprep.subr.bf16.mxu1 %v1565_v61 }
 0x210   : > { %7215 = vst [vmem:[#allocation46_spill] sm:$0xff] %v5885_v6  ;;  %4235 = vmatmul.mubr.bf16.gmra.mrb[84].mxu1 %v7216_v0 }
 0x211   : > { %4249 = vmatpush3.bf16.msra.mxu1 %v1565_v61  ;;  %4238 = vmatprep.mubr.bf16.mxu1 %v7217_v45 }
 0x212   : > { %v1361_v30 = vpop.f32.mrb[72].mxu0 }
 0x213   : > { %v1363_v24 = vpop.f32.mrb[73].mxu0 }
 0x214   : > { %v1365_v7 = vpop.f32.mrb[74].mxu0 }
 0x215   : > { %v1566_v1 = vpack.c.bf16 %v1365_v7, %v1361_v30  ;;  %v1367_v9 = vpop.f32.mrb[75].mxu0 }
 0x216   : > { %v5893_v51 = vpack.c.bf16 %v1367_v9, %v1363_v24 }
 0x217   : > { %4250 = vmatprep.subr.bf16.mxu1 %v1566_v1 }
 0x218   : > { %7218 = vst [vmem:[#allocation47_spill] sm:$0xff] %v5893_v51  ;;  %4239 = vmatmul.mubr.bf16.gmra.mrb[88].mxu1 %v7219_v39 }
 0x219   : > { %4251 = vmatpush3.bf16.msra.mxu1 %v1566_v1  ;;  %4242 = vmatprep.mubr.bf16.mxu1 %v1546_v19 }
 0x21a   : > { %v1371_v37 = vpop.f32.mrb[76].mxu0 }
 0x21b   : > { %v1373_v22 = vpop.f32.mrb[77].mxu0 }
 0x21c   : > { %v1375_v15 = vpop.f32.mrb[78].mxu0 }
 0x21d   : > { %v1567_v20 = vpack.c.bf16 %v1375_v15, %v1371_v37  ;;  %v1377_v42 = vpop.f32.mrb[79].mxu0 }
 0x21e   : > { %v5898_v28 = vpack.c.bf16 %v1377_v42, %v1373_v22 }
 0x21f   : > { %4252 = vmatprep.subr.bf16.mxu1 %v1567_v20 }
 0x220   : > { %7220 = vst [vmem:[#allocation48_spill] sm:$0xff] %v5898_v28  ;;  %4243 = vmatmul.mubr.bf16.gmra.mrb[92].mxu1 %v1547_v31 }
 0x221   : > { %4253 = vmatpush3.bf16.msra.mxu1 %v1567_v20 }
 0x222   : > { %v1381_v2 = vpop.f32.mrb[80].mxu0 }
 0x223   : > { %v1383_v25 = vpop.f32.mrb[81].mxu0 }
 0x224   : > { %v1385_v41 = vpop.f32.mrb[82].mxu0 }
 0x225   : > { %v1568_v34 = vpack.c.bf16 %v1385_v41, %v1381_v2  ;;  %v1387_v61 = vpop.f32.mrb[83].mxu0 }
 0x226   : > { %v5900_v58 = vpack.c.bf16 %v1387_v61, %v1383_v25 }
 0x227   : > { %4254 = vmatprep.subr.bf16.mxu1 %v1568_v34 }
 0x228   : > { %7221 = vst [vmem:[#allocation49_spill] sm:$0xff] %v5900_v58  ;;  %4255 = vmatpush3.bf16.msra.mxu1 %v1568_v34 }
 0x22a   : > { %v1391_v17 = vpop.f32.mrb[84].mxu0 }
 0x22b   : > { %v1393_v32 = vpop.f32.mrb[85].mxu0 }
 0x22c   : > { %v1395_v19 = vpop.f32.mrb[86].mxu0 }
 0x22d   : > { %v1569_v0 = vpack.c.bf16 %v1395_v19, %v1391_v17  ;;  %v1397_v45 = vpop.f32.mrb[87].mxu0 }
 0x22e   : > { %v5902_v30 = vpack.c.bf16 %v1397_v45, %v1393_v32 }
 0x22f   : > { %4256 = vmatprep.subr.bf16.mxu1 %v1569_v0 }
 0x230   : > { %7222 = vst [vmem:[#allocation50_spill] sm:$0xff] %v5902_v30  ;;  %4257 = vmatpush3.bf16.msra.mxu1 %v1569_v0 }
 0x232   : > { %v1401_v31 = vpop.f32.mrb[88].mxu0 }
 0x233   : > { %v1403_v24 = vpop.f32.mrb[89].mxu0 }
 0x234   : > { %v1405_v7 = vpop.f32.mrb[90].mxu0 }
 0x235   : > { %v1570_v1 = vpack.c.bf16 %v1405_v7, %v1401_v31  ;;  %v1407_v9 = vpop.f32.mrb[91].mxu0 }
 0x236   : > { %v5904_v39 = vpack.c.bf16 %v1407_v9, %v1403_v24 }
 0x237   : > { %4258 = vmatprep.subr.bf16.mxu1 %v1570_v1 }
 0x238   : > { %7223 = vst [vmem:[#allocation51_spill] sm:$0xff] %v5904_v39  ;;  %4259 = vmatpush3.bf16.msra.mxu1 %v1570_v1 }
 0x23a   : > { %v1411_v37 = vpop.f32.mrb[92].mxu0 }
 0x23b   : > { %v1413_v22 = vpop.f32.mrb[93].mxu0 }
 0x23c   : > { %v1415_v15 = vpop.f32.mrb[94].mxu0 }
 0x23d   : > { %v1571_v20 = vpack.c.bf16 %v1415_v15, %v1411_v37  ;;  %v1417_v42 = vpop.f32.mrb[95].mxu0 }
 0x23e   : > { %v5906_v2 = vpack.c.bf16 %v1417_v42, %v1413_v22 }
 0x23f   : > { %4260 = vmatprep.subr.bf16.mxu1 %v1571_v20 }
 0x240   : > { %7224 = vst [vmem:[#allocation52_spill] sm:$0xff] %v5906_v2  ;;  %4261 = vmatpush3.bf16.msra.mxu1 %v1571_v20 }
 0x241   : > { %4310 = vmatprep.subr.bf16.mxu1 %v5643_v60 }
 0x242   : > { %v1421_v25 = vpop.f32.mrb[96].mxu0 }
 0x243   : > { %v1423_v41 = vpop.f32.mrb[97].mxu0 }
 0x244   : > { %v1425_v34 = vpop.f32.mrb[98].mxu0 }
 0x245   : > { %v1572_v61 = vpack.c.bf16 %v1425_v34, %v1421_v25  ;;  %v1427_v17 = vpop.f32.mrb[99].mxu0 }
 0x246   : > { %v5909_v32 = vpack.c.bf16 %v1427_v17, %v1423_v41 }
 0x247   : > { %4278 = vmatprep.subr.bf16.mxu0 %v1572_v61 }
 0x248   : > { %7225 = vst [vmem:[#allocation53_spill] sm:$0xff] %v5909_v32  ;;  %4279 = vmatpush3.bf16.msra.mxu0 %v1572_v61 }
 0x24a   : > { %v1431_v19 = vpop.f32.mrb[100].mxu0 }
 0x24b   : > { %v1433_v0 = vpop.f32.mrb[101].mxu0 }
 0x24c   : > { %v1435_v45 = vpop.f32.mrb[102].mxu0 }
 0x24d   : > { %v1573_v31 = vpack.c.bf16 %v1435_v45, %v1431_v19  ;;  %v1437_v24 = vpop.f32.mrb[103].mxu0 }
 0x24e   : > { %v5911_v7 = vpack.c.bf16 %v1437_v24, %v1433_v0 }
 0x24f   : > { %4280 = vmatprep.subr.bf16.mxu0 %v1573_v31 }
 0x250   : > { %7226 = vst [vmem:[#allocation54_spill] sm:$0xff] %v5911_v7  ;;  %4281 = vmatpush3.bf16.msra.mxu0 %v1573_v31 }
 0x252   : > { %v1441_v1 = vpop.f32.mrb[104].mxu0 }
 0x253   : > { %v1443_v9 = vpop.f32.mrb[105].mxu0 }
 0x254   : > { %v1445_v37 = vpop.f32.mrb[106].mxu0 }
 0x255   : > { %v1574_v22 = vpack.c.bf16 %v1445_v37, %v1441_v1  ;;  %v1447_v15 = vpop.f32.mrb[107].mxu0 }
 0x256   : > { %v5913_v20 = vpack.c.bf16 %v1447_v15, %v1443_v9 }
 0x257   : > { %4282 = vmatprep.subr.bf16.mxu0 %v1574_v22 }
 0x258   : > { %7227 = vst [vmem:[#allocation55_spill] sm:$0xff] %v5913_v20  ;;  %4283 = vmatpush3.bf16.msra.mxu0 %v1574_v22 }
 0x25a   : > { %v1451_v42 = vpop.f32.mrb[108].mxu0 }
 0x25b   : > { %v1453_v25 = vpop.f32.mrb[109].mxu0 }
 0x25c   : > { %v1455_v41 = vpop.f32.mrb[110].mxu0 }
 0x25d   : > { %v1575_v34 = vpack.c.bf16 %v1455_v41, %v1451_v42  ;;  %v1457_v61 = vpop.f32.mrb[111].mxu0 }
 0x25e   : > { %v5915_v17 = vpack.c.bf16 %v1457_v61, %v1453_v25 }
 0x25f   : > { %4284 = vmatprep.subr.bf16.mxu0 %v1575_v34 }
 0x260   : > { %7228 = vst [vmem:[#allocation56_spill] sm:$0xff] %v5915_v17  ;;  %4285 = vmatpush3.bf16.msra.mxu0 %v1575_v34 }
 0x262   : > { %v1461_v19 = vpop.f32.mrb[112].mxu0 }
 0x263   : > { %v1463_v0 = vpop.f32.mrb[113].mxu0 }
 0x264   : > { %v1465_v45 = vpop.f32.mrb[114].mxu0 }
 0x265   : > { %v1576_v31 = vpack.c.bf16 %v1465_v45, %v1461_v19  ;;  %v1467_v24 = vpop.f32.mrb[115].mxu0 }
 0x266   : > { %v5917_v1 = vpack.c.bf16 %v1467_v24, %v1463_v0 }
 0x267   : > { %4286 = vmatprep.subr.bf16.mxu0 %v1576_v31 }
 0x268   : > { %7229 = vst [vmem:[#allocation57_spill] sm:$0xff] %v5917_v1  ;;  %4287 = vmatpush3.bf16.msra.mxu0 %v1576_v31 }
 0x26a   : > { %v1471_v9 = vpop.f32.mrb[116].mxu0 }
 0x26b   : > { %v1473_v37 = vpop.f32.mrb[117].mxu0 }
 0x26c   : > { %v1475_v22 = vpop.f32.mrb[118].mxu0 }
 0x26d   : > { %v1577_v15 = vpack.c.bf16 %v1475_v22, %v1471_v9  ;;  %v1477_v18 = vpop.f32.mrb[119].mxu0 }
 0x26e   : > { %v5919_v42 = vpack.c.bf16 %v1477_v18, %v1473_v37 }
 0x26f   : > { %4288 = vmatprep.subr.bf16.mxu0 %v1577_v15 }
 0x270   : > { %7230 = vst [vmem:[#allocation58_spill] sm:$0xff] %v5919_v42  ;;  %4289 = vmatpush3.bf16.msra.mxu0 %v1577_v15 }
 0x272   : > { %v1481_v25 = vpop.f32.mrb[120].mxu0 }
 0x273   : > { %v1483_v41 = vpop.f32.mrb[121].mxu0 }
 0x274   : > { %v1485_v34 = vpop.f32.mrb[122].mxu0 }
 0x275   : > { %v1578_v61 = vpack.c.bf16 %v1485_v34, %v1481_v25  ;;  %v1487_v62 = vpop.f32.mrb[123].mxu0 }
 0x276   : > { %v5921_v19 = vpack.c.bf16 %v1487_v62, %v1483_v41 }
 0x277   : > { %4290 = vmatprep.subr.bf16.mxu0 %v1578_v61 }
 0x278   : > { %7231 = vst [vmem:[#allocation59_spill] sm:$0xff] %v5921_v19  ;;  %4291 = vmatpush3.bf16.msra.mxu0 %v1578_v61 }
 0x27a   : > { %v1491_v0 = vpop.f32.mrb[124].mxu0 }
 0x27b   : > { %v5923_v45 = vpop.f32.mrb[125].mxu0 }
 0x27c   : > { %v1495_v31 = vpop.f32.mrb[126].mxu0 }
 0x27d   : > { %v1579_v24 = vpack.c.bf16 %v1495_v31, %v1491_v0 }
 0x27f   : > { %4292 = vmatprep.subr.bf16.mxu0 %v1579_v24 }
 0x280   : > { %4293 = vmatpush3.bf16.msra.mxu0 %v1579_v24 }
 0x281   : > { %4342 = vmatprep.subr.bf16.mxu0 %v5762_v26 }
 0x29b   : > { %v4200_v18 = vpop.f32.mrb[64].mxu1 }
 0x29c   : > { %1778 = vmax.xlane.f32.xlu1 %v4200_v18  ;;  %v1614_v9 = vpop.f32.mrb[65].mxu1 }
 0x29d   : > { %1774 = vmax.xlane.f32.xlu0 %v1614_v9  ;;  %v4201_v37 = vpop.f32.mrb[66].mxu1 }
 0x29e   : > { %v1617_v22 = vpop.f32.mrb[67].mxu1 }
 0x2a0   : > { %1780 = vmax.xlane.f32.xlu1 %v4201_v37 }
 0x2a1   : > { %1776 = vmax.xlane.f32.xlu0 %v1617_v22 }
 0x2a3   : > { %v5926_v62 = vpop.f32.mrb[68].mxu1 }
 0x2a4   : > { %v5928_v15 = vpop.f32.mrb[69].mxu1 }
 0x2a5   : > { %1782 = vmax.xlane.f32.xlu0 %v5928_v15  ;;  %v5931_v25 = vpop.f32.mrb[70].mxu1 }
 0x2a6   : > { %v5933_v41 = vpop.f32.mrb[71].mxu1 }
 0x2a7   : > { %1784 = vmax.xlane.f32.xlu1 %v5933_v41 }
 0x2a9   : > { %1786 = vmax.xlane.f32.xlu0 %v5926_v62 }
 0x2ab   : > { %1788 = vmax.xlane.f32.xlu1 %v5931_v25  ;;  %v5938_v34 = vpop.f32.mrb[72].mxu1 }
 0x2ac   : > { %v5940_v61 = vpop.f32.mrb[73].mxu1 }
 0x2ad   : > { %1790 = vmax.xlane.f32.xlu0 %v5940_v61  ;;  %v5943_v0 = vpop.f32.mrb[74].mxu1 }
 0x2ae   : > { %v5945_v31 = vpop.f32.mrb[75].mxu1 }
 0x2af   : > { %1792 = vmax.xlane.f32.xlu1 %v5945_v31 }
 0x2b1   : > { %1794 = vmax.xlane.f32.xlu0 %v5938_v34 }
 0x2b3   : > { %1796 = vmax.xlane.f32.xlu1 %v5943_v0  ;;  %v5950_v24 = vpop.f32.mrb[76].mxu1 }
 0x2b4   : > { %v5952_v33 = vpop.f32.mrb[77].mxu1 }
 0x2b5   : > { %1798 = vmax.xlane.f32.xlu0 %v5952_v33  ;;  %v5955_v19 = vpop.f32.mrb[78].mxu1 }
 0x2b6   : > { %v5957_v42 = vpop.f32.mrb[79].mxu1 }
 0x2b7   : > { %1800 = vmax.xlane.f32.xlu1 %v5957_v42 }
 0x2b9   : > { %1802 = vmax.xlane.f32.xlu0 %v5950_v24 }
 0x2bb   : > { %1804 = vmax.xlane.f32.xlu1 %v5955_v19 }
 0x2db   : > { %v5962_v1 = vpop.f32.mrb[80].mxu1 }
 0x2dc   : > { %v5964_v17 = vpop.f32.mrb[81].mxu1 }
 0x2dd   : > { %1806 = vmax.xlane.f32.xlu0 %v5964_v17  ;;  %v5967_v20 = vpop.f32.mrb[82].mxu1 }
 0x2de   : > { %v5969_v7 = vpop.f32.mrb[83].mxu1 }
 0x2df   : > { %1808 = vmax.xlane.f32.xlu1 %v5969_v7 }
 0x2e1   : > { %1810 = vmax.xlane.f32.xlu0 %v5962_v1 }
 0x2e3   : > { %1812 = vmax.xlane.f32.xlu1 %v5967_v20  ;;  %v5974_v21 = vpop.f32.mrb[84].mxu1 }
 0x2e4   : > { %v5976_v52 = vpop.f32.mrb[85].mxu1 }
 0x2e5   : > { %v5978_v32 = vpop.f32.mrb[86].mxu1 }
 0x2e6   : > { %v5980_v48 = vpop.f32.mrb[87].mxu1 }
 0x2eb   : > { %v5982_v40 = vpop.f32.mrb[88].mxu1 }
 0x2ec   : > { %v5984_v63 = vpop.f32.mrb[89].mxu1 }
 0x2ed   : > { %v5986_v2 = vpop.f32.mrb[90].mxu1 }
 0x2ee   : > { %v5988_v46 = vpop.f32.mrb[91].mxu1 }
 0x2f3   : > { %v5990_v12 = vpop.f32.mrb[92].mxu1 }
 0x2f4   : > { %v5992_v8 = vpop.f32.mrb[93].mxu1 }
 0x2f5   : > { %v5994_v39 = vpop.f32.mrb[94].mxu1 }
 0x2f6   : > { %v5996_v30 = vpop.f32.mrb[95].mxu1 }
 0x329   : > { %v1779_v16 = vpop.xlane.xlu1 %1778 }
 0x32a   : > { %v1840_v59 = vsub.f32 %v4200_v18, %v1779_v16  ;;  %v1775_v43 = vpop.xlane.xlu0 %1774 }
 0x32b   : > { %v1838_v55 = vsub.f32 %v1614_v9, %v1775_v43 }
 0x32c   : > { %v1874_v28 = vmul.f32 1.442695, %v1840_v59 }
 0x32d   : > { %v1870_v3 = vmul.f32 1.442695, %v1838_v55  ;;  %v1781_v58 = vpop.xlane.xlu1 %1780 }
 0x32e   : > { %v1777_v49 = vpop.xlane.xlu0 %1776  ;;  %v1841_v14 = vsub.f32 %v4201_v37, %v1781_v58 }
 0x32f   : > { %4786 = vpow2.f32 %v1870_v3  ;;  %v1839_v10 = vsub.f32 %v1617_v22, %v1777_v49 }
 0x330   : > { %4788 = vpow2.f32 %v1874_v28  ;;  %v1876_v38 = vmul.f32 1.442695, %v1841_v14 }
 0x331   : > { %v1872_v4 = vmul.f32 1.442695, %v1839_v10 }
 0x332   : > { %v1783_v6 = vpop.xlane.xlu0 %1782 }
 0x333   : > { %4790 = vpow2.f32 %v1872_v4  ;;  %v1842_v59 = vsub.f32 %v5928_v15, %v1783_v6 }
 0x334   : > { %4792 = vpow2.f32 %v1876_v38  ;;  %v1785_v55 = vpop.xlane.xlu1 %1784 }
 0x335   : > { %v1843_v38 = vsub.f32 %v5933_v41, %v1785_v55  ;;  %v1878_v28 = vmul.f32 1.442695, %v1842_v59 }
 0x336   : > { %v1787_v49 = vpop.xlane.xlu0 %1786 }
 0x337   : > { %v1844_v58 = vsub.f32 %v5926_v62, %v1787_v49  ;;  %v1880_v9 = vmul.f32 1.442695, %v1843_v38  ;;  %4794 = vpow2.f32 %v1878_v28 }
 0x338   : > { %v1789_v4 = vpop.xlane.xlu1 %1788 }
 0x339   : > { %v5998_v51 = vpop.eup %4786  ;;  %v1845_v37 = vsub.f32 %v5931_v25, %v1789_v4  ;;  %v1882_v6 = vmul.f32 1.442695, %v1844_v58  ;;  %4796 = vpow2.f32 %v1880_v9 }
 0x33a   : > { %1934 = vadd.xlane.f32.xlu0 %v5998_v51  ;;  %v6001_v16 = vpop.eup %4788  ;;  %v1791_v14 = vpop.xlane.xlu0 %1790 }
 0x33b   : > { %v1846_v22 = vsub.f32 %v5940_v61, %v1791_v14  ;;  %v1884_v41 = vmul.f32 1.442695, %v1845_v37  ;;  %4798 = vpow2.f32 %v1882_v6 }
 0x33c   : > { %v1793_v3 = vpop.xlane.xlu1 %1792 }
 0x33d   : > { %v6003_v43 = vpop.eup %4790  ;;  %v1847_v55 = vsub.f32 %v5945_v31, %v1793_v3  ;;  %v1886_v62 = vmul.f32 1.442695, %v1846_v22  ;;  %4800 = vpow2.f32 %v1884_v41 }
 0x33e   : > { %1938 = vadd.xlane.f32.xlu0 %v6001_v16  ;;  %1936 = vadd.xlane.f32.xlu1 %v6003_v43  ;;  %v6007_v10 = vpop.eup %4792  ;;  %v1795_v18 = vpop.xlane.xlu0 %1794 }
 0x33f   : > { %v1848_v25 = vsub.f32 %v5938_v34, %v1795_v18  ;;  %v1888_v49 = vmul.f32 1.442695, %v1847_v55  ;;  %4802 = vpow2.f32 %v1886_v62 }
 0x340   : > { %v1797_v15 = vpop.xlane.xlu1 %1796 }
 0x341   : > { %v1849_v4 = vsub.f32 %v5943_v0, %v1797_v15  ;;  %v1890_v61 = vmul.f32 1.442695, %v1848_v25  ;;  %v6030_v3 = vpop.eup %4794  ;;  %4804 = vpow2.f32 %v1888_v49 }
 0x342   : > { %1940 = vadd.xlane.f32.xlu1 %v6007_v10  ;;  %1814 = vmax.xlane.f32.xlu0 %v5976_v52  ;;  %v1799_v59 = vpop.xlane.xlu0 %1798 }
 0x343   : > { %v1850_v31 = vsub.f32 %v5952_v33, %v1799_v59  ;;  %v1892_v28 = vmul.f32 1.442695, %v1849_v4  ;;  %4806 = vpow2.f32 %v1890_v61  ;;  %v6036_v18 = vpop.eup %4796 }
 0x344   : > { %v1801_v38 = vpop.xlane.xlu1 %1800 }
 0x345   : > { %v1851_v34 = vsub.f32 %v5957_v42, %v1801_v38  ;;  %v1894_v0 = vmul.f32 1.442695, %v1850_v31  ;;  %v6038_v37 = vpop.eup %4798  ;;  %4808 = vpow2.f32 %v1892_v28 }
 0x346   : > { %1818 = vmax.xlane.f32.xlu0 %v5974_v21  ;;  %1816 = vmax.xlane.f32.xlu1 %v5980_v48  ;;  %v1803_v14 = vpop.xlane.xlu0 %1802 }
 0x347   : > { %v1852_v58 = vsub.f32 %v5950_v24, %v1803_v14  ;;  %v1896_v33 = vmul.f32 1.442695, %v1851_v34  ;;  %4810 = vpow2.f32 %v1894_v0  ;;  %v6043_v22 = vpop.eup %4800 }
 0x348   : > { %v1805_v9 = vpop.xlane.xlu1 %1804 }
 0x349   : > { %v1898_v42 = vmul.f32 1.442695, %v1852_v58  ;;  %v1853_v6 = vsub.f32 %v5955_v19, %v1805_v9  ;;  %v6045_v15 = vpop.eup %4802  ;;  %4812 = vpow2.f32 %v1896_v33 }
 0x34a   : > { %1820 = vmax.xlane.f32.xlu1 %v5978_v32  ;;  %1822 = vmax.xlane.f32.xlu0 %v5984_v63 }
 0x34b   : > { %4814 = vpow2.f32 %v1898_v42  ;;  %v1900_v24 = vmul.f32 1.442695, %v1853_v6  ;;  %v6049_v41 = vpop.eup %4804 }
 0x34d   : > { %v6051_v55 = vpop.eup %4806  ;;  %4816 = vpow2.f32 %v1900_v24 }
 0x34e   : > { %1826 = vmax.xlane.f32.xlu0 %v5982_v40  ;;  %1824 = vmax.xlane.f32.xlu1 %v5988_v46 }
 0x34f   : > { %v6055_v19 = vpop.eup %4808 }
 0x351   : > { %v6057_v59 = vpop.eup %4810 }
 0x352   : > { %1828 = vmax.xlane.f32.xlu1 %v5986_v2  ;;  %1830 = vmax.xlane.f32.xlu0 %v5992_v8 }
 0x353   : > { %v6062_v49 = vpop.eup %4812 }
 0x355   : > { %v6064_v38 = vpop.eup %4814 }
 0x356   : > { %1834 = vmax.xlane.f32.xlu0 %v5990_v12  ;;  %1832 = vmax.xlane.f32.xlu1 %v5996_v30 }
 0x357   : > { %v6070_v58 = vpop.eup %4816 }
 0x35a   : > { %1942 = vadd.xlane.f32.xlu0 %v6030_v3  ;;  %1836 = vmax.xlane.f32.xlu1 %v5994_v39 }
 0x35e   : > { %1946 = vadd.xlane.f32.xlu0 %v6038_v37  ;;  %1944 = vadd.xlane.f32.xlu1 %v6036_v18 }
 0x362   : > { %1950 = vadd.xlane.f32.xlu0 %v6045_v15  ;;  %1948 = vadd.xlane.f32.xlu1 %v6043_v22 }
 0x366   : > { %1954 = vadd.xlane.f32.xlu0 %v6051_v55  ;;  %1952 = vadd.xlane.f32.xlu1 %v6049_v41 }
 0x36a   : > { %v1807_v62 = vpop.xlane.xlu0 %1806  ;;  %1958 = vadd.xlane.f32.xlu0 %v6057_v59  ;;  %1956 = vadd.xlane.f32.xlu1 %v6055_v19 }
 0x36b   : > { %v1854_v25 = vsub.f32 %v5964_v17, %v1807_v62 }
 0x36c   : > { %v1809_v4 = vpop.xlane.xlu1 %1808 }
 0x36d   : > { %v1902_v61 = vmul.f32 1.442695, %v1854_v25  ;;  %v1855_v31 = vsub.f32 %v5969_v7, %v1809_v4 }
 0x36e   : > { %v1811_v14 = vpop.xlane.xlu0 %1810  ;;  %1962 = vadd.xlane.f32.xlu0 %v6064_v38  ;;  %1960 = vadd.xlane.f32.xlu1 %v6062_v49 }
 0x36f   : > { %4818 = vpow2.f32 %v1902_v61  ;;  %v1904_v28 = vmul.f32 1.442695, %v1855_v31  ;;  %v1856_v34 = vsub.f32 %v5962_v1, %v1811_v14 }
 0x370   : > { %v1813_v0 = vpop.xlane.xlu1 %1812 }
 0x371   : > { %4820 = vpow2.f32 %v1904_v28  ;;  %v1906_v17 = vmul.f32 1.442695, %v1856_v34  ;;  %v1857_v9 = vsub.f32 %v5967_v20, %v1813_v0 }
 0x372   : > { %1964 = vadd.xlane.f32.xlu1 %v6070_v58 }
 0x373   : > { %4822 = vpow2.f32 %v1906_v17  ;;  %v1908_v7 = vmul.f32 1.442695, %v1857_v9 }
 0x375   : > { %4824 = vpow2.f32 %v1908_v7 }
 0x379   : > { %v6074_v33 = vpop.eup %4818 }
 0x37a   : > { %1966 = vadd.xlane.f32.xlu0 %v6074_v33 }
 0x37b   : > { %v6077_v42 = vpop.eup %4820 }
 0x37c   : > { %1968 = vadd.xlane.f32.xlu1 %v6077_v42 }
 0x37d   : > { %v6080_v1 = vpop.eup %4822 }
 0x37e   : > { %1970 = vadd.xlane.f32.xlu0 %v6080_v1 }
 0x37f   : > { %v6083_v6 = vpop.eup %4824 }
 0x380   : > { %1972 = vadd.xlane.f32.xlu1 %v6083_v6 }
 0x3c7   : > { %v1935_v20 = vpop.xlane.xlu0 %1934 }
 0x3c8   : > { %4826 = vrcp.f32 %v1935_v20 }
 0x3cb   : > { %v1939_v24 = vpop.xlane.xlu0 %1938  ;;  %v1937_v62 = vpop.xlane.xlu1 %1936 }
 0x3cc   : > { %4828 = vrcp.f32 %v1937_v62 }
 0x3cd   : > { %4830 = vrcp.f32 %v1939_v24 }
 0x3cf   : > { %v1941_v25 = vpop.xlane.xlu1 %1940  ;;  %v1815_v4 = vpop.xlane.xlu0 %1814 }
 0x3d0   : > { %4832 = vrcp.f32 %v1941_v25  ;;  %v1858_v61 = vsub.f32 %v5976_v52, %v1815_v4 }
 0x3d2   : > { %v1910_v31 = vmul.f32 1.442695, %v1858_v61  ;;  %v4827_v34 = vpop.eup %4826  ;;  %v1497_v61 = vpop.f32.mrb[127].mxu0 }
 0x3d3   : > { %v1819_v14 = vpop.xlane.xlu0 %1818  ;;  %v1817_v28 = vpop.xlane.xlu1 %1816  ;;  %v2030_v24 = vmul.f32 %v4827_v34, %v5998_v51 }
 0x3d4   : > { %4834 = vpow2.f32 %v1910_v31  ;;  %v1860_v0 = vsub.f32 %v5974_v21, %v1819_v14  ;;  %v1859_v17 = vsub.f32 %v5980_v48, %v1817_v28  ;;  %v6094_v21 = vpack.c.bf16 %v1497_v61, %v5923_v45 }
 0x3d6   : > { %v1914_v9 = vmul.f32 1.442695, %v1860_v0  ;;  %v1912_v7 = vmul.f32 1.442695, %v1859_v17  ;;  %v4829_v20 = vpop.eup %4828 }
 0x3d7   : > { %v1821_v47 = vpop.xlane.xlu1 %1820  ;;  %v1823_v62 = vpop.xlane.xlu0 %1822  ;;  %v2031_v4 = vmul.f32 %v4829_v20, %v6003_v43 }
 0x3d8   : > { %v4831_v57 = vpop.eup %4830  ;;  %4836 = vpow2.f32 %v1914_v9  ;;  %v1861_v52 = vsub.f32 %v5978_v32, %v1821_v47  ;;  %v1862_v25 = vsub.f32 %v5984_v63, %v1823_v62 }
 0x3d9   : > { %4838 = vpow2.f32 %v1912_v7  ;;  %v2062_v28 = vpack.c.bf16 %v2031_v4, %v2030_v24  ;;  %v2032_v0 = vmul.f32 %v4831_v57, %v6001_v16 }
 0x3da   : > { %v4833_v48 = vpop.eup %4832  ;;  %v1916_v31 = vmul.f32 1.442695, %v1861_v52  ;;  %v1918_v14 = vmul.f32 1.442695, %v1862_v25 }
 0x3db   : > { %v2033_v51 = vmul.f32 %v4833_v48, %v6007_v10  ;;  %v1827_v34 = vpop.xlane.xlu0 %1826  ;;  %v1825_v17 = vpop.xlane.xlu1 %1824  ;;  %4262 = vmatprep.mubr.bf16.mxu1 %v2062_v28 }
 0x3dc   : > { %4840 = vpow2.f32 %v1916_v31  ;;  %v1864_v47 = vsub.f32 %v5982_v40, %v1827_v34  ;;  %v1863_v63 = vsub.f32 %v5988_v46, %v1825_v17 }
 0x3dd   : > { %4842 = vpow2.f32 %v1918_v14  ;;  %v2063_v32 = vpack.c.bf16 %v2033_v51, %v2032_v0 }
 0x3de   : > { %v6100_v45 = vpop.eup %4834  ;;  %v1922_v43 = vmul.f32 1.442695, %v1864_v47  ;;  %v1920_v9 = vmul.f32 1.442695, %v1863_v63 }
 0x3df   : > { %v1829_v7 = vpop.xlane.xlu1 %1828  ;;  %1974 = vadd.xlane.f32.xlu0 %v6100_v45  ;;  %v1831_v57 = vpop.xlane.xlu0 %1830  ;;  %4263 = vmatmul.mubr.bf16.vlgmr.msra.gmra.mrb[96].mxu1 %v2063_v32 }
 0x3e0   : > { %4844 = vpow2.f32 %v1922_v43  ;;  %v1865_v16 = vsub.f32 %v5986_v2, %v1829_v7  ;;  %v1866_v10 = vsub.f32 %v5992_v8, %v1831_v57  ;;  %4311 = vmatpush3.bf16.xpose.msra.mxu1 %v5643_v60 }
 0x3e1   : > { %4846 = vpow2.f32 %v1920_v9  ;;  %4312 = vmatprep.subr.bf16.mxu1 %v5657_v35 }
 0x3e2   : > { %v6107_v46 = vpop.eup %4836  ;;  %v1924_v40 = vmul.f32 1.442695, %v1865_v16  ;;  %v1926_v20 = vmul.f32 1.442695, %v1866_v10 }
 0x3e3   : > { %v6109_v62 = vpop.eup %4838  ;;  %1978 = vadd.xlane.f32.xlu0 %v6107_v46  ;;  %v1835_v24 = vpop.xlane.xlu0 %1834 }
 0x3e4   : > { %v1833_v52 = vpop.xlane.xlu1 %1832  ;;  %4848 = vpow2.f32 %v1924_v40  ;;  %v1868_v2 = vsub.f32 %v5990_v12, %v1835_v24  ;;  %1976 = vadd.xlane.f32.xlu1 %v6109_v62 }
 0x3e5   : > { %v1867_v60 = vsub.f32 %v5996_v30, %v1833_v52  ;;  %4850 = vpow2.f32 %v1926_v20 }
 0x3e6   : > { %v6115_v8 = vpop.eup %4840  ;;  %v1930_v25 = vmul.f32 1.442695, %v1868_v2 }
 0x3e7   : > { %v1928_v4 = vmul.f32 1.442695, %v1867_v60  ;;  %v6117_v61 = vpop.eup %4842  ;;  %v1943_v48 = vpop.xlane.xlu0 %1942 }
 0x3e8   : > { %v1837_v31 = vpop.xlane.xlu1 %1836  ;;  %4852 = vpow2.f32 %v1930_v25  ;;  %1982 = vadd.xlane.f32.xlu0 %v6117_v61  ;;  %1980 = vadd.xlane.f32.xlu1 %v6115_v8 }
 0x3e9   : > { %v1869_v12 = vsub.f32 %v5994_v39, %v1837_v31  ;;  %4854 = vpow2.f32 %v1928_v4  ;;  %4313 = vmatpush3.bf16.xpose.msra.mxu1 %v5657_v35 }
 0x3ea   : > { %v6123_v30 = vpop.eup %4844  ;;  %4314 = vmatprep.subr.bf16.mxu1 %v5673_v56  ;;  %4856 = vrcp.f32 %v1943_v48 }
 0x3eb   : > { %v1932_v14 = vmul.f32 1.442695, %v1869_v12  ;;  %v6126_v28 = vpop.eup %4846  ;;  %v1947_v0 = vpop.xlane.xlu0 %1946 }
 0x3ec   : > { %v1945_v51 = vpop.xlane.xlu1 %1944  ;;  %1986 = vadd.xlane.f32.xlu0 %v6123_v30  ;;  %1984 = vadd.xlane.f32.xlu1 %v6126_v28 }
 0x3ed   : > { %4858 = vpow2.f32 %v1932_v14 }
 0x3ee   : > { %v6130_v34 = vpop.eup %4848  ;;  %4860 = vrcp.f32 %v1945_v51 }
 0x3ef   : > { %v6132_v39 = vpop.eup %4850  ;;  %4862 = vrcp.f32 %v1947_v0  ;;  %v1951_v35 = vpop.xlane.xlu0 %1950 }
 0x3f0   : > { %v1949_v17 = vpop.xlane.xlu1 %1948  ;;  %1990 = vadd.xlane.f32.xlu0 %v6132_v39  ;;  %1988 = vadd.xlane.f32.xlu1 %v6130_v34 }
 0x3f1   : > { %4864 = vrcp.f32 %v1949_v17  ;;  %4315 = vmatpush3.bf16.xpose.msra.mxu1 %v5673_v56 }
 0x3f2   : > { %v6137_v47 = vpop.eup %4852  ;;  %4316 = vmatprep.subr.bf16.mxu1 %v5689_v50  ;;  %4866 = vrcp.f32 %v1951_v35 }
 0x3f3   : > { %v6140_v63 = vpop.eup %4854  ;;  %v1955_v32 = vpop.xlane.xlu0 %1954 }
 0x3f4   : > { %v1953_v43 = vpop.xlane.xlu1 %1952  ;;  %1994 = vadd.xlane.f32.xlu0 %v6137_v47  ;;  %1992 = vadd.xlane.f32.xlu1 %v6140_v63  ;;  %v4857_v9 = vpop.eup %4856 }
 0x3f5   : > { %4868 = vrcp.f32 %v1953_v43  ;;  %v2034_v40 = vmul.f32 %v4857_v9, %v6030_v3 }
 0x3f6   : > { %4870 = vrcp.f32 %v1955_v32 }
 0x3f7   : > { %v6144_v7 = vpop.eup %4858  ;;  %v1959_v57 = vpop.xlane.xlu0 %1958 }
 0x3f8   : > { %v1957_v56 = vpop.xlane.xlu1 %1956  ;;  %v4861_v16 = vpop.eup %4860  ;;  %1996 = vadd.xlane.f32.xlu1 %v6144_v7 }
 0x3f9   : > { %v4863_v10 = vpop.eup %4862  ;;  %4872 = vrcp.f32 %v1957_v56  ;;  %4317 = vmatpush3.bf16.xpose.msra.mxu1 %v5689_v50  ;;  %v2035_v20 = vmul.f32 %v4861_v16, %v6036_v18 }
 0x3fa   : > { %4318 = vmatprep.subr.bf16.mxu1 %v5705_v23  ;;  %4874 = vrcp.f32 %v1959_v57  ;;  %v2036_v25 = vmul.f32 %v4863_v10, %v6038_v37 }
 0x3fb   : > { %v4865_v24 = vpop.eup %4864  ;;  %v1963_v52 = vpop.xlane.xlu0 %1962  ;;  %v2064_v60 = vpack.c.bf16 %v2035_v20, %v2034_v40 }
 0x3fc   : > { %v1961_v2 = vpop.xlane.xlu1 %1960  ;;  %v2037_v4 = vmul.f32 %v4865_v24, %v6043_v22  ;;  %v4867_v48 = vpop.eup %4866 }
 0x3fd   : > { %4876 = vrcp.f32 %v1961_v2  ;;  %4266 = vmatprep.mubr.bf16.mxu1 %v2064_v60  ;;  %v2038_v18 = vmul.f32 %v4867_v48, %v6045_v15 }
 0x3fe   : > { %4878 = vrcp.f32 %v1963_v52  ;;  %v2065_v50 = vpack.c.bf16 %v2037_v4, %v2036_v25  ;;  %v7241_v25 = vld [vmem:[#allocation14_spill] sm:$0xff]  ;;  %v7244_v4 = vld [vmem:[#allocation16_spill] sm:$0xff] }
 0x3ff   : > { %v4869_v31 = vpop.eup %4868 }
 0x400   : > { %v1965_v3 = vpop.xlane.xlu1 %1964  ;;  %4267 = vmatmul.mubr.bf16.gmra.mrb[100].mxu1 %v2065_v50  ;;  %v2039_v12 = vmul.f32 %v4869_v31, %v6049_v41  ;;  %v4871_v14 = vpop.eup %4870  ;;  %v7247_v50 = vld [vmem:[#allocation49_spill] sm:$0xff]  ;;  %v7249_v31 = vld [vmem:[#allocation19_spill] sm:$0xff] }
 0x401   : > { %4880 = vrcp.f32 %v1965_v3  ;;  %4319 = vmatpush3.bf16.xpose.msra.mxu1 %v5705_v23  ;;  %v2040_v0 = vmul.f32 %v4871_v14, %v6051_v55  ;;  %v7250_v3 = vld [vmem:[#allocation18_spill] sm:$0xff]  ;;  %v7253_v14 = vld [vmem:[#allocation20_spill] sm:$0xff] }
 0x402   : > { %4320 = vmatprep.subr.bf16.mxu1 %v5720_v53  ;;  %v2066_v37 = vpack.c.bf16 %v2039_v12, %v2038_v18  ;;  %v7251_v18 = vpack.c.bf16 %v7249_v31, %v7250_v3  ;;  %v7252_v12 = vld [vmem:[#allocation21_spill] sm:$0xff] }
 0x403   : > { %v4873_v22 = vpop.eup %4872 }
 0x404   : > { %4270 = vmatprep.mubr.bf16.mxu1 %v2066_v37  ;;  %v2041_v51 = vmul.f32 %v4873_v22, %v6055_v19  ;;  %v4875_v35 = vpop.eup %4874  ;;  %v7254_v37 = vpack.c.bf16 %v7252_v12, %v7253_v14  ;;  %v7255_v22 = vld [vmem:[#allocation50_spill] sm:$0xff]  ;;  %v7269_v12 = vld [vmem:[#allocation27_spill] sm:$0xff] }
 0x405   : > { %v2042_v15 = vmul.f32 %v4875_v35, %v6057_v59  ;;  %v7258_v35 = vld [vmem:[#allocation23_spill] sm:$0xff]  ;;  %v7270_v14 = vld [vmem:[#allocation26_spill] sm:$0xff] }
 0x406   : > { %v2067_v17 = vpack.c.bf16 %v2041_v51, %v2040_v0  ;;  %v7256_v0 = vld [vmem:[#allocation51_spill] sm:$0xff] }
 0x407   : > { %v4877_v32 = vpop.eup %4876  ;;  %v1967_v43 = vpop.xlane.xlu0 %1966  ;;  %v7257_v51 = vld [vmem:[#allocation35_spill] sm:$0xff] }
 0x408   : > { %v4879_v9 = vpop.eup %4878  ;;  %4882 = vrcp.f32 %v1967_v43  ;;  %4271 = vmatmul.mubr.bf16.gmra.mrb[104].mxu1 %v2067_v17  ;;  %v2043_v23 = vmul.f32 %v4877_v32, %v6062_v49  ;;  %v7259_v17 = vld [vmem:[#allocation22_spill] sm:$0xff]  ;;  %v7261_v43 = vld [vmem:[#allocation52_spill] sm:$0xff] }
 0x409   : > { %4321 = vmatpush3.bf16.xpose.msra.mxu1 %v5720_v53  ;;  %v1969_v41 = vpop.xlane.xlu1 %1968  ;;  %v2044_v56 = vmul.f32 %v4879_v9, %v6064_v38  ;;  %v7232_v53 = vpack.c.bf16 %v5645_v5, %v5641_v29  ;;  %v7233_v5 = vpack.c.bf16 %v5659_v36, %v5653_v27  ;;  %v7243_v36 = vld [vmem:[#allocation17_spill] sm:$0xff]  ;;  %v7260_v32 = vpack.c.bf16 %v7258_v35, %v7259_v17  ;;  %v7262_v9 = vld [vmem:[#allocation38_spill] sm:$0xff]  ;;  %v7280_v17 = vld [vmem:[#allocation36_spill] sm:$0xff] }
 0x40a   : > { %4322 = vmatprep.subr.bf16.mxu1 %v5734_v13  ;;  %4884 = vrcp.f32 %v1969_v41  ;;  %v2068_v55 = vpack.c.bf16 %v2043_v23, %v2042_v15  ;;  %v7245_v48 = vpack.c.bf16 %v7243_v36, %v7244_v4  ;;  %v7263_v15 = vld [vmem:[#allocation41_spill] sm:$0xff] }
 0x40b   : > { %v4881_v57 = vpop.eup %4880  ;;  %v1971_v19 = vpop.xlane.xlu0 %1970  ;;  %v7264_v23 = vld [vmem:[#allocation45_spill] sm:$0xff] }
 0x40c   : > { %v2045_v16 = vmul.f32 %v4881_v57, %v6070_v58  ;;  %4886 = vrcp.f32 %v1971_v19  ;;  %4274 = vmatprep.mubr.bf16.mxu1 %v2068_v55  ;;  %v7265_v41 = vld [vmem:[#allocation53_spill] sm:$0xff] }
 0x40d   : > { %v1973_v10 = vpop.xlane.xlu1 %1972 }
 0x40e   : > { %v2069_v40 = vpack.c.bf16 %v2045_v16, %v2044_v56  ;;  %4888 = vrcp.f32 %v1973_v10 }
 0x410   : > { %4275 = vmatmul.mubr.bf16.gmra.mrb[108].mxu1 %v2069_v40 }
 0x411   : > { %4323 = vmatpush3.bf16.xpose.msra.mxu1 %v5734_v13  ;;  %4326 = vmatprep.mubr.bf16.mxu1 %v7232_v53  ;;  %v7234_v13 = vld [vmem:[#allocation13_spill] sm:$0xff] }
 0x412   : > { %v4883_v59 = vpop.eup %4882  ;;  %4324 = vmatprep.subr.bf16.mxu1 %v5748_v11 }
 0x413   : > { %v2046_v38 = vmul.f32 %v4883_v59, %v6074_v33  ;;  %v7235_v33 = vld [vmem:[#allocation12_spill] sm:$0xff] }
 0x414   : > { %v4885_v49 = vpop.eup %4884 }
 0x415   : > { %v2047_v58 = vmul.f32 %v4885_v49, %v6077_v42  ;;  %v7236_v42 = vpack.c.bf16 %v7234_v13, %v7235_v33 }
 0x416   : > { %v4887_v20 = vpop.eup %4886 }
 0x417   : > { %v2070_v24 = vpack.c.bf16 %v2047_v58, %v2046_v38  ;;  %v2048_v2 = vmul.f32 %v4887_v20, %v6080_v1  ;;  %v7238_v1 = vld [vmem:[#allocation47_spill] sm:$0xff] }
 0x418   : > { %v4889_v52 = vpop.eup %4888 }
 0x419   : > { %v2049_v60 = vmul.f32 %v4889_v52, %v6083_v6  ;;  %4325 = vmatpush3.bf16.xpose.msra.mxu1 %v5748_v11  ;;  %4294 = vmatprep.mubr.bf16.mxu0 %v2070_v24  ;;  %v7237_v11 = vld [vmem:[#allocation46_spill] sm:$0xff]  ;;  %v7240_v6 = vld [vmem:[#allocation15_spill] sm:$0xff] }
 0x41a   : > { %4374 = vmatprep.subr.bf16.mxu1 %v5877_v54  ;;  %v7242_v27 = vpack.c.bf16 %v7240_v6, %v7241_v25 }
 0x41b   : > { %v2071_v29 = vpack.c.bf16 %v2049_v60, %v2048_v2 }
 0x41d   : > { %4295 = vmatmul.mubr.bf16.vlgmr.msra.gmra.mrb[128].mxu0 %v2071_v29 }
 0x41e   : > { %4343 = vmatpush3.bf16.xpose.msra.mxu0 %v5762_v26  ;;  %v7239_v26 = vld [vmem:[#allocation29_spill] sm:$0xff] }
 0x41f   : > { %4344 = vmatprep.subr.bf16.mxu0 %v5782_v44 }
 0x420   : > { %4327 = vmatmul.mubr.bf16.vlgmr.msra.gmra.mrb[112].mxu1 %v7233_v5 }
 0x421   : > { %4330 = vmatprep.mubr.bf16.mxu1 %v7236_v42  ;;  %4375 = vmatpush3.bf16.msra.mxu1 %v5877_v54  ;;  %v7246_v54 = vld [vmem:[#allocation48_spill] sm:$0xff] }
 0x422   : > { %4376 = vmatprep.subr.bf16.mxu1 %v7237_v11 }
 0x425   : > { %4377 = vmatpush3.bf16.msra.mxu1 %v7237_v11 }
 0x426   : > { %4378 = vmatprep.subr.bf16.mxu1 %v7238_v1  ;;  %4345 = vmatpush3.bf16.xpose.msra.mxu0 %v5782_v44  ;;  %v7248_v44 = vld [vmem:[#allocation32_spill] sm:$0xff] }
 0x427   : > { %4346 = vmatprep.subr.bf16.mxu0 %v7239_v26 }
 0x428   : > { %4331 = vmatmul.mubr.bf16.gmra.mrb[116].mxu1 %v7242_v27 }
 0x429   : > { %4334 = vmatprep.mubr.bf16.mxu1 %v7245_v48  ;;  %4379 = vmatpush3.bf16.msra.mxu1 %v7238_v1 }
 0x42a   : > { %4380 = vmatprep.subr.bf16.mxu1 %v7246_v54 }
 0x42d   : > { %4381 = vmatpush3.bf16.msra.mxu1 %v7246_v54 }
 0x42e   : > { %4382 = vmatprep.subr.bf16.mxu1 %v7247_v50  ;;  %4347 = vmatpush3.bf16.xpose.msra.mxu0 %v7239_v26 }
 0x42f   : > { %4348 = vmatprep.subr.bf16.mxu0 %v7248_v44 }
 0x430   : > { %4335 = vmatmul.mubr.bf16.gmra.mrb[120].mxu1 %v7251_v18 }
 0x431   : > { %4338 = vmatprep.mubr.bf16.mxu1 %v7254_v37  ;;  %4383 = vmatpush3.bf16.msra.mxu1 %v7247_v50  ;;  %v7271_v37 = vpack.c.bf16 %v7269_v12, %v7270_v14 }
 0x432   : > { %4384 = vmatprep.subr.bf16.mxu1 %v7255_v22 }
 0x435   : > { %4385 = vmatpush3.bf16.msra.mxu1 %v7255_v22 }
 0x436   : > { %4386 = vmatprep.subr.bf16.mxu1 %v7256_v0  ;;  %4349 = vmatpush3.bf16.xpose.msra.mxu0 %v7248_v44 }
 0x437   : > { %4350 = vmatprep.subr.bf16.mxu0 %v7257_v51 }
 0x438   : > { %4339 = vmatmul.mubr.bf16.gmra.mrb[124].mxu1 %v7260_v32  ;;  %v7281_v32 = vld [vmem:[#allocation34_spill] sm:$0xff] }
 0x439   : > { %4387 = vmatpush3.bf16.msra.mxu1 %v7256_v0  ;;  %v7277_v0 = vld [vmem:[#allocation33_spill] sm:$0xff] }
 0x43a   : > { %4388 = vmatprep.subr.bf16.mxu1 %v7261_v43 }
 0x43d   : > { %4389 = vmatpush3.bf16.msra.mxu1 %v7261_v43  ;;  %v7282_v43 = vpack.c.bf16 %v7280_v17, %v7281_v32 }
 0x43e   : > { %4351 = vmatpush3.bf16.xpose.msra.mxu0 %v7257_v51  ;;  %v7278_v51 = vld [vmem:[#allocation31_spill] sm:$0xff] }
 0x43f   : > { %4352 = vmatprep.subr.bf16.mxu0 %v7262_v9  ;;  %v7279_v35 = vpack.c.bf16 %v7277_v0, %v7278_v51 }
 0x446   : > { %4353 = vmatpush3.bf16.xpose.msra.mxu0 %v7262_v9  ;;  %v7283_v9 = vld [vmem:[#allocation56_spill] sm:$0xff] }
 0x447   : > { %4354 = vmatprep.subr.bf16.mxu0 %v7263_v15 }
 0x44e   : > { %4355 = vmatpush3.bf16.xpose.msra.mxu0 %v7263_v15  ;;  %v7284_v15 = vld [vmem:[#allocation57_spill] sm:$0xff] }
 0x44f   : > { %4356 = vmatprep.subr.bf16.mxu0 %v7264_v23 }
 0x456   : > { %4357 = vmatpush3.bf16.xpose.msra.mxu0 %v7264_v23  ;;  %v7285_v23 = vld [vmem:[#allocation39_spill] sm:$0xff] }
 0x457   : > { %4406 = vmatprep.subr.bf16.mxu0 %v7265_v41 }
 0x46c   : > { %v1975_v57 = vpop.xlane.xlu0 %1974 }
 0x46d   : > { %4890 = vrcp.f32 %v1975_v57 }
 0x470   : > { %v1979_v55 = vpop.xlane.xlu0 %1978 }
 0x471   : > { %v1977_v19 = vpop.xlane.xlu1 %1976 }
 0x472   : > { %4892 = vrcp.f32 %v1977_v19  ;;  %v7289_v19 = vld [vmem:[#allocation40_spill] sm:$0xff] }
 0x473   : > { %4894 = vrcp.f32 %v1979_v55  ;;  %v7288_v55 = vld [vmem:[#allocation42_spill] sm:$0xff] }
 0x475   : > { %v1983_v56 = vpop.xlane.xlu0 %1982  ;;  %v1981_v16 = vpop.xlane.xlu1 %1980 }
 0x476   : > { %4896 = vrcp.f32 %v1981_v16  ;;  %v7291_v16 = vld [vmem:[#allocation58_spill] sm:$0xff] }
 0x477   : > { %4898 = vrcp.f32 %v1983_v56  ;;  %v4891_v53 = vpop.eup %4890  ;;  %v7290_v56 = vpack.c.bf16 %v7288_v55, %v7289_v19 }
 0x478   : > { %v2050_v58 = vmul.f32 %v4891_v53, %v6100_v45  ;;  %v7292_v53 = vld [vmem:[#allocation59_spill] sm:$0xff] }
 0x479   : > { %v1987_v10 = vpop.xlane.xlu0 %1986  ;;  %v1985_v40 = vpop.xlane.xlu1 %1984 }
 0x47a   : > { %4900 = vrcp.f32 %v1985_v40 }
 0x47b   : > { %4902 = vrcp.f32 %v1987_v10 }
 0x47c   : > { %v4893_v59 = vpop.eup %4892 }
 0x47d   : > { %v1991_v49 = vpop.xlane.xlu0 %1990  ;;  %v1989_v38 = vpop.xlane.xlu1 %1988  ;;  %v2051_v20 = vmul.f32 %v4893_v59, %v6109_v62 }
 0x47e   : > { %v4895_v24 = vpop.eup %4894  ;;  %4904 = vrcp.f32 %v1989_v38 }
 0x47f   : > { %v2072_v52 = vpack.c.bf16 %v2051_v20, %v2050_v58  ;;  %4906 = vrcp.f32 %v1991_v49  ;;  %v2052_v5 = vmul.f32 %v4895_v24, %v6107_v46  ;;  %v7293_v58 = vld [vmem:[#allocation44_spill] sm:$0xff]  ;;  %v7294_v20 = vld [vmem:[#allocation43_spill] sm:$0xff] }
 0x480   : > { %v4897_v2 = vpop.eup %4896  ;;  %v7295_v24 = vpack.c.bf16 %v7293_v58, %v7294_v20 }
 0x481   : > { %v1995_v60 = vpop.xlane.xlu0 %1994  ;;  %v1993_v29 = vpop.xlane.xlu1 %1992  ;;  %4298 = vmatprep.mubr.bf16.mxu0 %v2072_v52  ;;  %v2053_v13 = vmul.f32 %v4897_v2, %v6115_v8 }
 0x482   : > { %v4899_v33 = vpop.eup %4898  ;;  %4908 = vrcp.f32 %v1993_v29 }
 0x483   : > { %4910 = vrcp.f32 %v1995_v60  ;;  %v2073_v42 = vpack.c.bf16 %v2053_v13, %v2052_v5  ;;  %v2054_v62 = vmul.f32 %v4899_v33, %v6117_v61 }
 0x484   : > { %v4901_v11 = vpop.eup %4900 }
 0x485   : > { %v1997_v45 = vpop.xlane.xlu1 %1996  ;;  %4299 = vmatmul.mubr.bf16.gmra.mrb[132].mxu0 %v2073_v42  ;;  %v2055_v1 = vmul.f32 %v4901_v11, %v6126_v28  ;;  %v4903_v26 = vpop.eup %4902 }
 0x486   : > { %4912 = vrcp.f32 %v1997_v45  ;;  %v2056_v46 = vmul.f32 %v4903_v26, %v6123_v30  ;;  %v7266_v30 = vld [vmem:[#allocation25_spill] sm:$0xff] }
 0x487   : > { %v2074_v6 = vpack.c.bf16 %v2055_v1, %v2054_v62 }
 0x488   : > { %v4905_v25 = vpop.eup %4904 }
 0x489   : > { %4302 = vmatprep.mubr.bf16.mxu0 %v2074_v6  ;;  %v2057_v8 = vmul.f32 %v4905_v25, %v6130_v34  ;;  %v4907_v27 = vpop.eup %4906  ;;  %v7267_v34 = vld [vmem:[#allocation24_spill] sm:$0xff] }
 0x48a   : > { %v2058_v54 = vmul.f32 %v4907_v27, %v6132_v39  ;;  %v7268_v18 = vpack.c.bf16 %v7266_v30, %v7267_v34  ;;  %v7272_v39 = vld [vmem:[#allocation30_spill] sm:$0xff] }
 0x48b   : > { %v2075_v36 = vpack.c.bf16 %v2057_v8, %v2056_v46 }
 0x48c   : > { %v4909_v4 = vpop.eup %4908 }
 0x48d   : > { %v4911_v48 = vpop.eup %4910  ;;  %4303 = vmatmul.mubr.bf16.gmra.mrb[136].mxu0 %v2075_v36  ;;  %v2059_v50 = vmul.f32 %v4909_v4, %v6140_v63  ;;  %v7273_v63 = vld [vmem:[#allocation28_spill] sm:$0xff] }
 0x48e   : > { %v2060_v28 = vmul.f32 %v4911_v48, %v6137_v47  ;;  %v7274_v22 = vpack.c.bf16 %v7272_v39, %v7273_v63  ;;  %v7275_v47 = vld [vmem:[#allocation54_spill] sm:$0xff] }
 0x48f   : > { %v2076_v44 = vpack.c.bf16 %v2059_v50, %v2058_v54 }
 0x490   : > { %v4913_v61 = vpop.eup %4912 }
 0x491   : > { %v2061_v31 = vmul.f32 %v4913_v61, %v6144_v7  ;;  %4306 = vmatprep.mubr.bf16.mxu0 %v2076_v44  ;;  %v7276_v7 = vld [vmem:[#allocation55_spill] sm:$0xff] }
 0x493   : > { %v2077_v3 = vpack.c.bf16 %v2061_v31, %v2060_v28 }
 0x495   : > { %4307 = vmatmul.mubr.bf16.gmra.mrb[140].mxu0 %v2077_v3 }
 0x496   : > { %4358 = vmatprep.mubr.bf16.mxu0 %v7268_v18 }
 0x49d   : > { %4359 = vmatmul.mubr.bf16.vlgmr.msra.gmra.mrb[144].mxu0 %v7271_v37 }
 0x49e   : > { %4407 = vmatpush3.bf16.msra.mxu0 %v7265_v41  ;;  %4362 = vmatprep.mubr.bf16.mxu0 %v7274_v22  ;;  %v7286_v41 = vld [vmem:[#allocation37_spill] sm:$0xff] }
 0x49f   : > { %4408 = vmatprep.subr.bf16.mxu0 %v7275_v47  ;;  %v7287_v57 = vpack.c.bf16 %v7285_v23, %v7286_v41 }
 0x4a2   : > { %4409 = vmatpush3.bf16.msra.mxu0 %v7275_v47 }
 0x4a3   : > { %4410 = vmatprep.subr.bf16.mxu0 %v7276_v7 }
 0x4a5   : > { %4363 = vmatmul.mubr.bf16.gmra.mrb[148].mxu0 %v7279_v35 }
 0x4a6   : > { %4411 = vmatpush3.bf16.msra.mxu0 %v7276_v7  ;;  %4366 = vmatprep.mubr.bf16.mxu0 %v7282_v43 }
 0x4a7   : > { %4412 = vmatprep.subr.bf16.mxu0 %v7283_v9 }
 0x4aa   : > { %4413 = vmatpush3.bf16.msra.mxu0 %v7283_v9 }
 0x4ab   : > { %4414 = vmatprep.subr.bf16.mxu0 %v7284_v15 }
 0x4ad   : > { %4367 = vmatmul.mubr.bf16.gmra.mrb[152].mxu0 %v7287_v57 }
 0x4ae   : > { %4415 = vmatpush3.bf16.msra.mxu0 %v7284_v15  ;;  %4370 = vmatprep.mubr.bf16.mxu0 %v7290_v56 }
 0x4af   : > { %4416 = vmatprep.subr.bf16.mxu0 %v7291_v16 }
 0x4b2   : > { %v6271_v10 = vpop.f32.mrb[96].mxu1  ;;  %4417 = vmatpush3.bf16.msra.mxu0 %v7291_v16 }
 0x4b3   : > { %v6274_v40 = vpop.f32.mrb[97].mxu1  ;;  %4418 = vmatprep.subr.bf16.mxu0 %v7292_v53 }
 0x4b4   : > { %v6277_v59 = vpop.f32.mrb[98].mxu1 }
 0x4b5   : > { %v6281_v38 = vpop.f32.mrb[99].mxu1  ;;  %4371 = vmatmul.mubr.bf16.gmra.mrb[156].mxu0 %v7295_v24 }
 0x4b6   : > { %4419 = vmatpush3.bf16.msra.mxu0 %v7292_v53 }
 0x4b7   : > { %4420 = vmatprep.subr.bf16.mxu0 %v6094_v21 }
 0x4ba   : > { %4421 = vmatpush3.bf16.msra.mxu0 %v6094_v21 }
 0x4d3   : > { %v6291_v2 = vpop.f32.mrb[100].mxu1 }
 0x4d4   : > { %v6293_v60 = vpop.f32.mrb[101].mxu1 }
 0x4d5   : > { %v6295_v29 = vpop.f32.mrb[102].mxu1 }
 0x4d6   : > { %v6299_v13 = vpop.f32.mrb[103].mxu1 }
 0x4db   : > { %v6303_v42 = vpop.f32.mrb[104].mxu1 }
 0x4dc   : > { %v6305_v11 = vpop.f32.mrb[105].mxu1 }
 0x4dd   : > { %v6307_v45 = vpop.f32.mrb[106].mxu1 }
 0x4de   : > { %v6311_v62 = vpop.f32.mrb[107].mxu1 }
 0x4e3   : > { %v6315_v26 = vpop.f32.mrb[108].mxu1 }
 0x4e4   : > { %v6317_v6 = vpop.f32.mrb[109].mxu1 }
 0x4e5   : > { %v6319_v25 = vpop.f32.mrb[110].mxu1 }
 0x4e6   : > { %v6323_v8 = vpop.f32.mrb[111].mxu1 }
 0x4f0   : > { %v6327_v36 = vpop.f32.mrb[128].mxu0 }
 0x4f1   : > { %7296 = vst [vmem:[#allocation13_spill] sm:$0xff] %v6327_v36  ;;  %v6329_v4 = vpop.f32.mrb[129].mxu0 }
 0x4f2   : > { %7297 = vst [vmem:[#allocation12_spill] sm:$0xff] %v6329_v4  ;;  %v6331_v48 = vpop.f32.mrb[130].mxu0 }
 0x4f3   : > { %7298 = vst [vmem:[#allocation46_spill] sm:$0xff] %v6331_v48  ;;  %v6333_v54 = vpop.f32.mrb[112].mxu1  ;;  %v6337_v61 = vpop.f32.mrb[131].mxu0 }
 0x4f4   : > { %7299 = vst [vmem:[#allocation47_spill] sm:$0xff] %v6337_v61  ;;  %v6339_v44 = vpop.f32.mrb[113].mxu1 }
 0x4f5   : > { %2578 = vmax.xlane.f32.xlu0 %v6339_v44  ;;  %v6344_v31 = vpop.f32.mrb[114].mxu1 }
 0x4f6   : > { %v6346_v3 = vpop.f32.mrb[115].mxu1 }
 0x4f7   : > { %2580 = vmax.xlane.f32.xlu1 %v6346_v3 }
 0x4f9   : > { %2582 = vmax.xlane.f32.xlu0 %v6333_v54 }
 0x4fb   : > { %2584 = vmax.xlane.f32.xlu1 %v6344_v31  ;;  %v6351_v30 = vpop.f32.mrb[116].mxu1 }
 0x4fc   : > { %v6353_v34 = vpop.f32.mrb[117].mxu1 }
 0x4fd   : > { %2586 = vmax.xlane.f32.xlu0 %v6353_v34  ;;  %v6356_v18 = vpop.f32.mrb[118].mxu1 }
 0x4fe   : > { %v6358_v12 = vpop.f32.mrb[119].mxu1 }
 0x4ff   : > { %2588 = vmax.xlane.f32.xlu1 %v6358_v12 }
 0x501   : > { %2590 = vmax.xlane.f32.xlu0 %v6351_v30 }
 0x503   : > { %2592 = vmax.xlane.f32.xlu1 %v6356_v18  ;;  %v6363_v14 = vpop.f32.mrb[120].mxu1 }
 0x504   : > { %v6365_v37 = vpop.f32.mrb[121].mxu1 }
 0x505   : > { %2594 = vmax.xlane.f32.xlu0 %v6365_v37  ;;  %v6368_v39 = vpop.f32.mrb[122].mxu1 }
 0x506   : > { %v6370_v63 = vpop.f32.mrb[123].mxu1 }
 0x507   : > { %2596 = vmax.xlane.f32.xlu1 %v6370_v63 }
 0x509   : > { %2598 = vmax.xlane.f32.xlu0 %v6363_v14 }
 0x50b   : > { %2600 = vmax.xlane.f32.xlu1 %v6368_v39  ;;  %v6375_v22 = vpop.f32.mrb[124].mxu1 }
 0x50c   : > { %v6377_v47 = vpop.f32.mrb[125].mxu1 }
 0x50d   : > { %2602 = vmax.xlane.f32.xlu0 %v6377_v47  ;;  %v6380_v7 = vpop.f32.mrb[126].mxu1 }
 0x50e   : > { %v6382_v0 = vpop.f32.mrb[127].mxu1 }
 0x50f   : > { %2604 = vmax.xlane.f32.xlu1 %v6382_v0 }
 0x511   : > { %2606 = vmax.xlane.f32.xlu0 %v6375_v22 }
 0x513   : > { %2608 = vmax.xlane.f32.xlu1 %v6380_v7 }
 0x558   : > { %v6387_v51 = vpop.f32.mrb[132].mxu0 }
 0x559   : > { %7300 = vst [vmem:[#allocation29_spill] sm:$0xff] %v6387_v51  ;;  %v6389_v35 = vpop.f32.mrb[133].mxu0 }
 0x55a   : > { %7301 = vst [vmem:[#allocation15_spill] sm:$0xff] %v6389_v35  ;;  %v6391_v17 = vpop.f32.mrb[134].mxu0 }
 0x55b   : > { %7302 = vst [vmem:[#allocation14_spill] sm:$0xff] %v6391_v17  ;;  %v6395_v43 = vpop.f32.mrb[135].mxu0 }
 0x55c   : > { %7303 = vst [vmem:[#allocation17_spill] sm:$0xff] %v6395_v43 }
 0x560   : > { %v6399_v15 = vpop.f32.mrb[136].mxu0 }
 0x561   : > { %7304 = vst [vmem:[#allocation16_spill] sm:$0xff] %v6399_v15  ;;  %v6401_v23 = vpop.f32.mrb[137].mxu0 }
 0x562   : > { %7305 = vst [vmem:[#allocation48_spill] sm:$0xff] %v6401_v23  ;;  %v6403_v41 = vpop.f32.mrb[138].mxu0 }
 0x563   : > { %7306 = vst [vmem:[#allocation49_spill] sm:$0xff] %v6403_v41  ;;  %v6407_v55 = vpop.f32.mrb[139].mxu0 }
 0x564   : > { %7307 = vst [vmem:[#allocation32_spill] sm:$0xff] %v6407_v55 }
 0x568   : > { %v6411_v56 = vpop.f32.mrb[140].mxu0 }
 0x569   : > { %7308 = vst [vmem:[#allocation19_spill] sm:$0xff] %v6411_v56  ;;  %v6413_v16 = vpop.f32.mrb[141].mxu0 }
 0x56a   : > { %7309 = vst [vmem:[#allocation18_spill] sm:$0xff] %v6413_v16  ;;  %v6415_v53 = vpop.f32.mrb[142].mxu0 }
 0x56b   : > { %7310 = vst [vmem:[#allocation21_spill] sm:$0xff] %v6415_v53  ;;  %v6419_v20 = vpop.f32.mrb[143].mxu0 }
 0x56c   : > { %7311 = vst [vmem:[#allocation20_spill] sm:$0xff] %v6419_v20 }
 0x570   : > { %v6423_v57 = vpop.f32.mrb[144].mxu0 }
 0x571   : > { %v6425_v32 = vpop.f32.mrb[145].mxu0 }
 0x572   : > { %2610 = vmax.xlane.f32.xlu0 %v6425_v32  ;;  %v6428_v19 = vpop.f32.mrb[146].mxu0 }
 0x573   : > { %v6430_v9 = vpop.f32.mrb[147].mxu0 }
 0x574   : > { %2612 = vmax.xlane.f32.xlu1 %v6430_v9 }
 0x576   : > { %2614 = vmax.xlane.f32.xlu0 %v6423_v57 }
 0x578   : > { %2616 = vmax.xlane.f32.xlu1 %v6428_v19  ;;  %v6435_v58 = vpop.f32.mrb[148].mxu0 }
 0x579   : > { %v6437_v50 = vpop.f32.mrb[149].mxu0 }
 0x57a   : > { %2622 = vmax.xlane.f32.xlu0 %v6435_v58  ;;  %v6440_v24 = vpop.f32.mrb[150].mxu0 }
 0x57b   : > { %v6442_v28 = vpop.f32.mrb[151].mxu0 }
 0x57c   : > { %2624 = vmax.xlane.f32.xlu1 %v6440_v24 }
 0x57e   : > { %2618 = vmax.xlane.f32.xlu0 %v6437_v50 }
 0x580   : > { %2620 = vmax.xlane.f32.xlu1 %v6442_v28  ;;  %v6447_v46 = vpop.f32.mrb[152].mxu0 }
 0x581   : > { %v6449_v21 = vpop.f32.mrb[153].mxu0 }
 0x582   : > { %v2579_v27 = vpop.xlane.xlu0 %2578  ;;  %v6452_v5 = vpop.f32.mrb[154].mxu0 }
 0x583   : > { %v2642_v1 = vsub.f32 %v6339_v44, %v2579_v27  ;;  %v6454_v49 = vpop.f32.mrb[155].mxu0 }
 0x584   : > { %v2581_v33 = vpop.xlane.xlu1 %2580 }
 0x585   : > { %v2674_v52 = vmul.f32 1.442695, %v2642_v1  ;;  %v2643_v56 = vsub.f32 %v6346_v3, %v2581_v33 }
 0x586   : > { %v2583_v53 = vpop.xlane.xlu0 %2582 }
 0x587   : > { %4914 = vpow2.f32 %v2674_v52  ;;  %v2676_v16 = vmul.f32 1.442695, %v2643_v56  ;;  %v2644_v20 = vsub.f32 %v6333_v54, %v2583_v53 }
 0x588   : > { %v2585_v15 = vpop.xlane.xlu1 %2584  ;;  %v6459_v55 = vpop.f32.mrb[156].mxu0 }
 0x589   : > { %4916 = vpow2.f32 %v2676_v16  ;;  %v2678_v41 = vmul.f32 1.442695, %v2644_v20  ;;  %v2645_v23 = vsub.f32 %v6344_v31, %v2585_v15  ;;  %v6461_v44 = vpop.f32.mrb[157].mxu0 }
 0x58a   : > { %v2587_v27 = vpop.xlane.xlu0 %2586  ;;  %v6463_v1 = vpop.f32.mrb[158].mxu0 }
 0x58b   : > { %4918 = vpow2.f32 %v2678_v41  ;;  %v2680_v51 = vmul.f32 1.442695, %v2645_v23  ;;  %v6465_v3 = vpop.f32.mrb[159].mxu0  ;;  %v2646_v52 = vsub.f32 %v6353_v34, %v2587_v27 }
 0x58c   : > { %v2589_v33 = vpop.xlane.xlu1 %2588 }
 0x58d   : > { %4920 = vpow2.f32 %v2680_v51  ;;  %v2647_v31 = vsub.f32 %v6358_v12, %v2589_v33  ;;  %v2682_v41 = vmul.f32 1.442695, %v2646_v52 }
 0x58e   : > { %v2591_v54 = vpop.xlane.xlu0 %2590 }
 0x58f   : > { %v2648_v23 = vsub.f32 %v6351_v30, %v2591_v54  ;;  %v2684_v51 = vmul.f32 1.442695, %v2647_v31  ;;  %4922 = vpow2.f32 %v2682_v41 }
 0x590   : > { %v2593_v15 = vpop.xlane.xlu1 %2592 }
 0x591   : > { %v6468_v56 = vpop.eup %4914  ;;  %v2649_v34 = vsub.f32 %v6356_v18, %v2593_v15  ;;  %v2686_v12 = vmul.f32 1.442695, %v2648_v23  ;;  %4924 = vpow2.f32 %v2684_v51 }
 0x592   : > { %2738 = vadd.xlane.f32.xlu0 %v6468_v56  ;;  %v2595_v20 = vpop.xlane.xlu0 %2594 }
 0x593   : > { %v6472_v16 = vpop.eup %4916  ;;  %v2688_v52 = vmul.f32 1.442695, %v2649_v34  ;;  %4926 = vpow2.f32 %v2686_v12  ;;  %v2650_v54 = vsub.f32 %v6365_v37, %v2595_v20 }
 0x594   : > { %2740 = vadd.xlane.f32.xlu1 %v6472_v16  ;;  %v2597_v33 = vpop.xlane.xlu1 %2596 }
 0x595   : > { %v6476_v53 = vpop.eup %4918  ;;  %4928 = vpow2.f32 %v2688_v52  ;;  %v2651_v15 = vsub.f32 %v6370_v63, %v2597_v33  ;;  %v2690_v51 = vmul.f32 1.442695, %v2650_v54 }
 0x596   : > { %2742 = vadd.xlane.f32.xlu0 %v6476_v53  ;;  %v2599_v30 = vpop.xlane.xlu0 %2598 }
 0x597   : > { %v6480_v27 = vpop.eup %4920  ;;  %v2652_v34 = vsub.f32 %v6363_v14, %v2599_v30  ;;  %v2692_v37 = vmul.f32 1.442695, %v2651_v15  ;;  %4930 = vpow2.f32 %v2690_v51 }
 0x598   : > { %2744 = vadd.xlane.f32.xlu1 %v6480_v27  ;;  %v2601_v18 = vpop.xlane.xlu1 %2600 }
 0x599   : > { %v6488_v31 = vpop.eup %4922  ;;  %v2653_v20 = vsub.f32 %v6368_v39, %v2601_v18  ;;  %v2694_v63 = vmul.f32 1.442695, %v2652_v34  ;;  %4932 = vpow2.f32 %v2692_v37 }
 0x59a   : > { %2626 = vmax.xlane.f32.xlu0 %v6449_v21  ;;  %v2603_v41 = vpop.xlane.xlu0 %2602 }
 0x59b   : > { %v6492_v23 = vpop.eup %4924  ;;  %v2654_v33 = vsub.f32 %v6377_v47, %v2603_v41  ;;  %v2696_v14 = vmul.f32 1.442695, %v2653_v20  ;;  %4934 = vpow2.f32 %v2694_v63 }
 0x59c   : > { %2628 = vmax.xlane.f32.xlu1 %v6454_v49  ;;  %v2605_v12 = vpop.xlane.xlu1 %2604 }
 0x59d   : > { %v6496_v52 = vpop.eup %4926  ;;  %v2655_v30 = vsub.f32 %v6382_v0, %v2605_v12  ;;  %v2698_v39 = vmul.f32 1.442695, %v2654_v33  ;;  %4936 = vpow2.f32 %v2696_v14 }
 0x59e   : > { %2630 = vmax.xlane.f32.xlu0 %v6447_v46  ;;  %v2607_v35 = vpop.xlane.xlu0 %2606 }
 0x59f   : > { %v6500_v17 = vpop.eup %4928  ;;  %v2656_v18 = vsub.f32 %v6375_v22, %v2607_v35  ;;  %v2700_v15 = vmul.f32 1.442695, %v2655_v30  ;;  %4938 = vpow2.f32 %v2698_v39 }
 0x5a0   : > { %2632 = vmax.xlane.f32.xlu1 %v6452_v5  ;;  %v2609_v54 = vpop.xlane.xlu1 %2608 }
 0x5a1   : > { %v2657_v47 = vsub.f32 %v6380_v7, %v2609_v54  ;;  %v2702_v41 = vmul.f32 1.442695, %v2656_v18  ;;  %v6511_v0 = vpop.eup %4930  ;;  %4940 = vpow2.f32 %v2700_v15 }
 0x5a2   : > { %2746 = vadd.xlane.f32.xlu0 %v6488_v31 }
 0x5a3   : > { %v2704_v51 = vmul.f32 1.442695, %v2657_v47  ;;  %v6514_v34 = vpop.eup %4932  ;;  %4942 = vpow2.f32 %v2702_v41 }
 0x5a4   : > { %2748 = vadd.xlane.f32.xlu1 %v6492_v23 }
 0x5a5   : > { %v6517_v22 = vpop.eup %4934  ;;  %4944 = vpow2.f32 %v2704_v51 }
 0x5a6   : > { %2750 = vadd.xlane.f32.xlu0 %v6496_v52 }
 0x5a7   : > { %v6520_v7 = vpop.eup %4936 }
 0x5a8   : > { %2752 = vadd.xlane.f32.xlu1 %v6500_v17 }
 0x5a9   : > { %v6523_v35 = vpop.eup %4938 }
 0x5aa   : > { %2634 = vmax.xlane.f32.xlu0 %v6461_v44 }
 0x5ab   : > { %v6526_v12 = vpop.eup %4940 }
 0x5ac   : > { %2636 = vmax.xlane.f32.xlu1 %v6465_v3 }
 0x5ad   : > { %v6529_v37 = vpop.eup %4942 }
 0x5ae   : > { %2638 = vmax.xlane.f32.xlu0 %v6459_v55 }
 0x5af   : > { %v6532_v20 = vpop.eup %4944 }
 0x5b0   : > { %2640 = vmax.xlane.f32.xlu1 %v6463_v1 }
 0x5b2   : > { %2754 = vadd.xlane.f32.xlu0 %v6511_v0 }
 0x5b4   : > { %2756 = vadd.xlane.f32.xlu1 %v6514_v34 }
 0x5b6   : > { %2758 = vadd.xlane.f32.xlu0 %v6517_v22 }
 0x5b8   : > { %2760 = vadd.xlane.f32.xlu1 %v6520_v7 }
 0x5ba   : > { %2762 = vadd.xlane.f32.xlu0 %v6523_v35 }
 0x5bc   : > { %2764 = vadd.xlane.f32.xlu1 %v6526_v12 }
 0x5be   : > { %2766 = vadd.xlane.f32.xlu0 %v6529_v37 }
 0x5c0   : > { %2768 = vadd.xlane.f32.xlu1 %v6532_v20 }
 0x5ff   : > { %v2611_v63 = vpop.xlane.xlu0 %2610 }
 0x600   : > { %v2658_v33 = vsub.f32 %v6425_v32, %v2611_v63 }
 0x601   : > { %v2613_v14 = vpop.xlane.xlu1 %2612 }
 0x602   : > { %v2706_v30 = vmul.f32 1.442695, %v2658_v33  ;;  %v2659_v54 = vsub.f32 %v6430_v9, %v2613_v14 }
 0x603   : > { %v2615_v39 = vpop.xlane.xlu0 %2614 }
 0x604   : > { %4946 = vpow2.f32 %v2706_v30  ;;  %v2708_v18 = vmul.f32 1.442695, %v2659_v54  ;;  %v2660_v15 = vsub.f32 %v6423_v57, %v2615_v39 }
 0x605   : > { %v2617_v47 = vpop.xlane.xlu1 %2616 }
 0x606   : > { %4948 = vpow2.f32 %v2708_v18  ;;  %v2710_v41 = vmul.f32 1.442695, %v2660_v15  ;;  %v2661_v51 = vsub.f32 %v6428_v19, %v2617_v47 }
 0x607   : > { %v2623_v43 = vpop.xlane.xlu0 %2622 }
 0x608   : > { %4950 = vpow2.f32 %v2710_v41  ;;  %v2712_v36 = vmul.f32 1.442695, %v2661_v51  ;;  %v2664_v63 = vsub.f32 %v6435_v58, %v2623_v43 }
 0x609   : > { %v2625_v48 = vpop.xlane.xlu1 %2624 }
 0x60a   : > { %4952 = vpow2.f32 %v2712_v36  ;;  %v2665_v57 = vsub.f32 %v6440_v24, %v2625_v48  ;;  %v2718_v39 = vmul.f32 1.442695, %v2664_v63 }
 0x60b   : > { %v2619_v32 = vpop.xlane.xlu0 %2618 }
 0x60c   : > { %v2662_v9 = vsub.f32 %v6437_v50, %v2619_v32  ;;  %v2720_v50 = vmul.f32 1.442695, %v2665_v57 }
 0x60d   : > { %v2621_v33 = vpop.xlane.xlu1 %2620 }
 0x60e   : > { %v6541_v14 = vpop.eup %4946  ;;  %v2714_v30 = vmul.f32 1.442695, %v2662_v9  ;;  %v2663_v54 = vsub.f32 %v6442_v28, %v2621_v33 }
 0x60f   : > { %2770 = vadd.xlane.f32.xlu0 %v6541_v14 }
 0x610   : > { %v6546_v19 = vpop.eup %4948  ;;  %4954 = vpow2.f32 %v2714_v30  ;;  %v2716_v36 = vmul.f32 1.442695, %v2663_v54 }
 0x611   : > { %2772 = vadd.xlane.f32.xlu1 %v6546_v19 }
 0x612   : > { %v6549_v43 = vpop.eup %4950  ;;  %4956 = vpow2.f32 %v2716_v36 }
 0x613   : > { %2774 = vadd.xlane.f32.xlu0 %v6549_v43  ;;  %4958 = vpow2.f32 %v2718_v39 }
 0x614   : > { %v6552_v58 = vpop.eup %4952  ;;  %4960 = vpow2.f32 %v2720_v50 }
 0x615   : > { %2776 = vadd.xlane.f32.xlu1 %v6552_v58 }
 0x61a   : > { %v6555_v48 = vpop.eup %4954 }
 0x61b   : > { %2778 = vadd.xlane.f32.xlu0 %v6555_v48 }
 0x61c   : > { %v6558_v28 = vpop.eup %4956 }
 0x61d   : > { %2780 = vadd.xlane.f32.xlu1 %v6558_v28  ;;  %v6561_v24 = vpop.eup %4958 }
 0x61e   : > { %v6564_v15 = vpop.eup %4960 }
 0x61f   : > { %v2739_v18 = vpop.xlane.xlu0 %2738  ;;  %2782 = vadd.xlane.f32.xlu0 %v6561_v24 }
 0x620   : > { %4962 = vrcp.f32 %v2739_v18 }
 0x621   : > { %v2741_v47 = vpop.xlane.xlu1 %2740  ;;  %2784 = vadd.xlane.f32.xlu1 %v6564_v15 }
 0x622   : > { %4964 = vrcp.f32 %v2741_v47 }
 0x623   : > { %v2743_v41 = vpop.xlane.xlu0 %2742 }
 0x624   : > { %4966 = vrcp.f32 %v2743_v41 }
 0x625   : > { %v2745_v51 = vpop.xlane.xlu1 %2744 }
 0x626   : > { %4968 = vrcp.f32 %v2745_v51 }
 0x627   : > { %v2627_v32 = vpop.xlane.xlu0 %2626 }
 0x628   : > { %v2666_v63 = vsub.f32 %v6449_v21, %v2627_v32 }
 0x629   : > { %v2629_v9 = vpop.xlane.xlu1 %2628 }
 0x62a   : > { %v4963_v33 = vpop.eup %4962  ;;  %v2722_v57 = vmul.f32 1.442695, %v2666_v63  ;;  %v2667_v30 = vsub.f32 %v6454_v49, %v2629_v9 }
 0x62b   : > { %v2631_v54 = vpop.xlane.xlu0 %2630  ;;  %v2834_v47 = vmul.f32 %v4963_v33, %v6468_v56 }
 0x62c   : > { %v4965_v39 = vpop.eup %4964  ;;  %4970 = vpow2.f32 %v2722_v57  ;;  %v2724_v36 = vmul.f32 1.442695, %v2667_v30  ;;  %v2668_v50 = vsub.f32 %v6447_v46, %v2631_v54 }
 0x62d   : > { %v2633_v18 = vpop.xlane.xlu1 %2632  ;;  %v2835_v41 = vmul.f32 %v4965_v39, %v6472_v16 }
 0x62e   : > { %v4967_v51 = vpop.eup %4966  ;;  %4972 = vpow2.f32 %v2724_v36  ;;  %v2726_v4 = vmul.f32 1.442695, %v2668_v50  ;;  %v2669_v21 = vsub.f32 %v6452_v5, %v2633_v18 }
 0x62f   : > { %v2747_v32 = vpop.xlane.xlu0 %2746  ;;  %v2866_v63 = vpack.c.bf16 %v2835_v41, %v2834_v47  ;;  %v2836_v9 = vmul.f32 %v4967_v51, %v6476_v53 }
 0x630   : > { %v4969_v61 = vpop.eup %4968  ;;  %4974 = vpow2.f32 %v2726_v4  ;;  %v2728_v49 = vmul.f32 1.442695, %v2669_v21 }
 0x631   : > { %v2837_v57 = vmul.f32 %v4969_v61, %v6480_v27  ;;  %4976 = vrcp.f32 %v2747_v32  ;;  %4390 = vmatprep.mubr.bf16.mxu1 %v2866_v63  ;;  %v2749_v46 = vpop.xlane.xlu1 %2748 }
 0x632   : > { %4978 = vpow2.f32 %v2728_v49 }
 0x633   : > { %4980 = vrcp.f32 %v2749_v46  ;;  %v2751_v56 = vpop.xlane.xlu0 %2750  ;;  %v2867_v16 = vpack.c.bf16 %v2837_v57, %v2836_v9 }
 0x634   : > { %4982 = vrcp.f32 %v2751_v56 }
 0x635   : > { %4391 = vmatmul.mubr.bf16.vlgmr.msra.gmra.mrb[128].mxu1 %v2867_v16  ;;  %v2753_v33 = vpop.xlane.xlu1 %2752 }
 0x636   : > { %v6575_v5 = vpop.eup %4970  ;;  %4984 = vrcp.f32 %v2753_v33 }
 0x637   : > { %2786 = vadd.xlane.f32.xlu0 %v6575_v5  ;;  %v2635_v4 = vpop.xlane.xlu0 %2634 }
 0x638   : > { %v6578_v30 = vpop.eup %4972  ;;  %v2670_v61 = vsub.f32 %v6461_v44, %v2635_v4 }
 0x639   : > { %2788 = vadd.xlane.f32.xlu1 %v6578_v30  ;;  %v2637_v53 = vpop.xlane.xlu1 %2636 }
 0x63a   : > { %v6582_v27 = vpop.eup %4974  ;;  %v2730_v54 = vmul.f32 1.442695, %v2670_v61  ;;  %v2671_v39 = vsub.f32 %v6465_v3, %v2637_v53 }
 0x63b   : > { %v4977_v36 = vpop.eup %4976  ;;  %2790 = vadd.xlane.f32.xlu0 %v6582_v27  ;;  %v2639_v50 = vpop.xlane.xlu0 %2638 }
 0x63c   : > { %v6586_v18 = vpop.eup %4978  ;;  %4986 = vpow2.f32 %v2730_v54  ;;  %v2732_v47 = vmul.f32 1.442695, %v2671_v39  ;;  %v2672_v41 = vsub.f32 %v6459_v55, %v2639_v50  ;;  %v2838_v21 = vmul.f32 %v4977_v36, %v6488_v31  ;;  %v6604_v36 = vld [vmem:[#allocation7 + $0x4] ss:$8 sps:$4 sm:$0xff]  }
 0x63d   : > { %v4981_v51 = vpop.eup %4980  ;;  %2792 = vadd.xlane.f32.xlu1 %v6586_v18  ;;  %v2641_v44 = vpop.xlane.xlu1 %2640  ;;  %3462 = vmatprep.subr.bf16.mxu0 %v6604_v36 }
 0x63e   : > { %v4983_v32 = vpop.eup %4982  ;;  %4988 = vpow2.f32 %v2732_v47  ;;  %v2734_v63 = vmul.f32 1.442695, %v2672_v41  ;;  %v2673_v3 = vsub.f32 %v6463_v1, %v2641_v44  ;;  %v2839_v49 = vmul.f32 %v4981_v51, %v6492_v23 }
 0x63f   : > { %v2755_v9 = vpop.xlane.xlu0 %2754  ;;  %v2840_v16 = vmul.f32 %v4983_v32, %v6496_v52 }
 0x640   : > { %v4985_v57 = vpop.eup %4984  ;;  %4990 = vpow2.f32 %v2734_v63  ;;  %v2736_v46 = vmul.f32 1.442695, %v2673_v3  ;;  %v2868_v56 = vpack.c.bf16 %v2839_v49, %v2838_v21 }
 0x641   : > { %4992 = vrcp.f32 %v2755_v9  ;;  %v2757_v55 = vpop.xlane.xlu1 %2756  ;;  %v2841_v33 = vmul.f32 %v4985_v57, %v6500_v17 }
 0x642   : > { %4994 = vpow2.f32 %v2736_v46  ;;  %4394 = vmatprep.mubr.bf16.mxu1 %v2868_v56 }
 0x643   : > { %4996 = vrcp.f32 %v2757_v55  ;;  %v2759_v31 = vpop.xlane.xlu0 %2758  ;;  %v2869_v4 = vpack.c.bf16 %v2841_v33, %v2840_v16 }
 0x644   : > { %4998 = vrcp.f32 %v2759_v31 }
 0x645   : > { %4395 = vmatmul.mubr.bf16.gmra.mrb[132].mxu1 %v2869_v4  ;;  %v2761_v1 = vpop.xlane.xlu1 %2760  ;;  %v4761_v4 = vld [vmem:[#allocation7 + $0x84] ss:$8 sps:$4 sm:$0xff]  }
 0x646   : > { %v6595_v23 = vpop.eup %4986  ;;  %5000 = vrcp.f32 %v2761_v1  ;;  %3189 = vmatprep.subr.bf16.mxu1 %v4761_v4  ;;  %v4767_v1 = vld [vmem:[#allocation7 + $0x94] ss:$8 sps:$4 sm:$0xff]  }
 0x647   : > { %2794 = vadd.xlane.f32.xlu0 %v6595_v23  ;;  %v2763_v61 = vpop.xlane.xlu0 %2762 }
 0x648   : > { %v6598_v53 = vpop.eup %4988  ;;  %5002 = vrcp.f32 %v2763_v61  ;;  %v5209_v61 = vmov 0  }
 0x649   : > { %2796 = vadd.xlane.f32.xlu1 %v6598_v53  ;;  %v2765_v17 = vpop.xlane.xlu1 %2764 }
 0x64a   : > { %v6601_v52 = vpop.eup %4990  ;;  %5004 = vrcp.f32 %v2765_v17  ;;  %v4770_v17 = vld [vmem:[#allocation7 + $0xa4] ss:$8 sps:$4 sm:$0xff]  }
 0x64b   : > { %v4993_v54 = vpop.eup %4992  ;;  %2798 = vadd.xlane.f32.xlu0 %v6601_v52  ;;  %v2767_v39 = vpop.xlane.xlu0 %2766 }
 0x64c   : > { %v6606_v50 = vpop.eup %4994  ;;  %5006 = vrcp.f32 %v2767_v39  ;;  %v2842_v44 = vmul.f32 %v4993_v54, %v6511_v0  ;;  %v4773_v54 = vld [vmem:[#allocation7 + $0xb4] ss:$8 sps:$4 sm:$0xff]   ;;  %v4776_v39 = vld [vmem:[#allocation7 + $0xc4] ss:$8 sps:$4 sm:$0xff]  }
 0x64d   : > { %v4997_v47 = vpop.eup %4996  ;;  %2800 = vadd.xlane.f32.xlu1 %v6606_v50  ;;  %v2769_v41 = vpop.xlane.xlu1 %2768 }
 0x64e   : > { %v4999_v51 = vpop.eup %4998  ;;  %5008 = vrcp.f32 %v2769_v41  ;;  %v2843_v21 = vmul.f32 %v4997_v47, %v6514_v34  ;;  %v4779_v47 = vld [vmem:[#allocation7 + $0xd4] ss:$8 sps:$4 sm:$0xff]   ;;  %v4777_v41 = vld [vmem:[#allocation7 + $0xd0] ss:$8 sps:$4 sm:$0xff]  }
 0x64f   : > { %v2844_v3 = vmul.f32 %v4999_v51, %v6517_v22  ;;  %v4780_v51 = vld [vmem:[#allocation7 + $0xe0] ss:$8 sps:$4 sm:$0xff]  }
 0x650   : > { %v5001_v32 = vpop.eup %5000  ;;  %v2870_v63 = vpack.c.bf16 %v2843_v21, %v2842_v44  ;;  %v4782_v44 = vld [vmem:[#allocation7 + $0xe4] ss:$8 sps:$4 sm:$0xff]   ;;  %v4785_v21 = vld [vmem:[#allocation7 + $0xf4] ss:$8 sps:$4 sm:$0xff]  }
 0x651   : > { %v2845_v49 = vmul.f32 %v5001_v32, %v6520_v7  ;;  %v4759_v7 = vld [vmem:[#allocation7 + $0x80] ss:$8 sps:$4 sm:$0xff]   ;;  %v4783_v32 = vld [vmem:[#allocation7 + $0xf0] ss:$8 sps:$4 sm:$0xff]  }
 0x652   : > { %v5003_v9 = vpop.eup %5002  ;;  %4398 = vmatprep.mubr.bf16.mxu1 %v2870_v63  ;;  %3190 = vmatpush1.bf16.msra.mxu1 %v4759_v7 }
 0x653   : > { %v2871_v57 = vpack.c.bf16 %v2845_v49, %v2844_v3  ;;  %v2846_v56 = vmul.f32 %v5003_v9, %v6523_v35  ;;  %v4765_v35 = vld [vmem:[#allocation7 + $0x90] ss:$8 sps:$4 sm:$0xff]   ;;  %3191 = vmatprep.subr.bf16.mxu1 %v4767_v1  ;;  %v6624_v1 = vld [vmem:[#allocation7] ss:$8 sps:$4 sm:$0xff]  }
 0x654   : > { %v5005_v46 = vpop.eup %5004 }
 0x655   : > { %4399 = vmatmul.mubr.bf16.gmra.mrb[136].mxu1 %v2871_v57  ;;  %v2847_v55 = vmul.f32 %v5005_v46, %v6526_v12  ;;  %v4768_v12 = vld [vmem:[#allocation7 + $0xa0] ss:$8 sps:$4 sm:$0xff]  }
 0x656   : > { %v5007_v16 = vpop.eup %5006  ;;  %3192 = vmatpush1.bf16.msra.mxu1 %v4765_v35 }
 0x657   : > { %v2872_v33 = vpack.c.bf16 %v2847_v55, %v2846_v56  ;;  %v2848_v34 = vmul.f32 %v5007_v16, %v6529_v37  ;;  %3193 = vmatprep.subr.bf16.mxu1 %v4770_v17  ;;  %v4771_v37 = vld [vmem:[#allocation7 + $0xb0] ss:$8 sps:$4 sm:$0xff]   ;;  %v6632_v17 = vld [vmem:[#allocation7 + $0x24] ss:$8 sps:$4 sm:$0xff]  }
 0x658   : > { %v5009_v0 = vpop.eup %5008 }
 0x659   : > { %4402 = vmatprep.mubr.bf16.mxu1 %v2872_v33  ;;  %v2849_v31 = vmul.f32 %v5009_v0, %v6532_v20  ;;  %v4774_v20 = vld [vmem:[#allocation7 + $0xc0] ss:$8 sps:$4 sm:$0xff]  }
 0x65a   : > { %3194 = vmatpush1.bf16.msra.mxu1 %v4768_v12  ;;  %v6626_v12 = vld [vmem:[#allocation7 + $0x14] ss:$8 sps:$4 sm:$0xff]  }
 0x65b   : > { %v2873_v22 = vpack.c.bf16 %v2849_v31, %v2848_v34  ;;  %3195 = vmatprep.subr.bf16.mxu1 %v4773_v54 }
 0x65d   : > { %4403 = vmatmul.mubr.bf16.gmra.mrb[140].mxu1 %v2873_v22 }
 0x65e   : > { %3221 = vmatprep.mubr.bf16.mxu1 %v5209_v61  ;;  %3196 = vmatpush1.bf16.msra.mxu1 %v4771_v37 }
 0x65f   : > { %3197 = vmatprep.subr.bf16.mxu1 %v4776_v39 }
 0x662   : > { %3198 = vmatpush1.bf16.msra.mxu1 %v4774_v20  ;;  %v6637_v20 = vld [vmem:[#allocation7 + $0x20] ss:$8 sps:$4 sm:$0xff]  }
 0x663   : > { %3199 = vmatprep.subr.bf16.mxu1 %v4779_v47  ;;  %v6640_v47 = vld [vmem:[#allocation7 + $0x34] ss:$8 sps:$4 sm:$0xff]  }
 0x666   : > { %3200 = vmatpush1.bf16.msra.mxu1 %v4777_v41 }
 0x667   : > { %3201 = vmatprep.subr.bf16.mxu1 %v4782_v44 }
 0x66a   : > { %3202 = vmatpush1.bf16.msra.mxu1 %v4780_v51 }
 0x66b   : > { %3203 = vmatprep.subr.bf16.mxu1 %v4785_v21  ;;  %v6648_v21 = vld [vmem:[#allocation7 + $0x44] ss:$8 sps:$4 sm:$0xff]  }
 0x66e   : > { %3204 = vmatpush1.bf16.msra.mxu1 %v4783_v32  ;;  %v6651_v32 = vld [vmem:[#allocation7 + $0x40] ss:$8 sps:$4 sm:$0xff]  }
 0x66f   : > { %4438 = vmatprep.subr.bf16.mxu1 %v6604_v36 }
 0x69c   : > { %v2771_v63 = vpop.xlane.xlu0 %2770 }
 0x69d   : > { %5010 = vrcp.f32 %v2771_v63  ;;  %v6654_v63 = vld [vmem:[#allocation7 + $0x54] ss:$8 sps:$4 sm:$0xff]  }
 0x69e   : > { %v2773_v3 = vpop.xlane.xlu1 %2772 }
 0x69f   : > { %5012 = vrcp.f32 %v2773_v3  ;;  %v6660_v3 = vld [vmem:[#allocation7 + $0x64] ss:$8 sps:$4 sm:$0xff]  }
 0x6a0   : > { %v2775_v49 = vpop.xlane.xlu0 %2774 }
 0x6a1   : > { %5014 = vrcp.f32 %v2775_v49 }
 0x6a2   : > { %v2777_v9 = vpop.xlane.xlu1 %2776 }
 0x6a3   : > { %5016 = vrcp.f32 %v2777_v9 }
 0x6a7   : > { %v5011_v57 = vpop.eup %5010 }
 0x6a8   : > { %v2779_v46 = vpop.xlane.xlu0 %2778  ;;  %v2850_v16 = vmul.f32 %v5011_v57, %v6541_v14  ;;  %v6663_v57 = vld [vmem:[#allocation7 + $0x60] ss:$8 sps:$4 sm:$0xff]  }
 0x6a9   : > { %v5013_v56 = vpop.eup %5012  ;;  %5018 = vrcp.f32 %v2779_v46  ;;  %v6666_v46 = vld [vmem:[#allocation7 + $0x74] ss:$8 sps:$4 sm:$0xff]  }
 0x6aa   : > { %v2781_v55 = vpop.xlane.xlu1 %2780  ;;  %v2851_v33 = vmul.f32 %v5013_v56, %v6546_v19  ;;  %v6629_v19 = vld [vmem:[#allocation7 + $0x10] ss:$8 sps:$4 sm:$0xff]  }
 0x6ab   : > { %v5015_v0 = vpop.eup %5014  ;;  %5020 = vrcp.f32 %v2781_v55  ;;  %v6669_v55 = vld [vmem:[#allocation7 + $0x70] ss:$8 sps:$4 sm:$0xff]  }
 0x6ac   : > { %v2783_v36 = vpop.xlane.xlu0 %2782  ;;  %v2874_v34 = vpack.c.bf16 %v2851_v33, %v2850_v16  ;;  %v2852_v22 = vmul.f32 %v5015_v0, %v6549_v43 }
 0x6ad   : > { %v5017_v31 = vpop.eup %5016  ;;  %5022 = vrcp.f32 %v2783_v36 }
 0x6ae   : > { %v2853_v7 = vmul.f32 %v5017_v31, %v6552_v58  ;;  %4422 = vmatprep.mubr.bf16.mxu0 %v2874_v34  ;;  %v2785_v4 = vpop.xlane.xlu1 %2784 }
 0x6af   : > { %5024 = vrcp.f32 %v2785_v4 }
 0x6b0   : > { %v2875_v35 = vpack.c.bf16 %v2853_v7, %v2852_v22 }
 0x6b2   : > { %4423 = vmatmul.mubr.bf16.vlgmr.msra.gmra.mrb[160].mxu0 %v2875_v35 }
 0x6b3   : > { %v5019_v14 = vpop.eup %5018  ;;  %3463 = vmatpush1.bf16.msra.mxu0 %v6624_v1 }
 0x6b4   : > { %3464 = vmatprep.subr.bf16.mxu0 %v6626_v12  ;;  %v2854_v58 = vmul.f32 %v5019_v14, %v6555_v48  ;;  %v6645_v48 = vld [vmem:[#allocation7 + $0x30] ss:$8 sps:$4 sm:$0xff]  }
 0x6b5   : > { %v5021_v43 = vpop.eup %5020 }
 0x6b6   : > { %v2855_v54 = vmul.f32 %v5021_v43, %v6558_v28 }
 0x6b7   : > { %v5023_v37 = vpop.eup %5022  ;;  %3465 = vmatpush1.bf16.msra.mxu0 %v6629_v19 }
 0x6b8   : > { %v2876_v39 = vpack.c.bf16 %v2855_v54, %v2854_v58  ;;  %3466 = vmatprep.subr.bf16.mxu0 %v6632_v17  ;;  %v2856_v51 = vmul.f32 %v5023_v37, %v6561_v24 }
 0x6b9   : > { %v5025_v41 = vpop.eup %5024 }
 0x6ba   : > { %4426 = vmatprep.mubr.bf16.mxu0 %v2876_v39  ;;  %v2857_v44 = vmul.f32 %v5025_v41, %v6564_v15  ;;  %v6657_v15 = vld [vmem:[#allocation7 + $0x50] ss:$8 sps:$4 sm:$0xff]  }
 0x6bb   : > { %3467 = vmatpush1.bf16.msra.mxu0 %v6637_v20 }
 0x6bc   : > { %v2877_v28 = vpack.c.bf16 %v2857_v44, %v2856_v51  ;;  %3468 = vmatprep.subr.bf16.mxu0 %v6640_v47 }
 0x6be   : > { %4427 = vmatmul.mubr.bf16.gmra.mrb[164].mxu0 %v2877_v28 }
 0x6bf   : > { %3469 = vmatpush1.bf16.msra.mxu0 %v6645_v48 }
 0x6c0   : > { %3470 = vmatprep.subr.bf16.mxu0 %v6648_v21 }
 0x6c3   : > { %3471 = vmatpush1.bf16.msra.mxu0 %v6651_v32 }
 0x6c4   : > { %v2787_v24 = vpop.xlane.xlu0 %2786  ;;  %3472 = vmatprep.subr.bf16.mxu0 %v6654_v63 }
 0x6c5   : > { %5026 = vrcp.f32 %v2787_v24  ;;  %v7312_v24 = vpack.c.bf16 %v6281_v38, %v6274_v40  ;;  %v7315_v40 = vpack.c.bf16 %v6295_v29, %v6291_v2 }
 0x6c6   : > { %v2789_v49 = vpop.xlane.xlu1 %2788 }
 0x6c7   : > { %5028 = vrcp.f32 %v2789_v49  ;;  %3473 = vmatpush1.bf16.msra.mxu0 %v6657_v15 }
 0x6c8   : > { %v2791_v9 = vpop.xlane.xlu0 %2790  ;;  %3474 = vmatprep.subr.bf16.mxu0 %v6660_v3 }
 0x6c9   : > { %5030 = vrcp.f32 %v2791_v9 }
 0x6ca   : > { %v2793_v56 = vpop.xlane.xlu1 %2792 }
 0x6cb   : > { %5032 = vrcp.f32 %v2793_v56  ;;  %3475 = vmatpush1.bf16.msra.mxu0 %v6663_v57 }
 0x6cc   : > { %3476 = vmatprep.subr.bf16.mxu0 %v6666_v46 }
 0x6cf   : > { %v5027_v16 = vpop.eup %5026  ;;  %3477 = vmatpush1.bf16.msra.mxu0 %v6669_v55 }
 0x6d0   : > { %v2858_v0 = vmul.f32 %v5027_v16, %v6575_v5  ;;  %v7327_v16 = vld [vmem:[#allocation15_spill] sm:$0xff] }
 0x6d1   : > { %v5029_v33 = vpop.eup %5028 }
 0x6d2   : > { %v2859_v36 = vmul.f32 %v5029_v33, %v6578_v30 }
 0x6d3   : > { %v5031_v34 = vpop.eup %5030 }
 0x6d4   : > { %v2795_v31 = vpop.xlane.xlu0 %2794  ;;  %v2878_v22 = vpack.c.bf16 %v2859_v36, %v2858_v0  ;;  %v2860_v35 = vmul.f32 %v5031_v34, %v6582_v27  ;;  %v7329_v0 = vld [vmem:[#allocation14_spill] sm:$0xff]  ;;  %v7330_v36 = vld [vmem:[#allocation29_spill] sm:$0xff] }
 0x6d5   : > { %v5033_v7 = vpop.eup %5032  ;;  %5034 = vrcp.f32 %v2795_v31  ;;  %v7331_v34 = vpack.c.bf16 %v7329_v0, %v7330_v36  ;;  %v7332_v31 = vld [vmem:[#allocation32_spill] sm:$0xff] }
 0x6d6   : > { %4430 = vmatprep.mubr.bf16.mxu0 %v2878_v22  ;;  %v2797_v4 = vpop.xlane.xlu1 %2796  ;;  %v2861_v14 = vmul.f32 %v5033_v7, %v6586_v18  ;;  %v7333_v22 = vld [vmem:[#allocation48_spill] sm:$0xff] }
 0x6d7   : > { %5036 = vrcp.f32 %v2797_v4  ;;  %v7334_v7 = vpack.c.bf16 %v7332_v31, %v7333_v22  ;;  %v7335_v4 = vld [vmem:[#allocation49_spill] sm:$0xff] }
 0x6d8   : > { %v2799_v43 = vpop.xlane.xlu0 %2798  ;;  %v2879_v58 = vpack.c.bf16 %v2861_v14, %v2860_v35  ;;  %v7336_v35 = vld [vmem:[#allocation16_spill] sm:$0xff] }
 0x6d9   : > { %5038 = vrcp.f32 %v2799_v43  ;;  %v7337_v14 = vpack.c.bf16 %v7335_v4, %v7336_v35 }
 0x6da   : > { %4431 = vmatmul.mubr.bf16.gmra.mrb[168].mxu0 %v2879_v58  ;;  %v2801_v54 = vpop.xlane.xlu1 %2800 }
 0x6db   : > { %5040 = vrcp.f32 %v2801_v54 }
 0x6df   : > { %v5035_v5 = vpop.eup %5034 }
 0x6e0   : > { %v2862_v37 = vmul.f32 %v5035_v5, %v6595_v23  ;;  %v7313_v23 = vpack.c.bf16 %v6277_v59, %v6271_v10  ;;  %v7316_v59 = vpack.c.bf16 %v6311_v62, %v6305_v11 }
 0x6e1   : > { %v5037_v30 = vpop.eup %5036 }
 0x6e2   : > { %v2863_v39 = vmul.f32 %v5037_v30, %v6598_v53  ;;  %v7314_v53 = vpack.c.bf16 %v6299_v13, %v6293_v60  ;;  %v7317_v13 = vpack.c.bf16 %v6307_v45, %v6303_v42  ;;  %v7318_v42 = vpack.c.bf16 %v6323_v8, %v6317_v6 }
 0x6e3   : > { %v5039_v41 = vpop.eup %5038  ;;  %v7319_v6 = vpack.c.bf16 %v6319_v25, %v6315_v26 }
 0x6e4   : > { %v2880_v51 = vpack.c.bf16 %v2863_v39, %v2862_v37  ;;  %v2864_v27 = vmul.f32 %v5039_v41, %v6601_v52 }
 0x6e5   : > { %v5041_v44 = vpop.eup %5040 }
 0x6e6   : > { %4434 = vmatprep.mubr.bf16.mxu0 %v2880_v51  ;;  %v2865_v18 = vmul.f32 %v5041_v44, %v6606_v50 }
 0x6e8   : > { %v2881_v28 = vpack.c.bf16 %v2865_v18, %v2864_v27 }
 0x6ea   : > { %4435 = vmatmul.mubr.bf16.gmra.mrb[172].mxu0 %v2881_v28 }
 0x6eb   : > { %3494 = vmatprep.mubr.bf16.mxu0 %v5209_v61 }
 0x6f2   : > { %3495 = vmatmul.mubr.bf16.vlgmr.msra.gmra.mrb[176].mxu0 %v7312_v24 }
 0x6f3   : > { %3504 = vmatprep.mubr.bf16.mxu0 %v5209_v61 }
 0x6fa   : > { %3505 = vmatmul.mubr.bf16.gmra.mrb[180].mxu0 %v7313_v23 }
 0x6fb   : > { %3514 = vmatprep.mubr.bf16.mxu0 %v5209_v61 }
 0x702   : > { %3515 = vmatmul.mubr.bf16.gmra.mrb[184].mxu0 %v7314_v53 }
 0x703   : > { %3524 = vmatprep.mubr.bf16.mxu0 %v5209_v61 }
 0x708   : > { %v4392_v52 = vpop.f32.mrb[128].mxu1 }
 0x709   : > { %v2916_v50 = vpop.f32.mrb[129].mxu1 }
 0x70a   : > { %v4393_v49 = vpop.f32.mrb[130].mxu1  ;;  %3525 = vmatmul.mubr.bf16.gmra.mrb[188].mxu0 %v7315_v40 }
 0x70b   : > { %v3077_v38 = vpack.c.bf16 %v4393_v49, %v4392_v52  ;;  %v2919_v9 = vpop.f32.mrb[131].mxu1  ;;  %3534 = vmatprep.mubr.bf16.mxu0 %v5209_v61 }
 0x70c   : > { %v3076_v10 = vpack.c.bf16 %v2919_v9, %v2916_v50 }
 0x70e   : > { %3222 = vmatmul.mubr.bf16.vlgmr.msra.gmra.mrb[144].mxu1 %v3076_v10 }
 0x70f   : > { %3231 = vmatprep.mubr.bf16.mxu1 %v5209_v61  ;;  %4446 = vmatpush1.bf16.msra.mxu1 %v6624_v1 }
 0x710   : > { %4439 = vmatprep.subr.bf16.mxu1 %v6626_v12 }
 0x712   : > { %3535 = vmatmul.mubr.bf16.gmra.mrb[192].mxu0 %v7316_v59 }
 0x713   : > { %3544 = vmatprep.mubr.bf16.mxu0 %v5209_v61  ;;  %4447 = vmatpush1.bf16.msra.mxu1 %v6629_v19 }
 0x714   : > { %4440 = vmatprep.subr.bf16.mxu1 %v6632_v17 }
 0x716   : > { %3232 = vmatmul.mubr.bf16.gmra.mrb[148].mxu1 %v3077_v38 }
 0x717   : > { %3241 = vmatprep.mubr.bf16.mxu1 %v5209_v61  ;;  %4448 = vmatpush1.bf16.msra.mxu1 %v6637_v20 }
 0x718   : > { %v4396_v2 = vpop.f32.mrb[132].mxu1  ;;  %4441 = vmatprep.subr.bf16.mxu1 %v6640_v47 }
 0x719   : > { %v2932_v60 = vpop.f32.mrb[133].mxu1 }
 0x71a   : > { %v4397_v29 = vpop.f32.mrb[134].mxu1  ;;  %3545 = vmatmul.mubr.bf16.gmra.mrb[196].mxu0 %v7317_v13 }
 0x71b   : > { %v3079_v11 = vpack.c.bf16 %v4397_v29, %v4396_v2  ;;  %v2935_v62 = vpop.f32.mrb[135].mxu1  ;;  %3554 = vmatprep.mubr.bf16.mxu0 %v5209_v61  ;;  %4449 = vmatpush1.bf16.msra.mxu1 %v6645_v48 }
 0x71c   : > { %v3078_v1 = vpack.c.bf16 %v2935_v62, %v2932_v60  ;;  %4442 = vmatprep.subr.bf16.mxu1 %v6648_v21 }
 0x71e   : > { %3242 = vmatmul.mubr.bf16.gmra.mrb[152].mxu1 %v3078_v1 }
 0x71f   : > { %3251 = vmatprep.mubr.bf16.mxu1 %v5209_v61  ;;  %4450 = vmatpush1.bf16.msra.mxu1 %v6651_v32  ;;  %v7320_v32 = vld [vmem:[#allocation47_spill] sm:$0xff] }
 0x720   : > { %4443 = vmatprep.subr.bf16.mxu1 %v6654_v63  ;;  %v7321_v63 = vld [vmem:[#allocation12_spill] sm:$0xff] }
 0x722   : > { %3555 = vmatmul.mubr.bf16.gmra.mrb[200].mxu0 %v7318_v42 }
 0x723   : > { %3564 = vmatprep.mubr.bf16.mxu0 %v5209_v61  ;;  %4451 = vmatpush1.bf16.msra.mxu1 %v6657_v15  ;;  %v7322_v15 = vpack.c.bf16 %v7320_v32, %v7321_v63  ;;  %v7342_v32 = vld [vmem:[#allocation19_spill] sm:$0xff] }
 0x724   : > { %4444 = vmatprep.subr.bf16.mxu1 %v6660_v3 }
 0x726   : > { %3252 = vmatmul.mubr.bf16.gmra.mrb[156].mxu1 %v3079_v11 }
 0x727   : > { %3261 = vmatprep.mubr.bf16.mxu1 %v5209_v61  ;;  %4452 = vmatpush1.bf16.msra.mxu1 %v6663_v57  ;;  %v7323_v57 = vld [vmem:[#allocation46_spill] sm:$0xff] }
 0x728   : > { %v4400_v45 = vpop.f32.mrb[136].mxu1  ;;  %4445 = vmatprep.subr.bf16.mxu1 %v6666_v46  ;;  %v7324_v46 = vld [vmem:[#allocation13_spill] sm:$0xff] }
 0x729   : > { %v2948_v12 = vpop.f32.mrb[137].mxu1  ;;  %v7325_v56 = vpack.c.bf16 %v7323_v57, %v7324_v46 }
 0x72a   : > { %v4401_v19 = vpop.f32.mrb[138].mxu1  ;;  %3565 = vmatmul.mubr.bf16.gmra.mrb[204].mxu0 %v7319_v6  ;;  %v3657_v6 = vlaneseq }
 0x72b   : > { %v3081_v8 = vpack.c.bf16 %v4401_v19, %v4400_v45  ;;  %v2951_v17 = vpop.f32.mrb[139].mxu1  ;;  %3574 = vmatprep.mubr.bf16.mxu0 %v5209_v61  ;;  %4453 = vmatpush1.bf16.msra.mxu1 %v6669_v55  ;;  %v7326_v55 = vld [vmem:[#allocation17_spill] sm:$0xff]  ;;  %v7338_v45 = vld [vmem:[#allocation20_spill] sm:$0xff] }
 0x72c   : > { %v3080_v20 = vpack.c.bf16 %v2951_v17, %v2948_v12  ;;  %v7328_v33 = vpack.c.bf16 %v7326_v55, %v7327_v16  ;;  %v7339_v12 = vld [vmem:[#allocation18_spill] sm:$0xff] }
 0x72d   : > { %v7340_v19 = vpack.c.bf16 %v7338_v45, %v7339_v12 }
 0x72e   : > { %3262 = vmatmul.mubr.bf16.gmra.mrb[160].mxu1 %v3080_v20 }
 0x72f   : > { %3271 = vmatprep.mubr.bf16.mxu1 %v5209_v61 }
 0x730   : > { %v4404_v47 = vpop.f32.mrb[140].mxu1 }
 0x731   : > { %v2964_v48 = vpop.f32.mrb[141].mxu1 }
 0x732   : > { %v4405_v21 = vpop.f32.mrb[142].mxu1  ;;  %3575 = vmatmul.mubr.bf16.gmra.mrb[208].mxu0 %v7322_v15 }
 0x733   : > { %v3083_v3 = vpack.c.bf16 %v4405_v21, %v4404_v47  ;;  %v2967_v26 = vpop.f32.mrb[143].mxu1  ;;  %3584 = vmatprep.mubr.bf16.mxu0 %v5209_v61  ;;  %v7341_v21 = vld [vmem:[#allocation21_spill] sm:$0xff] }
 0x734   : > { %v3082_v25 = vpack.c.bf16 %v2967_v26, %v2964_v48  ;;  %v3658_v48 = vshrl.u32 %v3657_v6, 7  ;;  %v7343_v63 = vpack.c.bf16 %v7341_v21, %v7342_v32  ;;  %v3655_v26 = vld [vmem:[%s7100_s3] sm:$0x3] }
 0x736   : > { %3272 = vmatmul.mubr.bf16.gmra.mrb[164].mxu1 %v3081_v8  ;;  %v3659_v15 = vsub.s32 0, %v3658_v48 }
 0x737   : > { %3281 = vmatprep.mubr.bf16.mxu1 %v5209_v61 }
 0x73a   : > { %3585 = vmatmul.mubr.bf16.gmra.mrb[212].mxu0 %v7325_v56  ;;  %v6786_v56 = vrot.slane %v3655_v26, %v3659_v15 }
 0x73b   : > { %3594 = vmatprep.mubr.bf16.mxu0 %v5209_v61 }
 0x73e   : > { %3282 = vmatmul.mubr.bf16.gmra.mrb[168].mxu1 %v3082_v25  ;;  %v3663_v25 = vsub.s32 1, %v3658_v48 }
 0x73f   : > { %3291 = vmatprep.mubr.bf16.mxu1 %v5209_v61 }
 0x740   : > { %v6788_v16 = vrot.slane %v3655_v26, %v3663_v25 }
 0x742   : > { %3595 = vmatmul.mubr.bf16.gmra.mrb[216].mxu0 %v7328_v33 }
 0x743   : > { %3604 = vmatprep.mubr.bf16.mxu0 %v5209_v61 }
 0x746   : > { %3292 = vmatmul.mubr.bf16.gmra.mrb[172].mxu1 %v3083_v3 }
 0x747   : > { %3301 = vmatprep.mubr.bf16.mxu1 %v5209_v61 }
 0x74a   : > { %3605 = vmatmul.mubr.bf16.gmra.mrb[220].mxu0 %v7331_v34 }
 0x74b   : > { %3614 = vmatprep.mubr.bf16.mxu0 %v5209_v61 }
 0x752   : > { %3615 = vmatmul.mubr.bf16.gmra.mrb[224].mxu0 %v7334_v7 }
 0x753   : > { %3624 = vmatprep.mubr.bf16.mxu0 %v5209_v61 }
 0x75a   : > { %3625 = vmatmul.mubr.bf16.gmra.mrb[228].mxu0 %v7337_v14 }
 0x785   : > { %v4424_v43 = vpop.f32.mrb[160].mxu0 }
 0x786   : > { %v3013_v58 = vpop.f32.mrb[161].mxu0 }
 0x787   : > { %v4425_v54 = vpop.f32.mrb[162].mxu0 }
 0x788   : > { %v3085_v5 = vpack.c.bf16 %v4425_v54, %v4424_v43  ;;  %v3016_v30 = vpop.f32.mrb[163].mxu0 }
 0x789   : > { %v3084_v37 = vpack.c.bf16 %v3016_v30, %v3013_v58 }
 0x78b   : > { %3302 = vmatmul.mubr.bf16.gmra.mrb[176].mxu1 %v3084_v37 }
 0x78c   : > { %3311 = vmatprep.mubr.bf16.mxu1 %v5209_v61 }
 0x791   : > { %v4428_v39 = vpop.f32.mrb[164].mxu0 }
 0x792   : > { %v3029_v41 = vpop.f32.mrb[165].mxu0 }
 0x793   : > { %v4429_v51 = vpop.f32.mrb[166].mxu0  ;;  %3312 = vmatmul.mubr.bf16.gmra.mrb[180].mxu1 %v3085_v5 }
 0x794   : > { %v3087_v44 = vpack.c.bf16 %v4429_v51, %v4428_v39  ;;  %v3032_v27 = vpop.f32.mrb[167].mxu0  ;;  %3321 = vmatprep.mubr.bf16.mxu1 %v5209_v61 }
 0x795   : > { %v3086_v18 = vpack.c.bf16 %v3032_v27, %v3029_v41 }
 0x79b   : > { %3322 = vmatmul.mubr.bf16.gmra.mrb[184].mxu1 %v3086_v18 }
 0x79c   : > { %3331 = vmatprep.mubr.bf16.mxu1 %v5209_v61 }
 0x7a3   : > { %3332 = vmatmul.mubr.bf16.gmra.mrb[188].mxu1 %v3087_v44 }
 0x7a4   : > { %3341 = vmatprep.mubr.bf16.mxu1 %v5209_v61 }
 0x7ad   : > { %v4432_v28 = vpop.f32.mrb[168].mxu0 }
 0x7ae   : > { %v3045_v24 = vpop.f32.mrb[169].mxu0 }
 0x7af   : > { %v4433_v23 = vpop.f32.mrb[170].mxu0 }
 0x7b0   : > { %v3089_v53 = vpack.c.bf16 %v4433_v23, %v4432_v28  ;;  %v3048_v52 = vpop.f32.mrb[171].mxu0 }
 0x7b1   : > { %v3088_v50 = vpack.c.bf16 %v3048_v52, %v3045_v24 }
 0x7b3   : > { %3342 = vmatmul.mubr.bf16.gmra.mrb[192].mxu1 %v3088_v50 }
 0x7b4   : > { %3351 = vmatprep.mubr.bf16.mxu1 %v5209_v61 }
 0x7bb   : > { %3352 = vmatmul.mubr.bf16.gmra.mrb[196].mxu1 %v3089_v53 }
 0x7bc   : > { %3361 = vmatprep.mubr.bf16.mxu1 %v5209_v61 }
 0x7bd   : > { %v4436_v49 = vpop.f32.mrb[172].mxu0 }
 0x7be   : > { %v3061_v40 = vpop.f32.mrb[173].mxu0 }
 0x7bf   : > { %v4437_v38 = vpop.f32.mrb[174].mxu0 }
 0x7c0   : > { %v3091_v9 = vpack.c.bf16 %v4437_v38, %v4436_v49  ;;  %v3064_v10 = vpop.f32.mrb[175].mxu0 }
 0x7c1   : > { %v3090_v59 = vpack.c.bf16 %v3064_v10, %v3061_v40 }
 0x7c3   : > { %3362 = vmatmul.mubr.bf16.gmra.mrb[200].mxu1 %v3090_v59 }
 0x7c4   : > { %3371 = vmatprep.mubr.bf16.mxu1 %v5209_v61 }
 0x7c5   : > { %v3496_v2 = vpop.f32.mrb[176].mxu0 }
 0x7c6   : > { %v3498_v60 = vpop.f32.mrb[177].mxu0 }
 0x7c7   : > { %v3500_v29 = vpop.f32.mrb[178].mxu0 }
 0x7c8   : > { %v3502_v13 = vpop.f32.mrb[179].mxu0 }
 0x7cb   : > { %3372 = vmatmul.mubr.bf16.gmra.mrb[204].mxu1 %v3091_v9 }
 0x7cc   : > { %3634 = vmatprep.mubr.bf16.mxu1 %v5209_v61 }
 0x7cd   : > { %v3506_v11 = vpop.f32.mrb[180].mxu0 }
 0x7ce   : > { %v3508_v62 = vpop.f32.mrb[181].mxu0 }
 0x7cf   : > { %v3510_v1 = vpop.f32.mrb[182].mxu0 }
 0x7d0   : > { %v3512_v42 = vpop.f32.mrb[183].mxu0 }
 0x7d3   : > { %3635 = vmatmul.mubr.bf16.vlgmr.msra.gmra.mrb[200].mxu1 %v7340_v19 }
 0x7d4   : > { %3644 = vmatprep.mubr.bf16.mxu1 %v5209_v61 }
 0x7d5   : > { %v3516_v8 = vpop.f32.mrb[184].mxu0 }
 0x7d6   : > { %v3518_v17 = vpop.f32.mrb[185].mxu0 }
 0x7d7   : > { %v3520_v20 = vpop.f32.mrb[186].mxu0 }
 0x7d8   : > { %v3522_v47 = vpop.f32.mrb[187].mxu0 }
 0x7db   : > { %3645 = vmatmul.mubr.bf16.gmra.mrb[204].mxu1 %v7343_v63 }
 0x7dd   : > { %v6775_v3 = vpop.f32.mrb[188].mxu0 }
 0x7de   : > { %v6780_v57 = vpop.f32.mrb[189].mxu0 }
 0x7df   : > { %v6782_v61 = vpop.f32.mrb[190].mxu0 }
 0x7e0   : > { %v6784_v46 = vpop.f32.mrb[191].mxu0 }
 0x7e1   : > { %v3223_v55 = vpop.f32.mrb[144].mxu1 }
 0x7e2   : > { %v3497_v33 = vadd.f32 %v3496_v2, %v3223_v55  ;;  %v3225_v0 = vpop.f32.mrb[145].mxu1 }
 0x7e3   : > { %v3499_v36 = vadd.f32 %v3498_v60, %v3225_v0  ;;  %v3227_v34 = vpop.f32.mrb[146].mxu1 }
 0x7e4   : > { %v3667_v31 = vadd.f32 %v6786_v56, %v3497_v33  ;;  %v3501_v22 = vadd.f32 %v3500_v29, %v3227_v34  ;;  %v3229_v7 = vpop.f32.mrb[147].mxu1 }
 0x7e5   : > { %v3668_v4 = vadd.f32 %v6788_v16, %v3499_v36  ;;  %v3503_v35 = vadd.f32 %v3502_v13, %v3229_v7  ;;  %v6792_v14 = vpop.f32.mrb[192].mxu0 }
 0x7e6   : > { %3731 = vst [vmem:[%s6796_s30] sm:$0xff] %v3667_v31  ;;  %v3669_v43 = vadd.f32 %v6786_v56, %v3501_v22  ;;  %v6800_v58 = vpop.f32.mrb[193].mxu0 }
 0x7e7   : > { %3732 = vst [vmem:[%s6796_s30 + $0x8] sm:$0xff] %v3668_v4  ;;  %v3670_v54 = vadd.f32 %v6788_v16, %v3503_v35  ;;  %v6804_v5 = vpop.f32.mrb[194].mxu0 }
 0x7e8   : > { %3733 = vst [vmem:[%s6796_s30 + $0x10] sm:$0xff] %v3669_v43  ;;  %v6807_v30 = vpop.f32.mrb[195].mxu0 }
 0x7e9   : > { %3734 = vst [vmem:[%s6796_s30 + $0x18] sm:$0xff] %v3670_v54  ;;  %v3233_v37 = vpop.f32.mrb[148].mxu1 }
 0x7ea   : > { %v3507_v39 = vadd.f32 %v3506_v11, %v3233_v37  ;;  %v3235_v41 = vpop.f32.mrb[149].mxu1 }
 0x7eb   : > { %v3509_v51 = vadd.f32 %v3508_v62, %v3235_v41  ;;  %v3237_v44 = vpop.f32.mrb[150].mxu1 }
 0x7ec   : > { %v3671_v27 = vadd.f32 %v6786_v56, %v3507_v39  ;;  %v3511_v18 = vadd.f32 %v3510_v1, %v3237_v44  ;;  %v3239_v28 = vpop.f32.mrb[151].mxu1 }
 0x7ed   : > { %v3672_v24 = vadd.f32 %v6788_v16, %v3509_v51  ;;  %v3513_v23 = vadd.f32 %v3512_v42, %v3239_v28  ;;  %v6812_v53 = vpop.f32.mrb[196].mxu0 }
 0x7ee   : > { %3735 = vst [vmem:[%s6796_s30 + $0x20] sm:$0xff] %v3671_v27  ;;  %v3673_v52 = vadd.f32 %v6786_v56, %v3511_v18  ;;  %v6816_v50 = vpop.f32.mrb[197].mxu0 }
 0x7ef   : > { %3736 = vst [vmem:[%s6796_s30 + $0x28] sm:$0xff] %v3672_v24  ;;  %v3674_v49 = vadd.f32 %v6788_v16, %v3513_v23  ;;  %v6820_v40 = vpop.f32.mrb[198].mxu0 }
 0x7f0   : > { %3737 = vst [vmem:[%s6796_s30 + $0x30] sm:$0xff] %v3673_v52  ;;  %v6823_v38 = vpop.f32.mrb[199].mxu0 }
 0x7f1   : > { %3738 = vst [vmem:[%s6796_s30 + $0x38] sm:$0xff] %v3674_v49  ;;  %v3243_v9 = vpop.f32.mrb[152].mxu1 }
 0x7f2   : > { %v3517_v10 = vadd.f32 %v3516_v8, %v3243_v9  ;;  %v3245_v59 = vpop.f32.mrb[153].mxu1 }
 0x7f3   : > { %v3519_v2 = vadd.f32 %v3518_v17, %v3245_v59  ;;  %v3247_v60 = vpop.f32.mrb[154].mxu1 }
 0x7f4   : > { %v3675_v29 = vadd.f32 %v6786_v56, %v3517_v10  ;;  %v3521_v13 = vadd.f32 %v3520_v20, %v3247_v60  ;;  %v3249_v11 = vpop.f32.mrb[155].mxu1 }
 0x7f5   : > { %v3676_v62 = vadd.f32 %v6788_v16, %v3519_v2  ;;  %v3523_v1 = vadd.f32 %v3522_v47, %v3249_v11  ;;  %v6828_v42 = vpop.f32.mrb[200].mxu0 }
 0x7f6   : > { %3739 = vst [vmem:[%s6796_s30 + $0x40] sm:$0xff] %v3675_v29  ;;  %v3677_v45 = vadd.f32 %v6786_v56, %v3521_v13  ;;  %v6832_v12 = vpop.f32.mrb[201].mxu0 }
 0x7f7   : > { %3740 = vst [vmem:[%s6796_s30 + $0x48] sm:$0xff] %v3676_v62  ;;  %v3678_v19 = vadd.f32 %v6788_v16, %v3523_v1  ;;  %v6836_v6 = vpop.f32.mrb[202].mxu0 }
 0x7f8   : > { %3741 = vst [vmem:[%s6796_s30 + $0x50] sm:$0xff] %v3677_v45  ;;  %v6839_v8 = vpop.f32.mrb[203].mxu0 }
 0x7f9   : > { %3742 = vst [vmem:[%s6796_s30 + $0x58] sm:$0xff] %v3678_v19  ;;  %v3253_v17 = vpop.f32.mrb[156].mxu1 }
 0x7fa   : > { %v3527_v20 = vadd.f32 %v6775_v3, %v3253_v17  ;;  %v3255_v47 = vpop.f32.mrb[157].mxu1 }
 0x7fb   : > { %v3529_v48 = vadd.f32 %v6780_v57, %v3255_v47  ;;  %v3257_v21 = vpop.f32.mrb[158].mxu1 }
 0x7fc   : > { %v3679_v32 = vadd.f32 %v6786_v56, %v3527_v20  ;;  %v3531_v63 = vadd.f32 %v6782_v61, %v3257_v21  ;;  %v3259_v15 = vpop.f32.mrb[159].mxu1 }
 0x7fd   : > { %v3680_v26 = vadd.f32 %v6788_v16, %v3529_v48  ;;  %v3533_v25 = vadd.f32 %v6784_v46, %v3259_v15  ;;  %v6848_v55 = vpop.f32.mrb[204].mxu0 }
 0x7fe   : > { %3743 = vst [vmem:[%s6796_s30 + $0x60] sm:$0xff] %v3679_v32  ;;  %v3681_v3 = vadd.f32 %v6786_v56, %v3531_v63  ;;  %v6852_v33 = vpop.f32.mrb[205].mxu0 }
 0x7ff   : > { %3744 = vst [vmem:[%s6796_s30 + $0x68] sm:$0xff] %v3680_v26  ;;  %v3682_v57 = vadd.f32 %v6788_v16, %v3533_v25  ;;  %v6856_v0 = vpop.f32.mrb[206].mxu0 }
 0x800   : > { %3745 = vst [vmem:[%s6796_s30 + $0x70] sm:$0xff] %v3681_v3  ;;  %v6859_v61 = vpop.f32.mrb[207].mxu0 }
 0x801   : > { %3746 = vst [vmem:[%s6796_s30 + $0x78] sm:$0xff] %v3682_v57  ;;  %v3263_v36 = vpop.f32.mrb[160].mxu1 }
 0x802   : > { %v3537_v46 = vadd.f32 %v6792_v14, %v3263_v36  ;;  %v3265_v34 = vpop.f32.mrb[161].mxu1 }
 0x803   : > { %v3539_v31 = vadd.f32 %v6800_v58, %v3265_v34  ;;  %v3267_v22 = vpop.f32.mrb[162].mxu1 }
 0x804   : > { %v3683_v7 = vadd.f32 %v6786_v56, %v3537_v46  ;;  %v3541_v4 = vadd.f32 %v6804_v5, %v3267_v22  ;;  %v3269_v35 = vpop.f32.mrb[163].mxu1 }
 0x805   : > { %v3684_v43 = vadd.f32 %v6788_v16, %v3539_v31  ;;  %v3543_v54 = vadd.f32 %v6807_v30, %v3269_v35  ;;  %v6868_v37 = vpop.f32.mrb[208].mxu0 }
 0x806   : > { %3747 = vst [vmem:[%s6796_s30 + $0x80] sm:$0xff] %v3683_v7  ;;  %v3685_v14 = vadd.f32 %v6786_v56, %v3541_v4  ;;  %v6872_v39 = vpop.f32.mrb[209].mxu0 }
 0x807   : > { %3748 = vst [vmem:[%s6796_s30 + $0x88] sm:$0xff] %v3684_v43  ;;  %v3686_v58 = vadd.f32 %v6788_v16, %v3543_v54  ;;  %v6876_v41 = vpop.f32.mrb[210].mxu0 }
 0x808   : > { %3749 = vst [vmem:[%s6796_s30 + $0x90] sm:$0xff] %v3685_v14  ;;  %v6879_v5 = vpop.f32.mrb[211].mxu0 }
 0x809   : > { %3750 = vst [vmem:[%s6796_s30 + $0x98] sm:$0xff] %v3686_v58  ;;  %v3273_v51 = vpop.f32.mrb[164].mxu1 }
 0x80a   : > { %v3547_v30 = vadd.f32 %v6812_v53, %v3273_v51  ;;  %v3275_v44 = vpop.f32.mrb[165].mxu1 }
 0x80b   : > { %v3549_v27 = vadd.f32 %v6816_v50, %v3275_v44  ;;  %v3277_v18 = vpop.f32.mrb[166].mxu1 }
 0x80c   : > { %v3687_v28 = vadd.f32 %v6786_v56, %v3547_v30  ;;  %v3551_v24 = vadd.f32 %v6820_v40, %v3277_v18  ;;  %v3279_v23 = vpop.f32.mrb[167].mxu1 }
 0x80d   : > { %v3688_v52 = vadd.f32 %v6788_v16, %v3549_v27  ;;  %v3553_v49 = vadd.f32 %v6823_v38, %v3279_v23  ;;  %v6888_v9 = vpop.f32.mrb[212].mxu0 }
 0x80e   : > { %3751 = vst [vmem:[%s6796_s30 + $0xa0] sm:$0xff] %v3687_v28  ;;  %v3689_v53 = vadd.f32 %v6786_v56, %v3551_v24  ;;  %v6892_v10 = vpop.f32.mrb[213].mxu0 }
 0x80f   : > { %3752 = vst [vmem:[%s6796_s30 + $0xa8] sm:$0xff] %v3688_v52  ;;  %v3690_v50 = vadd.f32 %v6788_v16, %v3553_v49  ;;  %v6896_v59 = vpop.f32.mrb[214].mxu0 }
 0x810   : > { %3753 = vst [vmem:[%s6796_s30 + $0xb0] sm:$0xff] %v3689_v53  ;;  %v6899_v40 = vpop.f32.mrb[215].mxu0 }
 0x811   : > { %3754 = vst [vmem:[%s6796_s30 + $0xb8] sm:$0xff] %v3690_v50  ;;  %v3283_v2 = vpop.f32.mrb[168].mxu1 }
 0x812   : > { %v3557_v38 = vadd.f32 %v6828_v42, %v3283_v2  ;;  %v3285_v60 = vpop.f32.mrb[169].mxu1 }
 0x813   : > { %v3559_v29 = vadd.f32 %v6832_v12, %v3285_v60  ;;  %v3287_v13 = vpop.f32.mrb[170].mxu1 }
 0x814   : > { %v3691_v11 = vadd.f32 %v6786_v56, %v3557_v38  ;;  %v3561_v62 = vadd.f32 %v6836_v6, %v3287_v13  ;;  %v3289_v1 = vpop.f32.mrb[171].mxu1 }
 0x815   : > { %v3692_v45 = vadd.f32 %v6788_v16, %v3559_v29  ;;  %v3563_v19 = vadd.f32 %v6839_v8, %v3289_v1  ;;  %v6908_v17 = vpop.f32.mrb[216].mxu0 }
 0x816   : > { %3755 = vst [vmem:[%s6796_s30 + $0xc0] sm:$0xff] %v3691_v11  ;;  %v3693_v42 = vadd.f32 %v6786_v56, %v3561_v62  ;;  %v6912_v20 = vpop.f32.mrb[217].mxu0 }
 0x817   : > { %3756 = vst [vmem:[%s6796_s30 + $0xc8] sm:$0xff] %v3692_v45  ;;  %v3694_v12 = vadd.f32 %v6788_v16, %v3563_v19  ;;  %v6916_v47 = vpop.f32.mrb[218].mxu0 }
 0x818   : > { %3757 = vst [vmem:[%s6796_s30 + $0xd0] sm:$0xff] %v3693_v42  ;;  %v6919_v6 = vpop.f32.mrb[219].mxu0 }
 0x819   : > { %3758 = vst [vmem:[%s6796_s30 + $0xd8] sm:$0xff] %v3694_v12  ;;  %v3293_v48 = vpop.f32.mrb[172].mxu1 }
 0x81a   : > { %v3567_v8 = vadd.f32 %v6848_v55, %v3293_v48  ;;  %v3295_v21 = vpop.f32.mrb[173].mxu1 }
 0x81b   : > { %v3569_v32 = vadd.f32 %v6852_v33, %v3295_v21  ;;  %v3297_v63 = vpop.f32.mrb[174].mxu1 }
 0x81c   : > { %v3695_v15 = vadd.f32 %v6786_v56, %v3567_v8  ;;  %v3571_v26 = vadd.f32 %v6856_v0, %v3297_v63  ;;  %v3299_v25 = vpop.f32.mrb[175].mxu1 }
 0x81d   : > { %v3696_v3 = vadd.f32 %v6788_v16, %v3569_v32  ;;  %v3573_v57 = vadd.f32 %v6859_v61, %v3299_v25  ;;  %v6928_v36 = vpop.f32.mrb[220].mxu0 }
 0x81e   : > { %3759 = vst [vmem:[%s6796_s30 + $0xe0] sm:$0xff] %v3695_v15  ;;  %v3697_v55 = vadd.f32 %v6786_v56, %v3571_v26  ;;  %v6932_v46 = vpop.f32.mrb[221].mxu0 }
 0x81f   : > { %3760 = vst [vmem:[%s6796_s30 + $0xe8] sm:$0xff] %v3696_v3  ;;  %v3698_v33 = vadd.f32 %v6788_v16, %v3573_v57  ;;  %v6936_v34 = vpop.f32.mrb[222].mxu0 }
 0x820   : > { %3761 = vst [vmem:[%s6796_s30 + $0xf0] sm:$0xff] %v3697_v55  ;;  %v6939_v31 = vpop.f32.mrb[223].mxu0 }
 0x821   : > { %3762 = vst [vmem:[%s6796_s30 + $0xf8] sm:$0xff] %v3698_v33 }
 0x825   : > { %v6942_v0 = vpop.f32.mrb[224].mxu0 }
 0x826   : > { %v6944_v22 = vpop.f32.mrb[225].mxu0 }
 0x827   : > { %v6946_v61 = vpop.f32.mrb[226].mxu0 }
 0x828   : > { %v6948_v7 = vpop.f32.mrb[227].mxu0 }
 0x82d   : > { %v6950_v4 = vpop.f32.mrb[228].mxu0 }
 0x82e   : > { %v6952_v35 = vpop.f32.mrb[229].mxu0 }
 0x82f   : > { %v6954_v43 = vpop.f32.mrb[230].mxu0 }
 0x830   : > { %v6956_v54 = vpop.f32.mrb[231].mxu0 }
 0x85e   : > { %v3303_v14 = vpop.f32.mrb[176].mxu1 }
 0x85f   : > { %v3577_v58 = vadd.f32 %v6868_v37, %v3303_v14  ;;  %v3305_v51 = vpop.f32.mrb[177].mxu1 }
 0x860   : > { %v3579_v30 = vadd.f32 %v6872_v39, %v3305_v51  ;;  %v3307_v44 = vpop.f32.mrb[178].mxu1 }
 0x861   : > { %v3699_v27 = vadd.f32 %v6786_v56, %v3577_v58  ;;  %v3581_v18 = vadd.f32 %v6876_v41, %v3307_v44  ;;  %v3309_v28 = vpop.f32.mrb[179].mxu1 }
 0x862   : > { %v3700_v24 = vadd.f32 %v6788_v16, %v3579_v30  ;;  %v3583_v23 = vadd.f32 %v6879_v5, %v3309_v28 }
 0x863   : > { %3763 = vst [vmem:[%s6796_s30 + $0x100] sm:$0xff] %v3699_v27  ;;  %v3701_v52 = vadd.f32 %v6786_v56, %v3581_v18 }
 0x864   : > { %3764 = vst [vmem:[%s6796_s30 + $0x108] sm:$0xff] %v3700_v24  ;;  %v3702_v37 = vadd.f32 %v6788_v16, %v3583_v23 }
 0x865   : > { %3765 = vst [vmem:[%s6796_s30 + $0x110] sm:$0xff] %v3701_v52 }
 0x866   : > { %3766 = vst [vmem:[%s6796_s30 + $0x118] sm:$0xff] %v3702_v37  ;;  %v3313_v39 = vpop.f32.mrb[180].mxu1 }
 0x867   : > { %v3587_v41 = vadd.f32 %v6888_v9, %v3313_v39  ;;  %v3315_v49 = vpop.f32.mrb[181].mxu1 }
 0x868   : > { %v3589_v53 = vadd.f32 %v6892_v10, %v3315_v49  ;;  %v3317_v50 = vpop.f32.mrb[182].mxu1 }
 0x869   : > { %v3703_v5 = vadd.f32 %v6786_v56, %v3587_v41  ;;  %v3591_v2 = vadd.f32 %v6896_v59, %v3317_v50  ;;  %v3319_v38 = vpop.f32.mrb[183].mxu1 }
 0x86a   : > { %v3704_v60 = vadd.f32 %v6788_v16, %v3589_v53  ;;  %v3593_v29 = vadd.f32 %v6899_v40, %v3319_v38 }
 0x86b   : > { %3767 = vst [vmem:[%s6796_s30 + $0x120] sm:$0xff] %v3703_v5  ;;  %v3705_v13 = vadd.f32 %v6786_v56, %v3591_v2 }
 0x86c   : > { %3768 = vst [vmem:[%s6796_s30 + $0x128] sm:$0xff] %v3704_v60  ;;  %v3706_v9 = vadd.f32 %v6788_v16, %v3593_v29 }
 0x86d   : > { %3769 = vst [vmem:[%s6796_s30 + $0x130] sm:$0xff] %v3705_v13 }
 0x86e   : > { %3770 = vst [vmem:[%s6796_s30 + $0x138] sm:$0xff] %v3706_v9  ;;  %v3323_v10 = vpop.f32.mrb[184].mxu1 }
 0x86f   : > { %v3597_v59 = vadd.f32 %v6908_v17, %v3323_v10  ;;  %v3325_v11 = vpop.f32.mrb[185].mxu1 }
 0x870   : > { %v3599_v62 = vadd.f32 %v6912_v20, %v3325_v11  ;;  %v3327_v1 = vpop.f32.mrb[186].mxu1 }
 0x871   : > { %v3707_v40 = vadd.f32 %v6786_v56, %v3597_v59  ;;  %v3601_v45 = vadd.f32 %v6916_v47, %v3327_v1  ;;  %v3329_v19 = vpop.f32.mrb[187].mxu1 }
 0x872   : > { %v3708_v42 = vadd.f32 %v6788_v16, %v3599_v62  ;;  %v3603_v12 = vadd.f32 %v6919_v6, %v3329_v19 }
 0x873   : > { %3771 = vst [vmem:[%s6796_s30 + $0x140] sm:$0xff] %v3707_v40  ;;  %v3709_v48 = vadd.f32 %v6786_v56, %v3601_v45 }
 0x874   : > { %3772 = vst [vmem:[%s6796_s30 + $0x148] sm:$0xff] %v3708_v42  ;;  %v3710_v17 = vadd.f32 %v6788_v16, %v3603_v12 }
 0x875   : > { %3773 = vst [vmem:[%s6796_s30 + $0x150] sm:$0xff] %v3709_v48 }
 0x876   : > { %3774 = vst [vmem:[%s6796_s30 + $0x158] sm:$0xff] %v3710_v17  ;;  %v3333_v20 = vpop.f32.mrb[188].mxu1 }
 0x877   : > { %v3607_v47 = vadd.f32 %v6928_v36, %v3333_v20  ;;  %v3335_v8 = vpop.f32.mrb[189].mxu1 }
 0x878   : > { %v3609_v21 = vadd.f32 %v6932_v46, %v3335_v8  ;;  %v3337_v32 = vpop.f32.mrb[190].mxu1 }
 0x879   : > { %v3711_v6 = vadd.f32 %v6786_v56, %v3607_v47  ;;  %v3611_v63 = vadd.f32 %v6936_v34, %v3337_v32  ;;  %v3339_v15 = vpop.f32.mrb[191].mxu1 }
 0x87a   : > { %v3712_v26 = vadd.f32 %v6788_v16, %v3609_v21  ;;  %v3613_v25 = vadd.f32 %v6939_v31, %v3339_v15 }
 0x87b   : > { %3775 = vst [vmem:[%s6796_s30 + $0x160] sm:$0xff] %v3711_v6  ;;  %v3713_v3 = vadd.f32 %v6786_v56, %v3611_v63 }
 0x87c   : > { %3776 = vst [vmem:[%s6796_s30 + $0x168] sm:$0xff] %v3712_v26  ;;  %v3714_v57 = vadd.f32 %v6788_v16, %v3613_v25 }
 0x87d   : > { %3777 = vst [vmem:[%s6796_s30 + $0x170] sm:$0xff] %v3713_v3 }
 0x87e   : > { %3778 = vst [vmem:[%s6796_s30 + $0x178] sm:$0xff] %v3714_v57 }
 0x886   : > { %v3343_v36 = vpop.f32.mrb[192].mxu1 }
 0x887   : > { %v3617_v55 = vadd.f32 %v6942_v0, %v3343_v36  ;;  %v3345_v46 = vpop.f32.mrb[193].mxu1 }
 0x888   : > { %v3619_v33 = vadd.f32 %v6944_v22, %v3345_v46  ;;  %v3347_v34 = vpop.f32.mrb[194].mxu1 }
 0x889   : > { %v3715_v31 = vadd.f32 %v6786_v56, %v3617_v55  ;;  %v3621_v14 = vadd.f32 %v6946_v61, %v3347_v34  ;;  %v3349_v58 = vpop.f32.mrb[195].mxu1 }
 0x88a   : > { %v3716_v51 = vadd.f32 %v6788_v16, %v3619_v33  ;;  %v3623_v30 = vadd.f32 %v6948_v7, %v3349_v58 }
 0x88b   : > { %3779 = vst [vmem:[%s6796_s30 + $0x180] sm:$0xff] %v3715_v31  ;;  %v3717_v44 = vadd.f32 %v6786_v56, %v3621_v14 }
 0x88c   : > { %3780 = vst [vmem:[%s6796_s30 + $0x188] sm:$0xff] %v3716_v51  ;;  %v3718_v0 = vadd.f32 %v6788_v16, %v3623_v30 }
 0x88d   : > { %3781 = vst [vmem:[%s6796_s30 + $0x190] sm:$0xff] %v3717_v44 }
 0x88e   : > { %3782 = vst [vmem:[%s6796_s30 + $0x198] sm:$0xff] %v3718_v0  ;;  %v3353_v22 = vpop.f32.mrb[196].mxu1 }
 0x88f   : > { %v3627_v61 = vadd.f32 %v6950_v4, %v3353_v22  ;;  %v3355_v27 = vpop.f32.mrb[197].mxu1 }
 0x890   : > { %v3629_v18 = vadd.f32 %v6952_v35, %v3355_v27  ;;  %v3357_v28 = vpop.f32.mrb[198].mxu1 }
 0x891   : > { %v3719_v7 = vadd.f32 %v6786_v56, %v3627_v61  ;;  %v3631_v24 = vadd.f32 %v6954_v43, %v3357_v28  ;;  %v3359_v23 = vpop.f32.mrb[199].mxu1 }
 0x892   : > { %v3720_v52 = vadd.f32 %v6788_v16, %v3629_v18  ;;  %v3633_v37 = vadd.f32 %v6956_v54, %v3359_v23 }
 0x893   : > { %3783 = vst [vmem:[%s6796_s30 + $0x1a0] sm:$0xff] %v3719_v7  ;;  %v3721_v39 = vadd.f32 %v6786_v56, %v3631_v24 }
 0x894   : > { %3784 = vst [vmem:[%s6796_s30 + $0x1a8] sm:$0xff] %v3720_v52  ;;  %v3722_v4 = vadd.f32 %v6788_v16, %v3633_v37 }
 0x895   : > { %3785 = vst [vmem:[%s6796_s30 + $0x1b0] sm:$0xff] %v3721_v39 }
 0x896   : > { %3786 = vst [vmem:[%s6796_s30 + $0x1b8] sm:$0xff] %v3722_v4 }
 0x8a6   : > { %v3636_v35 = vpop.f32.mrb[200].mxu1 }
 0x8a7   : > { %v3723_v43 = vadd.f32 %v6786_v56, %v3636_v35  ;;  %v3638_v41 = vpop.f32.mrb[201].mxu1 }
 0x8a8   : > { %v3724_v49 = vadd.f32 %v6788_v16, %v3638_v41  ;;  %v3640_v54 = vpop.f32.mrb[202].mxu1 }
 0x8a9   : > { %3787 = vst [vmem:[%s6796_s30 + $0x1c0] sm:$0xff] %v3723_v43  ;;  %v3725_v53 = vadd.f32 %v6786_v56, %v3640_v54  ;;  %v3642_v50 = vpop.f32.mrb[203].mxu1 }
 0x8aa   : > { %3788 = vst [vmem:[%s6796_s30 + $0x1c8] sm:$0xff] %v3724_v49  ;;  %v3726_v5 = vadd.f32 %v6788_v16, %v3642_v50 }
 0x8ab   : > { %3789 = vst [vmem:[%s6796_s30 + $0x1d0] sm:$0xff] %v3725_v53 }
 0x8ac   : > { %3790 = vst [vmem:[%s6796_s30 + $0x1d8] sm:$0xff] %v3726_v5 }
 0x8ae   : > { %v3646_v2 = vpop.f32.mrb[204].mxu1 }
 0x8af   : > { %v3727_v38 = vadd.f32 %v6786_v56, %v3646_v2  ;;  %v3648_v60 = vpop.f32.mrb[205].mxu1 }
 0x8b0   : > { %v3728_v29 = vadd.f32 %v6788_v16, %v3648_v60  ;;  %v3650_v13 = vpop.f32.mrb[206].mxu1 }
 0x8b1   : > { %3791 = vst [vmem:[%s6796_s30 + $0x1e0] sm:$0xff] %v3727_v38  ;;  %v3729_v9 = vadd.f32 %v6786_v56, %v3650_v13  ;;  %v3652_v10 = vpop.f32.mrb[207].mxu1 }
 0x8b2   : > { %3792 = vst [vmem:[%s6796_s30 + $0x1e8] sm:$0xff] %v3728_v29  ;;  %v3730_v59 = vadd.f32 %v6788_v16, %v3652_v10 }
 0x8b3   : > { %3793 = vst [vmem:[%s6796_s30 + $0x1f0] sm:$0xff] %v3729_v9 }
 0x8b4   : > { %3794 = vst [vmem:[%s6796_s30 + $0x1f8] sm:$0xff] %v3730_v59 }
 0x8b5   : > { %5141 = shalt.err (!%p5138_p2)
}
 0x8b6   : > { %s5142_s8 = scalar_lea.hbm %s7047_s26, 8192  ;;  %s5146_s13 = scalar_lea.hbm %s7101_s4, 16384 }
 0x8b7   : > { %p5143_p13 = scmp.ne.s32.totalorder %s7047_s26, %s5142_s8  ;;  %p5147_p4 = scmp.lt.u32.totalorder %s7047_s26, %s7101_s4 }
 0x8b8   : > { %p5148_p7 = scmp.lt.u32.totalorder %s5146_s13, %s5142_s8  ;;  %p5150_p11 = scmp.lt.u32.totalorder %s5142_s8, %s7047_s26 }
 0x8b9   : > { %p5144_p6 = pnand %p5143_p13, %p7344_p0 }
 0x8ba   : > { %p5149_p8 = por %p5148_p7, %p5147_p4 }
 0x8bb   : > { %p5145_p10 = pneg %p5144_p6 }
 0x8bc   : > { %p5151_p1 = por %p5150_p11, %p5149_p8 }
 0x8be   : > { %p5152_p3 = pnand %p5151_p1, %p5145_p10 }
 0x8c0   : > { %5155 = shalt.err (!%p5152_p3)
}
 0x8c1   : > { %s5211_s30 = smov 256   ;;  %s5212_s6 = smov 16  }
 0x8c2   : > { %4528 = dma.vmem_to_hbm [thread:$0]  (%p7344_p0), %s7049_s25, 8192, %s7047_s26, %s3796_s19, %s5211_s30, %s5211_s30, %s5212_s6  }
 0x8c3 PF: > { %s3825_s7 = sand.u32 1, %s5186_s15   ;;  %p7345_p5 = scmp.ne.s32.totalorder %s7170_s22, 0 }
 0x8c4   : > { %p7346_p9 = scmp.ge.s32.totalorder %s5198_s18, 2  ;;  %s3826_s24 = scalar_lea.sflag [#allocation4], %s3825_s7 }
 0x8c6   : > { %p4542_p12 = pnand %p7346_p9, %p7345_p5 }
 0x8c8   : > { %5181 = dma.done.wait (!%p4542_p12), %s3826_s24, 8192  }
 0x8c9   : > { %5183 = vsyncadd (!%p4542_p12), %s3826_s24, 4294959104  ;;  %p18_p2 = scmp.ge.s32.totalorder %s5348_s11, 4   ;;  %s7347_s15 = smov %s5190_s16 }
 0x8ca   : > { %s7348_s16 = smov %s5194_s17  ;;  %s7349_s17 = smov %s5357_s14 }
 0x8cb   : > { %s7350_s18 = smov %s5348_s11  ;;  %20 = sbr.rel (!%p18_p2) target bundleno = 6 (0x6), region = 90 }
 0x8d2   :  { %3831 = vsyncpa [#allocation3], 1 }
 0x8d3   :  { %3833 = vsyncpa [#allocation3 + $0x1], 1 }
 0x8d4   :  { %3834 = vsyncpa [#allocation6], 1 }
 0x8d5   :  { %3835 = vsyncpa [#allocation4], 1 }
 0x8d6   :  { %3837 = vsyncpa [#allocation4 + $0x1], 1 }

</bundles_post_ra>
